<compile_context>
chip_gen: v7x
topology: tpu7x:2x2x1
jax: 0.10.0
libtpu: 0.0.40
codegen_flags: <defaults>
</compile_context>

<pallas_src>
import functools

import jax
import jax.numpy as jnp
from jax import lax
from jax.experimental import pallas as pl
from jax.experimental.pallas import tpu as pltpu

ODE_UNFOLDS = 6
_LANE = 128


@functools.lru_cache(maxsize=1)
def _tpu_generation():
    """Best-effort TPU generation from device_kind (0 if unknown)."""
    try:
        kind = jax.devices()[0].device_kind.lower()
    except Exception:
        return 0
    for g in (7, 6, 5, 4, 3):
        if f"v{g}" in kind or f"tpu{g}" in kind:
            return g
    return 0


def _round_up(x, m):
    return (x + m - 1) // m * m


def _make_kernel(n_pre, compute_dtype):
    """Kernel body specialized on the (static) padded presynaptic unit count."""
    cdt = compute_dtype

    def kernel(
        inp_ref,    # [Bt, Ir]  f32 (already affine-mapped)
        st_ref,     # [Bt, Np]  f32
        smu_ref,    # [Ir, Np]  cdt
        ssigh_ref,  # [Ir, Np]  cdt   0.5*sensory_sigma
        swh_ref,    # [Ir, Np]  cdt   0.5*sensory_W
        sweh_ref,   # [Ir, Np]  cdt   0.5*sensory_W*sensory_erev
        mu_ref,     # [Nr, Np]  cdt
        sigh_ref,   # [Nr, Np]  cdt   0.5*sigma
        wh_ref,     # [Nr, Np]  cdt   0.5*W
        weh_ref,    # [Nr, Np]  cdt   0.5*W*erev
        cm_ref,     # [1, Np]   f32
        bnum_ref,   # [1, Np]   f32   gleak*vleak + sum(WEh) + sum(sWEh)
        bden_ref,   # [1, Np]   f32   gleak + cm  + sum(Wh)  + sum(sWh)
        out_ref,    # [Bt, Np]  f32
    ):
        f32 = jnp.float32

        # ---- Sensory synapses (once per grid step, outside the unfolds) -----
        x = inp_ref[...].astype(cdt)                                   # (Bt, Ir)
        t_s = jnp.tanh(ssigh_ref[...][None] * (x[:, :, None] - smu_ref[...][None]))
        num0 = bnum_ref[...] + jnp.sum(sweh_ref[...][None] * t_s, axis=1, dtype=f32)
        den0 = bden_ref[...] + jnp.sum(swh_ref[...][None] * t_s, axis=1, dtype=f32)

        # ---- Hoisted loop invariants ----------------------------------------
        mu_b = mu_ref[...][None]                                       # (1, Nr, Np)
        sigh_b = sigh_ref[...][None]
        wh_b = wh_ref[...][None]
        weh_b = weh_ref[...][None]
        cm_t = cm_ref[...]                                             # (1, Np)

        v0 = st_ref[...]                                               # (Bt, Np) f32

        # ---- Semi-implicit ODE unfolds --------------------------------------
        def body(_, v):
            pre = v if n_pre == v.shape[-1] else v[:, :n_pre]          # (Bt, Nr)
            pre = pre.astype(cdt)
            t = jnp.tanh(sigh_b * (pre[:, :, None] - mu_b))            # (Bt, Nr, Np)
            w_num = jnp.sum(weh_b * t, axis=1, dtype=f32)              # (Bt, Np) f32
            w_den = jnp.sum(wh_b * t, axis=1, dtype=f32)
            return (cm_t * v + num0 + w_num) / (den0 + w_den)

        v = lax.fori_loop(0, ODE_UNFOLDS, body, v0, unroll=True)
        out_ref[...] = v.astype(out_ref.dtype)

    return kernel


def _pick_batch_tile(B, Ir, Nr, Np, itemsize, budget_bytes, min_programs):
    """Batch tile (multiple of 8) from a dtype-aware VMEM budget; pads batch."""
    per_row = (4 * Nr * Np + 2 * Ir * Np) * itemsize + 12 * Np * 4 + 4 * Ir
    bt = (budget_bytes // max(per_row, 1)) // 8 * 8
    b_pad = _round_up(max(B, 8), 8)
    bt = max(8, min(bt, b_pad))
    Bp = _round_up(b_pad, bt)
    if Bp // bt < min_programs:
        bt = max(8, _round_up(-(-b_pad // min_programs), 8))
        Bp = _round_up(max(b_pad, bt * min_programs), bt)
    return bt, Bp


def liquidnet_forward(inputs, state, params, *, compute_dtype=None):
    """Pallas-backed LiquidNet step. Returns (outputs, next_state), both [B, N].

    compute_dtype: dtype of the (Bt, pre, post) temporaries. Default (None)
    auto-selects bf16 on v6e/v7x (f32 accumulation kept) and f32 elsewhere.
    """
    B, I = inputs.shape
    _, N = state.shape
    f32 = jnp.float32

    gen = _tpu_generation()
    if compute_dtype is None:
        compute_dtype = jnp.bfloat16 if gen >= 6 else jnp.float32
    cdt = jnp.dtype(compute_dtype)
    csz = cdt.itemsize

    # Padded extents: lane-dense post axis, sublane-dense pre axes.
    sub = 8 * max(1, 4 // csz)           # 8 sublanes for f32, 16 for bf16
    Np = _round_up(N, _LANE)
    Nr = _round_up(N, sub)
    Ir = _round_up(I, sub)

    def pad2(x, rows, cols, fill=0.0):
        x = jnp.asarray(x, f32)
        pr, pc = rows - x.shape[0], cols - x.shape[1]
        if pr == 0 and pc == 0:
            return x
        return jnp.pad(x, ((0, pr), (0, pc)), constant_values=fill)

    # Affine input mapping (w=ones, b=zeros in the module) applied here — keeps
    # the kernel free of two operands/DMAs while preserving semantics.
    inp = inputs.astype(f32) * params["input_w"].astype(f32) + params["input_b"].astype(f32)

    # Padded columns: W/sigma/mu/erev = 0 (contribute nothing), gleak = cm = 1,
    # vleak = 0 so padded state lanes stay finite. Padded pre rows have W = 0.
    W = pad2(params["W"], Nr, Np)
    erev = pad2(params["erev"], Nr, Np)
    mu = pad2(params["mu"], Nr, Np)
    sig = pad2(params["sigma"], Nr, Np)
    sW = pad2(params["sensory_W"], Ir, Np)
    serev = pad2(params["sensory_erev"], Ir, Np)
    smu = pad2(params["sensory_mu"], Ir, Np)
    ssig = pad2(params["sensory_sigma"], Ir, Np)
    vleak = pad2(params["vleak"], 1, Np, 0.0)
    gleak = pad2(params["gleak"], 1, Np, 1.0)
    cm_t = pad2(params["cm_t"], 1, Np, 1.0)

    # ---- Algebraic fold (f32, then cast the matrices to compute dtype) ------
    # W*sigmoid(sigma*(v-mu)) == 0.5*W*tanh(0.5*sigma*(v-mu)) + 0.5*W
    wh, sigh = 0.5 * W, 0.5 * sig
    weh = wh * erev
    swh, ssigh = 0.5 * sW, 0.5 * ssig
    sweh = swh * serev
    base_num = (gleak * vleak + jnp.sum(weh, axis=0, keepdims=True)
                + jnp.sum(sweh, axis=0, keepdims=True))
    base_den = (gleak + cm_t + jnp.sum(wh, axis=0, keepdims=True)
                + jnp.sum(swh, axis=0, keepdims=True))
    mu_c, sigh_c, wh_c, weh_c = (a.astype(cdt) for a in (mu, sigh, wh, weh))
    smu_c, ssigh_c, swh_c, sweh_c = (a.astype(cdt) for a in (smu, ssigh, swh, sweh))

    # ---- Per-generation batch tiling / VMEM budget ---------------------------
    cap_mib = {7: 64, 6: 128, 5: 128, 4: 128}.get(gen, 64)
    tile_budget = (24 if cap_mib >= 128 else 8) << 20
    min_programs = 2 if gen >= 7 else 1          # use both v7x TensorCores
    bt, Bp = _pick_batch_tile(B, Ir, Nr, Np, csz, tile_budget, min_programs)

    inp = jnp.pad(inp, ((0, Bp - B), (0, Ir - I)))
    st = jnp.pad(state.astype(f32), ((0, Bp - B), (0, Np - N)))

    io_bytes = 2 * (bt * Ir * 4 + 2 * bt * Np * 4)                 # pipelined row tiles
    param_bytes = (4 * Nr * Np + 4 * Ir * Np) * csz + 3 * Np * 4   # resident params
    temp_bytes = (4 * bt * Nr * Np + 2 * bt * Ir * Np) * csz + 10 * bt * Np * 4
    single_buffer_params = param_bytes > (1 << 20)                 # only when it matters
    pbuf = 1 if single_buffer_params else 2
    est = io_bytes + pbuf * param_bytes + temp_bytes
    vmem_limit = int(min(max(int(1.5 * est) + (4 << 20), 32 << 20),
                         (cap_mib << 20) * 3 // 4))

    kernel = _make_kernel(Nr, cdt)
    grid = (Bp // bt,)
    operands = (inp, st, smu_c, ssigh_c, swh_c, sweh_c,
                mu_c, sigh_c, wh_c, weh_c, cm_t, base_num, base_den)

    def run(use_single_buffer):
        def row_spec(shape):
            return pl.BlockSpec(shape, lambda b: (b, 0))

        def const_spec(shape):
            if use_single_buffer:
                # Constant index_map -> block never changes; single buffer halves
                # resident-param VMEM (matters for large N on v7x's 64 MiB).
                return pl.BlockSpec(shape, lambda b: (0, 0),
                                    pipeline_mode=pl.Buffered(1))
            return pl.BlockSpec(shape, lambda b: (0, 0))

        in_specs = [
            row_spec((bt, Ir)),        # inputs
            row_spec((bt, Np)),        # state
            const_spec((Ir, Np)),      # sensory mu
            const_spec((Ir, Np)),      # sensory 0.5*sigma
            const_spec((Ir, Np)),      # sensory 0.5*W
            const_spec((Ir, Np)),      # sensory 0.5*W*erev
            const_spec((Nr, Np)),      # mu
            const_spec((Nr, Np)),      # 0.5*sigma
            const_spec((Nr, Np)),      # 0.5*W
            const_spec((Nr, Np)),      # 0.5*W*erev
            const_spec((1, Np)),       # cm_t
            const_spec((1, Np)),       # base numerator
            const_spec((1, Np)),       # base denominator
        ]
        return pl.pallas_call(
            kernel,
            out_shape=jax.ShapeDtypeStruct((Bp, Np), f32),
            grid=grid,
            in_specs=in_specs,
            out_specs=row_spec((bt, Np)),
            compiler_params=pltpu.CompilerParams(
                dimension_semantics=("parallel",),
                vmem_limit_bytes=vmem_limit,
            ),
        )(*operands)

    if single_buffer_params:
        try:
            out = run(True)
        except Exception:   # older Pallas without pipeline_mode support, etc.
            out = run(False)
    else:
        out = run(False)

    out = out[:B, :N]
    return out, out


def init_params(key, input_size, num_units):
    """Deterministic parameter init mirroring LiquidNet._get_variables()."""
    ks = jax.random.split(key, 10)
    f32 = jnp.float32
    params = {
        # Affine input mapping (ones / zeros, as in _map_inputs).
        "input_w": jnp.ones((1, input_size), f32),
        "input_b": jnp.zeros((1, input_size), f32),
        # Sensory synapses [I, N].
        "sensory_mu": jax.random.uniform(ks[0], (input_size, num_units), f32, 0.3, 0.8),
        "sensory_sigma": jax.random.uniform(ks[1], (input_size, num_units), f32, 3.0, 8.0),
        "sensory_W": jax.random.uniform(ks[2], (input_size, num_units), f32, 0.01, 1.0),
        "sensory_erev": (
            2.0 * jax.random.randint(ks[3], (input_size, num_units), 0, 2).astype(f32) - 1.0
        ),
        # Recurrent synapses [N, N].
        "mu": jax.random.uniform(ks[4], (num_units, num_units), f32, 0.3, 0.8),
        "sigma": jax.random.uniform(ks[5], (num_units, num_units), f32, 3.0, 8.0),
        "W": jax.random.uniform(ks[6], (num_units, num_units), f32, 0.01, 1.0),
        "erev": (
            2.0 * jax.random.randint(ks[7], (num_units, num_units), 0, 2).astype(f32) - 1.0
        ),
        # Per-unit parameters, kept as [1, N].
        "vleak": jax.random.uniform(ks[8], (1, num_units), f32, -0.2, 0.2),
        # gleak_init_max == gleak_init_min == 1  -> constant 1.0
        "gleak": jnp.ones((1, num_units), f32),
        # cm_init_max == cm_init_min == 0.5      -> constant 0.5
        "cm_t": jnp.full((1, num_units), 0.5, f32),
    }
    return params


def liquidnet_reference(inputs, state, params):
    """Pure-JAX reference of the PyTorch semi-implicit ODE step (for checking)."""
    inputs = inputs * params["input_w"] + params["input_b"]
    v_pre = state
    x_s = params["sensory_sigma"][None] * (inputs[:, :, None] - params["sensory_mu"][None])
    s_act = params["sensory_W"][None] * jax.nn.sigmoid(x_s)
    w_num_s = jnp.sum(s_act * params["sensory_erev"][None], axis=1)
    w_den_s = jnp.sum(s_act, axis=1)
    for _ in range(ODE_UNFOLDS):
        x_r = params["sigma"][None] * (v_pre[:, :, None] - params["mu"][None])
        w_act = params["W"][None] * jax.nn.sigmoid(x_r)
        w_num = jnp.sum(w_act * params["erev"][None], axis=1) + w_num_s
        w_den = jnp.sum(w_act, axis=1) + w_den_s
        num = params["cm_t"] * v_pre + params["gleak"] * params["vleak"] + w_num
        den = params["cm_t"] + params["gleak"] + w_den
        v_pre = num / den
    return v_pre


if __name__ == "__main__":
    B, I, N = 2, 4, 32  # batch, input features, num_units

    key = jax.random.PRNGKey(0)
    k_in, k_st, k_p = jax.random.split(key, 3)
    inputs = jax.random.normal(k_in, (B, I), jnp.float32)
    state = jax.random.normal(k_st, (B, N), jnp.float32)
    params = init_params(k_p, I, N)

    ref = liquidnet_reference(inputs, state, params)

    # Strict check with f32 compute.
    out_f32, _ = liquidnet_forward(inputs, state, params, compute_dtype=jnp.float32)
    out_f32 = jax.block_until_ready(out_f32)
    assert out_f32.shape == (B, N)
    assert jnp.allclose(out_f32, ref, atol=1e-5, rtol=1e-4), "f32 mismatch vs reference"

    # Auto (chip-dependent; bf16 temporaries on v6e/v7x) — loose tolerance check.
    outputs, next_state = liquidnet_forward(inputs, state, params)
    outputs = jax.block_until_ready(outputs)
    assert outputs.shape == (B, N)
    assert bool(jnp.all(jnp.isfinite(outputs)))
    assert jnp.allclose(outputs, ref, atol=5e-2, rtol=5e-2), "auto-dtype mismatch vs reference"

    print("KERNEL_OK")
</pallas_src>

<mosaic_0001>
module attributes {stable_mosaic.version = 11 : i64} {
  func.func @kernel(%arg0: i32, %arg1: memref<8x8xf32, #tpu.memory_space<vmem>>, %arg2: memref<8x128xf32, #tpu.memory_space<vmem>>, %arg3: memref<8x128xf32, #tpu.memory_space<vmem>>, %arg4: memref<8x128xf32, #tpu.memory_space<vmem>>, %arg5: memref<8x128xf32, #tpu.memory_space<vmem>>, %arg6: memref<8x128xf32, #tpu.memory_space<vmem>>, %arg7: memref<32x128xf32, #tpu.memory_space<vmem>>, %arg8: memref<32x128xf32, #tpu.memory_space<vmem>>, %arg9: memref<32x128xf32, #tpu.memory_space<vmem>>, %arg10: memref<32x128xf32, #tpu.memory_space<vmem>>, %arg11: memref<1x128xf32, #tpu.memory_space<vmem>>, %arg12: memref<1x128xf32, #tpu.memory_space<vmem>>, %arg13: memref<1x128xf32, #tpu.memory_space<vmem>>, %arg14: memref<8x128xf32, #tpu.memory_space<vmem>>) attributes {dimension_semantics = [#tpu.dimension_semantics<parallel>], iteration_bounds = array<i64: 1>, scalar_prefetch = 0 : i64, scratch_operands = 0 : i64, tpu.core_type = #tpu.core_type<tc>, window_params = [{transform_indices = @transform_0, window_bounds = array<i64: 8, 8>}, {transform_indices = @transform_1, window_bounds = array<i64: 8, 128>}, {pipeline_mode = #tpu.pipeline_mode<synchronous>, transform_indices = @transform_2, window_bounds = array<i64: 8, 128>}, {pipeline_mode = #tpu.pipeline_mode<synchronous>, transform_indices = @transform_3, window_bounds = array<i64: 8, 128>}, {pipeline_mode = #tpu.pipeline_mode<synchronous>, transform_indices = @transform_4, window_bounds = array<i64: 8, 128>}, {pipeline_mode = #tpu.pipeline_mode<synchronous>, transform_indices = @transform_5, window_bounds = array<i64: 8, 128>}, {pipeline_mode = #tpu.pipeline_mode<synchronous>, transform_indices = @transform_6, window_bounds = array<i64: 32, 128>}, {pipeline_mode = #tpu.pipeline_mode<synchronous>, transform_indices = @transform_7, window_bounds = array<i64: 32, 128>}, {pipeline_mode = #tpu.pipeline_mode<synchronous>, transform_indices = @transform_8, window_bounds = array<i64: 32, 128>}, {pipeline_mode = #tpu.pipeline_mode<synchronous>, transform_indices = @transform_9, window_bounds = array<i64: 32, 128>}, {pipeline_mode = #tpu.pipeline_mode<synchronous>, transform_indices = @transform_10, window_bounds = array<i64: 1, 128>}, {pipeline_mode = #tpu.pipeline_mode<synchronous>, transform_indices = @transform_11, window_bounds = array<i64: 1, 128>}, {pipeline_mode = #tpu.pipeline_mode<synchronous>, transform_indices = @transform_12, window_bounds = array<i64: 1, 128>}, {transform_indices = @transform_13, window_bounds = array<i64: 8, 128>}]} {
    %c0 = arith.constant 0 : index
    %c0_0 = arith.constant 0 : index
    %0 = vector.load %arg1[%c0, %c0_0] : memref<8x8xf32, #tpu.memory_space<vmem>>, vector<8x8xf32>
    %c0_1 = arith.constant 0 : index
    %c0_2 = arith.constant 0 : index
    %1 = vector.load %arg4[%c0_1, %c0_2] : memref<8x128xf32, #tpu.memory_space<vmem>>, vector<8x128xf32>
    %2 = vector.shape_cast %1 : vector<8x128xf32> to vector<1x8x128xf32>
    %3 = vector.shape_cast %0 : vector<8x8xf32> to vector<8x8x1xf32>
    %c0_3 = arith.constant 0 : index
    %c0_4 = arith.constant 0 : index
    %4 = vector.load %arg3[%c0_3, %c0_4] : memref<8x128xf32, #tpu.memory_space<vmem>>, vector<8x128xf32>
    %5 = vector.shape_cast %4 : vector<8x128xf32> to vector<1x8x128xf32>
    %6 = vector.broadcast %3 : vector<8x8x1xf32> to vector<8x8x128xf32>
    %7 = vector.broadcast %5 : vector<1x8x128xf32> to vector<8x8x128xf32>
    %8 = arith.subf %6, %7 : vector<8x8x128xf32>
    %9 = vector.broadcast %2 : vector<1x8x128xf32> to vector<8x8x128xf32>
    %10 = arith.mulf %9, %8 : vector<8x8x128xf32>
    %11 = math.tanh %10 : vector<8x8x128xf32>
    %c0_5 = arith.constant 0 : index
    %c0_6 = arith.constant 0 : index
    %12 = vector.load %arg12[%c0_5, %c0_6] : memref<1x128xf32, #tpu.memory_space<vmem>>, vector<1x128xf32>
    %c0_7 = arith.constant 0 : index
    %c0_8 = arith.constant 0 : index
    %13 = vector.load %arg6[%c0_7, %c0_8] : memref<8x128xf32, #tpu.memory_space<vmem>>, vector<8x128xf32>
    %14 = vector.shape_cast %13 : vector<8x128xf32> to vector<1x8x128xf32>
    %15 = vector.broadcast %14 : vector<1x8x128xf32> to vector<8x8x128xf32>
    %16 = arith.mulf %15, %11 : vector<8x8x128xf32>
    %cst = arith.constant dense<0.000000e+00> : vector<8x128xf32>
    %17 = vector.multi_reduction <add>, %16, %cst [1] : vector<8x8x128xf32> to vector<8x128xf32>
    %18 = vector.broadcast %12 : vector<1x128xf32> to vector<8x128xf32>
    %19 = arith.addf %18, %17 : vector<8x128xf32>
    %c0_9 = arith.constant 0 : index
    %c0_10 = arith.constant 0 : index
    %20 = vector.load %arg13[%c0_9, %c0_10] : memref<1x128xf32, #tpu.memory_space<vmem>>, vector<1x128xf32>
    %c0_11 = arith.constant 0 : index
    %c0_12 = arith.constant 0 : index
    %21 = vector.load %arg5[%c0_11, %c0_12] : memref<8x128xf32, #tpu.memory_space<vmem>>, vector<8x128xf32>
    %22 = vector.shape_cast %21 : vector<8x128xf32> to vector<1x8x128xf32>
    %23 = vector.broadcast %22 : vector<1x8x128xf32> to vector<8x8x128xf32>
    %24 = arith.mulf %23, %11 : vector<8x8x128xf32>
    %cst_13 = arith.constant dense<0.000000e+00> : vector<8x128xf32>
    %25 = vector.multi_reduction <add>, %24, %cst_13 [1] : vector<8x8x128xf32> to vector<8x128xf32>
    %26 = vector.broadcast %20 : vector<1x128xf32> to vector<8x128xf32>
    %27 = arith.addf %26, %25 : vector<8x128xf32>
    %c0_14 = arith.constant 0 : index
    %c0_15 = arith.constant 0 : index
    %28 = vector.load %arg7[%c0_14, %c0_15] : memref<32x128xf32, #tpu.memory_space<vmem>>, vector<32x128xf32>
    %29 = vector.shape_cast %28 : vector<32x128xf32> to vector<1x32x128xf32>
    %c0_16 = arith.constant 0 : index
    %c0_17 = arith.constant 0 : index
    %30 = vector.load %arg8[%c0_16, %c0_17] : memref<32x128xf32, #tpu.memory_space<vmem>>, vector<32x128xf32>
    %31 = vector.shape_cast %30 : vector<32x128xf32> to vector<1x32x128xf32>
    %c0_18 = arith.constant 0 : index
    %c0_19 = arith.constant 0 : index
    %32 = vector.load %arg9[%c0_18, %c0_19] : memref<32x128xf32, #tpu.memory_space<vmem>>, vector<32x128xf32>
    %33 = vector.shape_cast %32 : vector<32x128xf32> to vector<1x32x128xf32>
    %c0_20 = arith.constant 0 : index
    %c0_21 = arith.constant 0 : index
    %34 = vector.load %arg10[%c0_20, %c0_21] : memref<32x128xf32, #tpu.memory_space<vmem>>, vector<32x128xf32>
    %35 = vector.shape_cast %34 : vector<32x128xf32> to vector<1x32x128xf32>
    %c0_22 = arith.constant 0 : index
    %c0_23 = arith.constant 0 : index
    %36 = vector.load %arg11[%c0_22, %c0_23] : memref<1x128xf32, #tpu.memory_space<vmem>>, vector<1x128xf32>
    %c0_24 = arith.constant 0 : index
    %c0_25 = arith.constant 0 : index
    %37 = vector.load %arg2[%c0_24, %c0_25] : memref<8x128xf32, #tpu.memory_space<vmem>>, vector<8x128xf32>
    %c0_i32 = arith.constant 0 : i32
    %38 = vector.extract_strided_slice %37 {offsets = [0, 0], sizes = [8, 32], strides = [1, 1]} : vector<8x128xf32> to vector<8x32xf32>
    %39 = vector.shape_cast %38 : vector<8x32xf32> to vector<8x32x1xf32>
    %40 = vector.broadcast %39 : vector<8x32x1xf32> to vector<8x32x128xf32>
    %41 = vector.broadcast %29 : vector<1x32x128xf32> to vector<8x32x128xf32>
    %42 = arith.subf %40, %41 : vector<8x32x128xf32>
    %43 = vector.broadcast %31 : vector<1x32x128xf32> to vector<8x32x128xf32>
    %44 = arith.mulf %43, %42 : vector<8x32x128xf32>
    %45 = math.tanh %44 : vector<8x32x128xf32>
    %46 = vector.broadcast %35 : vector<1x32x128xf32> to vector<8x32x128xf32>
    %47 = arith.mulf %46, %45 : vector<8x32x128xf32>
    %cst_26 = arith.constant dense<0.000000e+00> : vector<8x128xf32>
    %48 = vector.multi_reduction <add>, %47, %cst_26 [1] : vector<8x32x128xf32> to vector<8x128xf32>
    %49 = vector.broadcast %33 : vector<1x32x128xf32> to vector<8x32x128xf32>
    %50 = arith.mulf %49, %45 : vector<8x32x128xf32>
    %cst_27 = arith.constant dense<0.000000e+00> : vector<8x128xf32>
    %51 = vector.multi_reduction <add>, %50, %cst_27 [1] : vector<8x32x128xf32> to vector<8x128xf32>
    %52 = vector.broadcast %36 : vector<1x128xf32> to vector<8x128xf32>
    %53 = arith.mulf %52, %37 : vector<8x128xf32>
    %54 = arith.addf %53, %19 : vector<8x128xf32>
    %55 = arith.addf %54, %48 : vector<8x128xf32>
    %56 = arith.addf %27, %51 : vector<8x128xf32>
    %57 = arith.divf %55, %56 : vector<8x128xf32>
    %c1_i32 = arith.constant 1 : i32
    %58 = vector.extract_strided_slice %57 {offsets = [0, 0], sizes = [8, 32], strides = [1, 1]} : vector<8x128xf32> to vector<8x32xf32>
    %59 = vector.shape_cast %58 : vector<8x32xf32> to vector<8x32x1xf32>
    %60 = vector.broadcast %59 : vector<8x32x1xf32> to vector<8x32x128xf32>
    %61 = vector.broadcast %29 : vector<1x32x128xf32> to vector<8x32x128xf32>
    %62 = arith.subf %60, %61 : vector<8x32x128xf32>
    %63 = vector.broadcast %31 : vector<1x32x128xf32> to vector<8x32x128xf32>
    %64 = arith.mulf %63, %62 : vector<8x32x128xf32>
    %65 = math.tanh %64 : vector<8x32x128xf32>
    %66 = vector.broadcast %35 : vector<1x32x128xf32> to vector<8x32x128xf32>
    %67 = arith.mulf %66, %65 : vector<8x32x128xf32>
    %cst_28 = arith.constant dense<0.000000e+00> : vector<8x128xf32>
    %68 = vector.multi_reduction <add>, %67, %cst_28 [1] : vector<8x32x128xf32> to vector<8x128xf32>
    %69 = vector.broadcast %33 : vector<1x32x128xf32> to vector<8x32x128xf32>
    %70 = arith.mulf %69, %65 : vector<8x32x128xf32>
    %cst_29 = arith.constant dense<0.000000e+00> : vector<8x128xf32>
    %71 = vector.multi_reduction <add>, %70, %cst_29 [1] : vector<8x32x128xf32> to vector<8x128xf32>
    %72 = vector.broadcast %36 : vector<1x128xf32> to vector<8x128xf32>
    %73 = arith.mulf %72, %57 : vector<8x128xf32>
    %74 = arith.addf %73, %19 : vector<8x128xf32>
    %75 = arith.addf %74, %68 : vector<8x128xf32>
    %76 = arith.addf %27, %71 : vector<8x128xf32>
    %77 = arith.divf %75, %76 : vector<8x128xf32>
    %c2_i32 = arith.constant 2 : i32
    %78 = vector.extract_strided_slice %77 {offsets = [0, 0], sizes = [8, 32], strides = [1, 1]} : vector<8x128xf32> to vector<8x32xf32>
    %79 = vector.shape_cast %78 : vector<8x32xf32> to vector<8x32x1xf32>
    %80 = vector.broadcast %79 : vector<8x32x1xf32> to vector<8x32x128xf32>
    %81 = vector.broadcast %29 : vector<1x32x128xf32> to vector<8x32x128xf32>
    %82 = arith.subf %80, %81 : vector<8x32x128xf32>
    %83 = vector.broadcast %31 : vector<1x32x128xf32> to vector<8x32x128xf32>
    %84 = arith.mulf %83, %82 : vector<8x32x128xf32>
    %85 = math.tanh %84 : vector<8x32x128xf32>
    %86 = vector.broadcast %35 : vector<1x32x128xf32> to vector<8x32x128xf32>
    %87 = arith.mulf %86, %85 : vector<8x32x128xf32>
    %cst_30 = arith.constant dense<0.000000e+00> : vector<8x128xf32>
    %88 = vector.multi_reduction <add>, %87, %cst_30 [1] : vector<8x32x128xf32> to vector<8x128xf32>
    %89 = vector.broadcast %33 : vector<1x32x128xf32> to vector<8x32x128xf32>
    %90 = arith.mulf %89, %85 : vector<8x32x128xf32>
    %cst_31 = arith.constant dense<0.000000e+00> : vector<8x128xf32>
    %91 = vector.multi_reduction <add>, %90, %cst_31 [1] : vector<8x32x128xf32> to vector<8x128xf32>
    %92 = vector.broadcast %36 : vector<1x128xf32> to vector<8x128xf32>
    %93 = arith.mulf %92, %77 : vector<8x128xf32>
    %94 = arith.addf %93, %19 : vector<8x128xf32>
    %95 = arith.addf %94, %88 : vector<8x128xf32>
    %96 = arith.addf %27, %91 : vector<8x128xf32>
    %97 = arith.divf %95, %96 : vector<8x128xf32>
    %c3_i32 = arith.constant 3 : i32
    %98 = vector.extract_strided_slice %97 {offsets = [0, 0], sizes = [8, 32], strides = [1, 1]} : vector<8x128xf32> to vector<8x32xf32>
    %99 = vector.shape_cast %98 : vector<8x32xf32> to vector<8x32x1xf32>
    %100 = vector.broadcast %99 : vector<8x32x1xf32> to vector<8x32x128xf32>
    %101 = vector.broadcast %29 : vector<1x32x128xf32> to vector<8x32x128xf32>
    %102 = arith.subf %100, %101 : vector<8x32x128xf32>
    %103 = vector.broadcast %31 : vector<1x32x128xf32> to vector<8x32x128xf32>
    %104 = arith.mulf %103, %102 : vector<8x32x128xf32>
    %105 = math.tanh %104 : vector<8x32x128xf32>
    %106 = vector.broadcast %35 : vector<1x32x128xf32> to vector<8x32x128xf32>
    %107 = arith.mulf %106, %105 : vector<8x32x128xf32>
    %cst_32 = arith.constant dense<0.000000e+00> : vector<8x128xf32>
    %108 = vector.multi_reduction <add>, %107, %cst_32 [1] : vector<8x32x128xf32> to vector<8x128xf32>
    %109 = vector.broadcast %33 : vector<1x32x128xf32> to vector<8x32x128xf32>
    %110 = arith.mulf %109, %105 : vector<8x32x128xf32>
    %cst_33 = arith.constant dense<0.000000e+00> : vector<8x128xf32>
    %111 = vector.multi_reduction <add>, %110, %cst_33 [1] : vector<8x32x128xf32> to vector<8x128xf32>
    %112 = vector.broadcast %36 : vector<1x128xf32> to vector<8x128xf32>
    %113 = arith.mulf %112, %97 : vector<8x128xf32>
    %114 = arith.addf %113, %19 : vector<8x128xf32>
    %115 = arith.addf %114, %108 : vector<8x128xf32>
    %116 = arith.addf %27, %111 : vector<8x128xf32>
    %117 = arith.divf %115, %116 : vector<8x128xf32>
    %c4_i32 = arith.constant 4 : i32
    %118 = vector.extract_strided_slice %117 {offsets = [0, 0], sizes = [8, 32], strides = [1, 1]} : vector<8x128xf32> to vector<8x32xf32>
    %119 = vector.shape_cast %118 : vector<8x32xf32> to vector<8x32x1xf32>
    %120 = vector.broadcast %119 : vector<8x32x1xf32> to vector<8x32x128xf32>
    %121 = vector.broadcast %29 : vector<1x32x128xf32> to vector<8x32x128xf32>
    %122 = arith.subf %120, %121 : vector<8x32x128xf32>
    %123 = vector.broadcast %31 : vector<1x32x128xf32> to vector<8x32x128xf32>
    %124 = arith.mulf %123, %122 : vector<8x32x128xf32>
    %125 = math.tanh %124 : vector<8x32x128xf32>
    %126 = vector.broadcast %35 : vector<1x32x128xf32> to vector<8x32x128xf32>
    %127 = arith.mulf %126, %125 : vector<8x32x128xf32>
    %cst_34 = arith.constant dense<0.000000e+00> : vector<8x128xf32>
    %128 = vector.multi_reduction <add>, %127, %cst_34 [1] : vector<8x32x128xf32> to vector<8x128xf32>
    %129 = vector.broadcast %33 : vector<1x32x128xf32> to vector<8x32x128xf32>
    %130 = arith.mulf %129, %125 : vector<8x32x128xf32>
    %cst_35 = arith.constant dense<0.000000e+00> : vector<8x128xf32>
    %131 = vector.multi_reduction <add>, %130, %cst_35 [1] : vector<8x32x128xf32> to vector<8x128xf32>
    %132 = vector.broadcast %36 : vector<1x128xf32> to vector<8x128xf32>
    %133 = arith.mulf %132, %117 : vector<8x128xf32>
    %134 = arith.addf %133, %19 : vector<8x128xf32>
    %135 = arith.addf %134, %128 : vector<8x128xf32>
    %136 = arith.addf %27, %131 : vector<8x128xf32>
    %137 = arith.divf %135, %136 : vector<8x128xf32>
    %c5_i32 = arith.constant 5 : i32
    %138 = vector.extract_strided_slice %137 {offsets = [0, 0], sizes = [8, 32], strides = [1, 1]} : vector<8x128xf32> to vector<8x32xf32>
    %139 = vector.shape_cast %138 : vector<8x32xf32> to vector<8x32x1xf32>
    %140 = vector.broadcast %139 : vector<8x32x1xf32> to vector<8x32x128xf32>
    %141 = vector.broadcast %29 : vector<1x32x128xf32> to vector<8x32x128xf32>
    %142 = arith.subf %140, %141 : vector<8x32x128xf32>
    %143 = vector.broadcast %31 : vector<1x32x128xf32> to vector<8x32x128xf32>
    %144 = arith.mulf %143, %142 : vector<8x32x128xf32>
    %145 = math.tanh %144 : vector<8x32x128xf32>
    %146 = vector.broadcast %35 : vector<1x32x128xf32> to vector<8x32x128xf32>
    %147 = arith.mulf %146, %145 : vector<8x32x128xf32>
    %cst_36 = arith.constant dense<0.000000e+00> : vector<8x128xf32>
    %148 = vector.multi_reduction <add>, %147, %cst_36 [1] : vector<8x32x128xf32> to vector<8x128xf32>
    %149 = vector.broadcast %33 : vector<1x32x128xf32> to vector<8x32x128xf32>
    %150 = arith.mulf %149, %145 : vector<8x32x128xf32>
    %cst_37 = arith.constant dense<0.000000e+00> : vector<8x128xf32>
    %151 = vector.multi_reduction <add>, %150, %cst_37 [1] : vector<8x32x128xf32> to vector<8x128xf32>
    %152 = vector.broadcast %36 : vector<1x128xf32> to vector<8x128xf32>
    %153 = arith.mulf %152, %137 : vector<8x128xf32>
    %154 = arith.addf %153, %19 : vector<8x128xf32>
    %155 = arith.addf %154, %148 : vector<8x128xf32>
    %156 = arith.addf %27, %151 : vector<8x128xf32>
    %157 = arith.divf %155, %156 : vector<8x128xf32>
    %c0_38 = arith.constant 0 : index
    %c0_39 = arith.constant 0 : index
    %158 = vector.load %arg14[%c0_38, %c0_39] : memref<8x128xf32, #tpu.memory_space<vmem>>, vector<8x128xf32>
    tpu.vector_store %arg14[%c0_38, %c0_39], %157 {strides = array<i32>} : memref<8x128xf32, #tpu.memory_space<vmem>>, vector<8x128xf32>,
    return
  }
  func.func @transform_0(%arg0: i32) -> (i32, i32) {
    %c0_i32 = arith.constant 0 : i32
    %c0_i32_0 = arith.constant 0 : i32
    return %arg0, %c0_i32 : i32, i32
  }
  func.func @transform_1(%arg0: i32) -> (i32, i32) {
    %c0_i32 = arith.constant 0 : i32
    %c0_i32_0 = arith.constant 0 : i32
    return %arg0, %c0_i32 : i32, i32
  }
  func.func @transform_2(%arg0: i32) -> (i32, i32) {
    %c0_i32 = arith.constant 0 : i32
    %c0_i32_0 = arith.constant 0 : i32
    %c0_i32_1 = arith.constant 0 : i32
    return %c0_i32, %c0_i32_0 : i32, i32
  }
  func.func @transform_3(%arg0: i32) -> (i32, i32) {
    %c0_i32 = arith.constant 0 : i32
    %c0_i32_0 = arith.constant 0 : i32
    %c0_i32_1 = arith.constant 0 : i32
    return %c0_i32, %c0_i32_0 : i32, i32
  }
  func.func @transform_4(%arg0: i32) -> (i32, i32) {
    %c0_i32 = arith.constant 0 : i32
    %c0_i32_0 = arith.constant 0 : i32
    %c0_i32_1 = arith.constant 0 : i32
    return %c0_i32, %c0_i32_0 : i32, i32
  }
  func.func @transform_5(%arg0: i32) -> (i32, i32) {
    %c0_i32 = arith.constant 0 : i32
    %c0_i32_0 = arith.constant 0 : i32
    %c0_i32_1 = arith.constant 0 : i32
    return %c0_i32, %c0_i32_0 : i32, i32
  }
  func.func @transform_6(%arg0: i32) -> (i32, i32) {
    %c0_i32 = arith.constant 0 : i32
    %c0_i32_0 = arith.constant 0 : i32
    %c0_i32_1 = arith.constant 0 : i32
    return %c0_i32, %c0_i32_0 : i32, i32
  }
  func.func @transform_7(%arg0: i32) -> (i32, i32) {
    %c0_i32 = arith.constant 0 : i32
    %c0_i32_0 = arith.constant 0 : i32
    %c0_i32_1 = arith.constant 0 : i32
    return %c0_i32, %c0_i32_0 : i32, i32
  }
  func.func @transform_8(%arg0: i32) -> (i32, i32) {
    %c0_i32 = arith.constant 0 : i32
    %c0_i32_0 = arith.constant 0 : i32
    %c0_i32_1 = arith.constant 0 : i32
    return %c0_i32, %c0_i32_0 : i32, i32
  }
  func.func @transform_9(%arg0: i32) -> (i32, i32) {
    %c0_i32 = arith.constant 0 : i32
    %c0_i32_0 = arith.constant 0 : i32
    %c0_i32_1 = arith.constant 0 : i32
    return %c0_i32, %c0_i32_0 : i32, i32
  }
  func.func @transform_10(%arg0: i32) -> (i32, i32) {
    %c0_i32 = arith.constant 0 : i32
    %c0_i32_0 = arith.constant 0 : i32
    %c0_i32_1 = arith.constant 0 : i32
    return %c0_i32, %c0_i32_0 : i32, i32
  }
  func.func @transform_11(%arg0: i32) -> (i32, i32) {
    %c0_i32 = arith.constant 0 : i32
    %c0_i32_0 = arith.constant 0 : i32
    %c0_i32_1 = arith.constant 0 : i32
    return %c0_i32, %c0_i32_0 : i32, i32
  }
  func.func @transform_12(%arg0: i32) -> (i32, i32) {
    %c0_i32 = arith.constant 0 : i32
    %c0_i32_0 = arith.constant 0 : i32
    %c0_i32_1 = arith.constant 0 : i32
    return %c0_i32, %c0_i32_0 : i32, i32
  }
  func.func @transform_13(%arg0: i32) -> (i32, i32) {
    %c0_i32 = arith.constant 0 : i32
    %c0_i32_0 = arith.constant 0 : i32
    return %arg0, %c0_i32 : i32, i32
  }
}

</mosaic_0001>

<bundles_post_ra>
// kernel: tpu_custom_call.1
= control target key start
LH: loop header
LB: loop body
LE: loop exit
PB: predicated region body
PF: predicated region fallthrough
CT: control target
= control target key end

     0   :  { %18 = vsyncpa [#allocation3], 0  ;;  %s6068_s0 = inlined_call_operand.hbm [shape: f32[8,8], index: 0, kind: input, shape index: {}]   ;;  %s6069_s1 = inlined_call_operand.hbm [shape: f32[8,128], index: 1, kind: input, shape index: {}]   ;;  %s6070_s2 = inlined_call_operand.hbm [shape: f32[8,128], index: 2, kind: input, shape index: {}]   ;;  %s6071_s3 = inlined_call_operand.hbm [shape: f32[8,128], index: 3, kind: input, shape index: {}]   ;;  %s6072_s4 = inlined_call_operand.hbm [shape: f32[8,128], index: 4, kind: input, shape index: {}]   ;;  %s6073_s5 = inlined_call_operand.hbm [shape: f32[8,128], index: 5, kind: input, shape index: {}]   ;;  %s6074_s6 = inlined_call_operand.hbm [shape: f32[32,128], index: 6, kind: input, shape index: {}]   ;;  %s6075_s7 = inlined_call_operand.hbm [shape: f32[32,128], index: 7, kind: input, shape index: {}]   ;;  %s6076_s8 = inlined_call_operand.hbm [shape: f32[32,128], index: 8, kind: input, shape index: {}]   ;;  %s6077_s9 = inlined_call_operand.vmem [shape: f32[32,128], index: 9, kind: input, shape index: {}]   ;;  %s6078_s10 = inlined_call_operand.vmem [shape: f32[1,128], index: 10, kind: input, shape index: {}]   ;;  %s6079_s11 = inlined_call_operand.vmem [shape: f32[1,128], index: 11, kind: input, shape index: {}]   ;;  %s6080_s12 = inlined_call_operand.vmem [shape: f32[1,128], index: 12, kind: input, shape index: {}]   ;;  %s6081_s13 = inlined_call_operand.hbm [shape: f32[8,128], index: 13, kind: output, shape index: {}]  }
   0x1   :  { %19 = vsyncpa [#allocation6], 0 }
   0x2   :  { %20 = vsyncpa [#allocation9], 0 }
   0x3   :  { %21 = vsyncpa [#allocation12], 0 }
   0x4   :  { %22 = vsyncpa [#allocation15], 0 }
   0x5   :  { %23 = vsyncpa [#allocation4], 0  ;;  %s4141_s25 = smov [#allocation5]   ;;  %s4142_s27 = smov [#allocation8]  }
   0x6   :  { %s40_s26 = sshll.u32 %s4141_s25, 4  ;;  %s60_s28 = sshll.u32 %s4142_s27, 4  ;;  %s41_s26 = int_to_ptr.vmem [resolvable:$true] %s40_s26  ;;  %s61_s28 = int_to_ptr.vmem [resolvable:$true] %s60_s28 }
   0x7   :  { %s3909_s14 = scalar_lea.hbm %s6069_s1, 128 }
   0x8   :  { %p3910_p0 = scmp.ne.s32.totalorder %s6069_s1, %s3909_s14  ;;  %p3913_p1 = scmp.lt.u32.totalorder %s3909_s14, %s6069_s1 }
   0xa   :  { %p3915_p2 = pnand %p3913_p1, %p3910_p0 }
   0xc   :  { %3918 = shalt.err (!%p3915_p2)
}
   0xd   :  { %s3919_s19 = scalar_lea.vmem %s41_s26, 128  ;;  %p3924_p4 = scmp.lt.s32.totalorder %s41_s26, %s41_s26 }
   0xe   :  { %p3920_p3 = scmp.ne.s32.totalorder %s41_s26, %s3919_s19  ;;  %p3925_p5 = scmp.lt.s32.totalorder %s3919_s19, %s3919_s19 }
  0x10   :  { %p3926_p6 = por %p3925_p5, %p3924_p4 }
  0x12   :  { %p3927_p7 = pnand %p3926_p6, %p3920_p3 }
  0x14   :  { %3930 = shalt.err (!%p3927_p7)
}
  0x15   :  { %43 = dma.hbm_to_vmem [thread:$0]  %s6069_s1, 128, %s41_s26, [#allocation6]  }
  0x16   :  { %s3931_s24 = scalar_lea.hbm %s6071_s3, 128 }
  0x17   :  { %p3932_p8 = scmp.ne.s32.totalorder %s6071_s3, %s3931_s24  ;;  %p3935_p9 = scmp.lt.u32.totalorder %s3931_s24, %s6071_s3 }
  0x19   :  { %p3937_p10 = pnand %p3935_p9, %p3932_p8 }
  0x1b   :  { %3940 = shalt.err (!%p3937_p10)
}
  0x1c   :  { %s3941_s14 = scalar_lea.vmem %s61_s28, 128  ;;  %p3946_p12 = scmp.lt.s32.totalorder %s61_s28, %s61_s28 }
  0x1d   :  { %p3942_p11 = scmp.ne.s32.totalorder %s61_s28, %s3941_s14  ;;  %p3947_p13 = scmp.lt.s32.totalorder %s3941_s14, %s3941_s14 }
  0x1f   :  { %p3948_p0 = por %p3947_p13, %p3946_p12 }
  0x21   :  { %p3949_p1 = pnand %p3948_p0, %p3942_p11 }
  0x23   :  { %3952 = shalt.err (!%p3949_p1)
}
  0x24   :  { %63 = dma.hbm_to_vmem [thread:$0]  %s6071_s3, 128, %s61_s28, [#allocation9]  }
  0x25   :  { %s4143_s15 = smov [#allocation11]   ;;  %s3953_s19 = scalar_lea.hbm %s6073_s5, 128 }
  0x26   :  { %s80_s16 = sshll.u32 %s4143_s15, 4  ;;  %p3954_p2 = scmp.ne.s32.totalorder %s6073_s5, %s3953_s19  ;;  %s81_s16 = int_to_ptr.vmem [resolvable:$true] %s80_s16 }
  0x27   :  { %p3957_p3 = scmp.lt.u32.totalorder %s3953_s19, %s6073_s5 }
  0x29   :  { %p3959_p4 = pnand %p3957_p3, %p3954_p2 }
  0x2b   :  { %3962 = shalt.err (!%p3959_p4)
}
  0x2c   :  { %s3963_s24 = scalar_lea.vmem %s81_s16, 128  ;;  %p3968_p6 = scmp.lt.s32.totalorder %s81_s16, %s81_s16 }
  0x2d   :  { %p3964_p5 = scmp.ne.s32.totalorder %s81_s16, %s3963_s24  ;;  %p3969_p7 = scmp.lt.s32.totalorder %s3963_s24, %s3963_s24 }
  0x2f   :  { %p3970_p8 = por %p3969_p7, %p3968_p6 }
  0x31   :  { %p3971_p9 = pnand %p3970_p8, %p3964_p5 }
  0x33   :  { %3974 = shalt.err (!%p3971_p9)
}
  0x34   :  { %83 = dma.hbm_to_vmem [thread:$0]  %s6073_s5, 128, %s81_s16, [#allocation12]  }
  0x35   :  { %s4144_s25 = smov [#allocation14]   ;;  %s4145_s29 = smov [#allocation2]  }
  0x36   :  { %s101_s27 = sshll.u32 %s4144_s25, 4  ;;  %s30_s30 = sshll.u32 %s4145_s29, 4  ;;  %s102_s27 = int_to_ptr.vmem [resolvable:$true] %s101_s27  ;;  %s31_s30 = int_to_ptr.vmem [resolvable:$true] %s30_s30 }
  0x37   :  { %s3975_s26 = scalar_lea.hbm %s6075_s7, 512 }
  0x38   :  { %p3976_p10 = scmp.ne.s32.totalorder %s6075_s7, %s3975_s26  ;;  %p3979_p11 = scmp.lt.u32.totalorder %s3975_s26, %s6075_s7 }
  0x3a   :  { %p3981_p12 = pnand %p3979_p11, %p3976_p10 }
  0x3c   :  { %3984 = shalt.err (!%p3981_p12)
}
  0x3d   :  { %s3985_s5 = scalar_lea.vmem %s102_s27, 512  ;;  %p3990_p0 = scmp.lt.s32.totalorder %s102_s27, %s102_s27 }
  0x3e   :  { %p3986_p13 = scmp.ne.s32.totalorder %s102_s27, %s3985_s5  ;;  %p3991_p1 = scmp.lt.s32.totalorder %s3985_s5, %s3985_s5 }
  0x40   :  { %p3992_p2 = por %p3991_p1, %p3990_p0 }
  0x42   :  { %p3993_p3 = pnand %p3992_p2, %p3986_p13 }
  0x44   :  { %3996 = shalt.err (!%p3993_p3)
}
  0x45   :  { %s4146_s16 = smov 128   ;;  %s4147_s20 = smov 8  }
  0x46   :  { %107 = dma.hbm_to_vmem [thread:$0]  %s6075_s7, 512, %s102_s27, [#allocation15], %s4146_s16, %s4146_s16, %s4147_s20  }
  0x47   :  { %s3997_s3 = scalar_lea.hbm %s6068_s0, 128 }
  0x48   :  { %p3998_p4 = scmp.ne.s32.totalorder %s6068_s0, %s3997_s3  ;;  %p4001_p5 = scmp.lt.u32.totalorder %s3997_s3, %s6068_s0 }
  0x4a   :  { %p4003_p6 = pnand %p4001_p5, %p3998_p4 }
  0x4c   :  { %4006 = shalt.err (!%p4003_p6)
}
  0x4d   :  { %s4007_s1 = scalar_lea.vmem %s31_s30, 128  ;;  %p4012_p8 = scmp.lt.s32.totalorder %s31_s30, %s31_s30 }
  0x4e   :  { %p4008_p7 = scmp.ne.s32.totalorder %s31_s30, %s4007_s1  ;;  %p4013_p9 = scmp.lt.s32.totalorder %s4007_s1, %s4007_s1 }
  0x50   :  { %p4014_p10 = por %p4013_p9, %p4012_p8 }
  0x52   :  { %p4015_p11 = pnand %p4014_p10, %p4008_p7 }
  0x54   :  { %4018 = shalt.err (!%p4015_p11)
}
  0x55   :  { %33 = dma.hbm_to_vmem [thread:$0]  %s6068_s0, 128, %s31_s30, [#allocation3]  }
  0x56   :  { %s4148_s26 = smov [#allocation7]   ;;  %s4149_s17 = smov [#allocation10]  }
  0x57   :  { %s50_s15 = sshll.u32 %s4148_s26, 4  ;;  %s70_s18 = sshll.u32 %s4149_s17, 4  ;;  %s51_s15 = int_to_ptr.vmem [resolvable:$true] %s50_s15  ;;  %s71_s18 = int_to_ptr.vmem [resolvable:$true] %s70_s18 }
  0x58   :  { %s4019_s21 = scalar_lea.hbm %s6070_s2, 128 }
  0x59   :  { %p4020_p12 = scmp.ne.s32.totalorder %s6070_s2, %s4019_s21  ;;  %p4023_p13 = scmp.lt.u32.totalorder %s4019_s21, %s6070_s2 }
  0x5b   :  { %p4025_p0 = pnand %p4023_p13, %p4020_p12 }
  0x5d   :  { %4028 = shalt.err (!%p4025_p0)
}
  0x5e   :  { %s4029_s0 = scalar_lea.vmem %s51_s15, 128  ;;  %p4034_p2 = scmp.lt.s32.totalorder %s51_s15, %s51_s15 }
  0x5f   :  { %p4030_p1 = scmp.ne.s32.totalorder %s51_s15, %s4029_s0  ;;  %p4035_p3 = scmp.lt.s32.totalorder %s4029_s0, %s4029_s0 }
  0x61   :  { %p4036_p4 = por %p4035_p3, %p4034_p2 }
  0x63   :  { %p4037_p5 = pnand %p4036_p4, %p4030_p1 }
  0x65   :  { %4040 = shalt.err (!%p4037_p5)
}
  0x66   :  { %53 = dma.hbm_to_vmem [thread:$0]  %s6070_s2, 128, %s51_s15, [#allocation6]  }
  0x67   :  { %s4041_s14 = scalar_lea.hbm %s6072_s4, 128 }
  0x68   :  { %p4042_p6 = scmp.ne.s32.totalorder %s6072_s4, %s4041_s14  ;;  %p4045_p7 = scmp.lt.u32.totalorder %s4041_s14, %s6072_s4 }
  0x6a   :  { %p4047_p8 = pnand %p4045_p7, %p4042_p6 }
  0x6c   :  { %4050 = shalt.err (!%p4047_p8)
}
  0x6d   :  { %s4051_s17 = scalar_lea.vmem %s71_s18, 128  ;;  %p4056_p10 = scmp.lt.s32.totalorder %s71_s18, %s71_s18 }
  0x6e   :  { %p4052_p9 = scmp.ne.s32.totalorder %s71_s18, %s4051_s17  ;;  %p4057_p11 = scmp.lt.s32.totalorder %s4051_s17, %s4051_s17 }
  0x70   :  { %p4058_p12 = por %p4057_p11, %p4056_p10 }
  0x72   :  { %p4059_p13 = pnand %p4058_p12, %p4052_p9 }
  0x74   :  { %4062 = shalt.err (!%p4059_p13)
}
  0x75   :  { %73 = dma.hbm_to_vmem [thread:$0]  %s6072_s4, 128, %s71_s18, [#allocation9]  }
  0x76   :  { %s4150_s19 = smov [#allocation13]   ;;  %s4151_s21 = smov [#allocation16]  }
  0x77   :  { %s89_s5 = sshll.u32 %s4150_s19, 4  ;;  %s113_s22 = sshll.u32 %s4151_s21, 4  ;;  %s90_s5 = int_to_ptr.vmem [resolvable:$true] %s89_s5  ;;  %s114_s22 = int_to_ptr.vmem [resolvable:$true] %s113_s22 }
  0x78   :  { %s4063_s3 = scalar_lea.hbm %s6074_s6, 512 }
  0x79   :  { %p4064_p0 = scmp.ne.s32.totalorder %s6074_s6, %s4063_s3  ;;  %p4067_p1 = scmp.lt.u32.totalorder %s4063_s3, %s6074_s6 }
  0x7b   :  { %p4069_p2 = pnand %p4067_p1, %p4064_p0 }
  0x7d   :  { %4072 = shalt.err (!%p4069_p2)
}
  0x7e   :  { %s4073_s4 = scalar_lea.vmem %s90_s5, 512  ;;  %p4078_p4 = scmp.lt.s32.totalorder %s90_s5, %s90_s5 }
  0x7f   :  { %p4074_p3 = scmp.ne.s32.totalorder %s90_s5, %s4073_s4  ;;  %p4079_p5 = scmp.lt.s32.totalorder %s4073_s4, %s4073_s4 }
  0x81   :  { %p4080_p6 = por %p4079_p5, %p4078_p4 }
  0x83   :  { %p4081_p7 = pnand %p4080_p6, %p4074_p3 }
  0x85   :  { %4084 = shalt.err (!%p4081_p7)
}
  0x86   :  { %95 = dma.hbm_to_vmem [thread:$0]  %s6074_s6, 512, %s90_s5, [#allocation12], %s4146_s16, %s4146_s16, %s4147_s20  }
  0x87   :  { %s4085_s7 = scalar_lea.hbm %s6076_s8, 512 }
  0x88   :  { %p4086_p8 = scmp.ne.s32.totalorder %s6076_s8, %s4085_s7  ;;  %p4089_p9 = scmp.lt.u32.totalorder %s4085_s7, %s6076_s8 }
  0x8a   :  { %p4091_p10 = pnand %p4089_p9, %p4086_p8 }
  0x8c   :  { %4094 = shalt.err (!%p4091_p10)
}
  0x8d   :  { %s4095_s15 = scalar_lea.vmem %s114_s22, 512  ;;  %p4100_p12 = scmp.lt.s32.totalorder %s114_s22, %s114_s22 }
  0x8e   :  { %p4096_p11 = scmp.ne.s32.totalorder %s114_s22, %s4095_s15  ;;  %p4101_p13 = scmp.lt.s32.totalorder %s4095_s15, %s4095_s15 }
  0x90   :  { %p4102_p0 = por %p4101_p13, %p4100_p12 }
  0x92   :  { %p4103_p1 = pnand %p4102_p0, %p4096_p11 }
  0x94   :  { %4106 = shalt.err (!%p4103_p1)
}
  0x95   :  { %119 = dma.hbm_to_vmem [thread:$0]  %s6076_s8, 512, %s114_s22, [#allocation15], %s4146_s16, %s4146_s16, %s4147_s20  }
  0x96   :  { %4129 = dma.done.wait [#allocation3], 128  }
  0x97   :  { %4130 = vsyncadd [#allocation3], 4294967168 }
  0x98   :  { %4131 = dma.done.wait [#allocation6], 256  }
  0x99   :  { %4132 = vsyncadd [#allocation6], 4294967040 }
  0x9a   :  { %4133 = dma.done.wait [#allocation9], 256  }
  0x9b   :  { %4134 = vsyncadd [#allocation9], 4294967040 }
  0x9c   :  { %4135 = dma.done.wait [#allocation12], 640  }
  0x9d   :  { %4136 = vsyncadd [#allocation12], 4294966656 }
  0x9e   :  { %4137 = dma.done.wait [#allocation15], 1024  }
  0x9f   :  { %4138 = vsyncadd [#allocation15], 4294966272  ;;  %v157_v0 = vlaneseq  ;;  %v424_v4 = vld [vmem:[#allocation5] sm:$0xff]  ;;  %v155_v13 = vld [vmem:[#allocation2] sm:$0xff]  ;;  %vm310_vm0 = vcmask 1041409   ;;  %vm312_vm1 = vcmask 1042434  }
  0xa0   :  { %v4372_v38 = vld [vmem:[#allocation13] sm:$0xff]  ;;  %v4374_v39 = vld [vmem:[#allocation13 + $0x8] sm:$0xff]  ;;  %v4394_v53 = vld [vmem:[#allocation13 + $0x10] sm:$0xff]  ;;  %vm314_vm2 = vcmask 1043459   ;;  %vm316_vm3 = vcmask 1044484   ;;  %vm318_vm4 = vcmask 1045509  }
  0xa1   :  { %v158_v1 = vshrl.u32 %v157_v0, 7  ;;  %v4381_v43 = vld [vmem:[#allocation14] sm:$0xff]  ;;  %v4384_v45 = vld [vmem:[#allocation14 + $0x8] sm:$0xff]  ;;  %v4405_v63 = vld [vmem:[#allocation14 + $0x10] sm:$0xff]  ;;  %vm320_vm5 = vcmask 1046534   ;;  %vm322_vm6 = vcmask 1047559  }
  0xa2   :  { %v4390_v49 = vld [vmem:[#allocation7] sm:$0xff]  ;;  %v4402_v60 = vld [vmem:[#allocation8] sm:$0xff] }
  0xa3   :  { %v4340_v2 = vsub.s32 1, %v158_v1  ;;  %v4342_v3 = vsub.s32 0, %v158_v1  ;;  %v4346_v7 = vsub.s32 2, %v158_v1  ;;  %v4349_v9 = vsub.s32 3, %v158_v1 }
  0xa4   :  { %v4352_v11 = vsub.s32 4, %v158_v1  ;;  %v4357_v16 = vsub.s32 5, %v158_v1  ;;  %v4361_v19 = vsub.s32 6, %v158_v1  ;;  %v4365_v22 = vsub.s32 7, %v158_v1 }
  0xa5   :  { %6142 = vst [vmem:[#allocation24_spill] sm:$0xff] %v4340_v2  ;;  %6143 = vst [vmem:[#allocation25_spill] sm:$0xff] %v4342_v3  ;;  %v447_v5 = vrot.slane %v424_v4, %v4340_v2  ;;  %v428_v6 = vrot.slane %v424_v4, %v4342_v3  ;;  %v466_v8 = vrot.slane %v424_v4, %v4346_v7 }
  0xa6   :  { %6144 = vst [vmem:[#allocation26_spill] sm:$0xff] %v4346_v7  ;;  %6145 = vst [vmem:[#allocation27_spill] sm:$0xff] %v4349_v9  ;;  %v485_v10 = vrot.slane %v424_v4, %v4349_v9  ;;  %v504_v12 = vrot.slane %v424_v4, %v4352_v11  ;;  %v160_v14 = vrot.slane %v155_v13, %v4342_v3 }
  0xa7   :  { %449 = vbcast.lane.b32.xlu1 %v447_v5, 256  ;;  %430 = vbcast.lane.b32.xlu0 %v428_v6, 256  ;;  %6146 = vst [vmem:[#allocation28_spill] sm:$0xff] %v4352_v11  ;;  %v167_v15 = vrot.slane %v155_v13, %v4340_v2  ;;  %6147 = vst [vmem:[#allocation29_spill] sm:$0xff] %v4357_v16  ;;  %v523_v17 = vrot.slane %v424_v4, %v4357_v16 }
  0xa8   :  { %v174_v18 = vrot.slane %v155_v13, %v4346_v7  ;;  %6148 = vst [vmem:[#allocation30_spill] sm:$0xff] %v4361_v19  ;;  %v542_v20 = vrot.slane %v424_v4, %v4361_v19  ;;  %v181_v21 = vrot.slane %v155_v13, %v4349_v9  ;;  %6149 = vst [vmem:[#allocation31_spill] sm:$0xff] %v4365_v22 }
  0xa9   :  { %v561_v23 = vrot.slane %v424_v4, %v4365_v22  ;;  %v188_v24 = vrot.slane %v155_v13, %v4352_v11  ;;  %v195_v25 = vrot.slane %v155_v13, %v4357_v16  ;;  %v202_v26 = vrot.slane %v155_v13, %v4361_v19 }
  0xaa   :  { %v209_v27 = vrot.slane %v155_v13, %v4365_v22 }
  0xab   :  { %453 = vbcast.lane.b32.xlu1 %v447_v5, 264  ;;  %434 = vbcast.lane.b32.xlu0 %v428_v6, 264 }
  0xaf   :  { %472 = vbcast.lane.b32.xlu1 %v466_v8, 264  ;;  %468 = vbcast.lane.b32.xlu0 %v466_v8, 256 }
  0xb3   :  { %457 = vbcast.lane.b32.xlu1 %v447_v5, 272  ;;  %438 = vbcast.lane.b32.xlu0 %v428_v6, 272 }
  0xb7   :  { %491 = vbcast.lane.b32.xlu1 %v485_v10, 264  ;;  %487 = vbcast.lane.b32.xlu0 %v485_v10, 256 }
  0xbb   :  { %506 = vbcast.lane.b32.xlu1 %v504_v12, 256  ;;  %476 = vbcast.lane.b32.xlu0 %v466_v8, 272 }
  0xbf   :  { %510 = vbcast.lane.b32.xlu0 %v504_v12, 264  ;;  %162 = vbcast.lane.b32.xlu1 %v160_v14, 256 }
  0xc3   :  { %169 = vbcast.lane.b32.xlu0 %v167_v15, 256  ;;  %442 = vbcast.lane.b32.xlu1 %v428_v6, 280 }
  0xc7   :  { %461 = vbcast.lane.b32.xlu0 %v447_v5, 280  ;;  %495 = vbcast.lane.b32.xlu1 %v485_v10, 272  ;;  %v4410_v5 = vld [vmem:[#allocation13 + $0x18] sm:$0xff] }
  0xcb   :  { %525 = vbcast.lane.b32.xlu0 %v523_v17, 256  ;;  %529 = vbcast.lane.b32.xlu1 %v523_v17, 264 }
  0xcf   :  { %176 = vbcast.lane.b32.xlu0 %v174_v18, 256  ;;  %480 = vbcast.lane.b32.xlu1 %v466_v8, 280 }
  0xd3   :  { %514 = vbcast.lane.b32.xlu0 %v504_v12, 272  ;;  %544 = vbcast.lane.b32.xlu1 %v542_v20, 256 }
  0xd7   :  { %548 = vbcast.lane.b32.xlu0 %v542_v20, 264  ;;  %183 = vbcast.lane.b32.xlu1 %v181_v21, 256 }
  0xdb   :  { %499 = vbcast.lane.b32.xlu0 %v485_v10, 280  ;;  %533 = vbcast.lane.b32.xlu1 %v523_v17, 272 }
  0xdf   :  { %563 = vbcast.lane.b32.xlu0 %v561_v23, 256  ;;  %567 = vbcast.lane.b32.xlu1 %v561_v23, 264 }
  0xe3   :  { %190 = vbcast.lane.b32.xlu0 %v188_v24, 256  ;;  %518 = vbcast.lane.b32.xlu1 %v504_v12, 280 }
  0xe7   :  { %552 = vbcast.lane.b32.xlu0 %v542_v20, 272  ;;  %197 = vbcast.lane.b32.xlu1 %v195_v25, 256 }
  0xeb   :  { %537 = vbcast.lane.b32.xlu0 %v523_v17, 280  ;;  %571 = vbcast.lane.b32.xlu1 %v561_v23, 272 }
  0xef   :  { %204 = vbcast.lane.b32.xlu0 %v202_v26, 256  ;;  %556 = vbcast.lane.b32.xlu1 %v542_v20, 280  ;;  %v4419_v20 = vld [vmem:[#allocation14 + $0x18] sm:$0xff] }
  0xf3   :  { %211 = vbcast.lane.b32.xlu0 %v209_v27, 256  ;;  %575 = vbcast.lane.b32.xlu1 %v561_v23, 280 }
 0x119   :  { %v450_v28 = vpop.permute.xlu1 %449  ;;  %v431_v29 = vpop.permute.xlu0 %430 }
 0x11a   :  { %v581_v42 = vsub.f32 %v450_v28, %v4372_v38  ;;  %v577_v54 = vsub.f32 %v431_v29, %v4372_v38 }
 0x11c   :  { %v613_v51 = vmul.f32 %v581_v42, %v4381_v43  ;;  %v609_v1 = vmul.f32 %v577_v54, %v4381_v43 }
 0x11d   :  { %v454_v30 = vpop.permute.xlu1 %453  ;;  %v435_v31 = vpop.permute.xlu0 %434 }
 0x11e   :  { %v582_v44 = vsub.f32 %v454_v30, %v4374_v39  ;;  %v578_v46 = vsub.f32 %v435_v31, %v4374_v39  ;;  %3430 = vtanh.f32 %v613_v51 }
 0x120   :  { %v614_v55 = vmul.f32 %v582_v44, %v4384_v45  ;;  %v610_v56 = vmul.f32 %v578_v46, %v4384_v45  ;;  %v4447_v46 = vld [vmem:[#allocation16] sm:$0xff] }
 0x121   :  { %v473_v32 = vpop.permute.xlu1 %472  ;;  %v469_v33 = vpop.permute.xlu0 %468 }
 0x122   :  { %v586_v47 = vsub.f32 %v473_v32, %v4374_v39  ;;  %v585_v52 = vsub.f32 %v469_v33, %v4372_v38  ;;  %3432 = vtanh.f32 %v614_v55 }
 0x123   :  { %3434 = vtanh.f32 %v610_v56 }
 0x124   :  { %v618_v58 = vmul.f32 %v586_v47, %v4384_v45  ;;  %v617_v62 = vmul.f32 %v585_v52, %v4381_v43 }
 0x125   :  { %v458_v34 = vpop.permute.xlu1 %457  ;;  %v439_v35 = vpop.permute.xlu0 %438 }
 0x126   :  { %v583_v59 = vsub.f32 %v458_v34, %v4394_v53  ;;  %v579_v0 = vsub.f32 %v439_v35, %v4394_v53  ;;  %3436 = vtanh.f32 %v618_v58  ;;  %v4437_v34 = vld [vmem:[%s6077_s9] sm:$0xff] }
 0x127   :  { %3438 = vtanh.f32 %v617_v62 }
 0x128   :  { %v615_v12 = vmul.f32 %v583_v59, %v4405_v63  ;;  %v611_v15 = vmul.f32 %v579_v0, %v4405_v63  ;;  %3440 = vtanh.f32 %v609_v1  ;;  %v3431_v29 = vpop.eup %3430  ;;  %v4459_v59 = vld [vmem:[#allocation11] sm:$0xff] }
 0x129   :  { %v492_v36 = vpop.permute.xlu1 %491  ;;  %v488_v37 = vpop.permute.xlu0 %487  ;;  %v677_v47 = vmul.f32 %v3431_v29, %v4437_v34  ;;  %6150 = vst [vmem:[#allocation32_spill] sm:$0xff] %v4459_v59 }
 0x12a   :  { %v590_v8 = vsub.f32 %v492_v36, %v4374_v39  ;;  %v589_v13 = vsub.f32 %v488_v37, %v4372_v38  ;;  %v4439_v37 = vld [vmem:[#allocation16 + $0x8] sm:$0xff] }
 0x12c   :  { %v622_v21 = vmul.f32 %v590_v8, %v4384_v45  ;;  %v621_v24 = vmul.f32 %v589_v13, %v4381_v43  ;;  %v3433_v31 = vpop.eup %3432  ;;  %v781_v8 = vmul.f32 %v3431_v29, %v4447_v46 }
 0x12d   :  { %v4376_v40 = vpop.permute.xlu1 %506  ;;  %v4378_v41 = vpop.permute.xlu0 %476  ;;  %v782_v56 = vmul.f32 %v3433_v31, %v4439_v37 }
 0x12e   :  { %v587_v27 = vsub.f32 %v4378_v41, %v4394_v53  ;;  %v593_v32 = vsub.f32 %v4376_v40, %v4372_v38  ;;  %v3435_v33 = vpop.eup %3434  ;;  %v4444_v41 = vld [vmem:[%s6077_s9 + $0x8] sm:$0xff] }
 0x12f   :  { %v678_v55 = vmul.f32 %v3433_v31, %v4444_v41  ;;  %v778_v62 = vmul.f32 %v3435_v33, %v4439_v37 }
 0x130   :  { %v3437_v36 = vpop.eup %3436  ;;  %v619_v42 = vmul.f32 %v587_v27, %v4405_v63 }
 0x131   :  { %v4388_v48 = vpop.permute.xlu0 %510  ;;  %v163_v50 = vpop.permute.xlu1 %162  ;;  %v682_v0 = vmul.f32 %v3437_v36, %v4444_v41 }
 0x132   :  { %v214_v57 = vsub.f32 %v163_v50, %v4390_v49  ;;  %v3439_v44 = vpop.eup %3438  ;;  %v625_v50 = vmul.f32 %v593_v32, %v4381_v43  ;;  %v594_v58 = vsub.f32 %v4388_v48, %v4374_v39 }
 0x133   :  { %v3441_v40 = vpop.eup %3440  ;;  %v681_v1 = vmul.f32 %v3439_v44, %v4437_v34  ;;  %v785_v48 = vmul.f32 %v3439_v44, %v4447_v46 }
 0x134   :  { %v222_v10 = vmul.f32 %v214_v57, %v4402_v60  ;;  %v674_v57 = vmul.f32 %v3435_v33, %v4444_v41 }
 0x135   :  { %v170_v61 = vpop.permute.xlu0 %169  ;;  %v443_v6 = vpop.permute.xlu1 %442  ;;  %v4482_v33 = vadd.f32 %v682_v0, %v681_v1 }
 0x136   :  { %v215_v4 = vsub.f32 %v170_v61, %v4390_v49  ;;  %v580_v17 = vsub.f32 %v443_v6, %v4410_v5  ;;  %3442 = vtanh.f32 %v222_v10  ;;  %v673_v10 = vmul.f32 %v3441_v40, %v4437_v34 }
 0x137   :  { %3444 = vtanh.f32 %v615_v12  ;;  %v786_v12 = vmul.f32 %v3437_v36, %v4439_v37 }
 0x138   :  { %v223_v18 = vmul.f32 %v215_v4, %v4402_v60  ;;  %3446 = vtanh.f32 %v611_v15  ;;  %v612_v26 = vmul.f32 %v580_v17, %v4419_v20  ;;  %v4464_v4 = vld [vmem:[#allocation10] sm:$0xff]  ;;  %v4474_v15 = vld [vmem:[%s6077_s9 + $0x10] sm:$0xff]  ;;  %v705_v31 = vadd.f32 %v674_v57, %v673_v10 }
 0x139   :  { %v462_v14 = vpop.permute.xlu0 %461  ;;  %v4429_v28 = vpop.permute.xlu1 %495  ;;  %6151 = vst [vmem:[#allocation33_spill] sm:$0xff] %v4464_v4 }
 0x13a   :  { %v584_v23 = vsub.f32 %v462_v14, %v4410_v5  ;;  %3448 = vtanh.f32 %v223_v18  ;;  %v777_v14 = vmul.f32 %v3441_v40, %v4447_v46  ;;  %v591_v1 = vsub.f32 %v4429_v28, %v4394_v53 }
 0x13b   :  { %3450 = vtanh.f32 %v622_v21 }
 0x13c   :  { %v616_v30 = vmul.f32 %v584_v23, %v4419_v20  ;;  %3452 = vtanh.f32 %v621_v24  ;;  %v714_v23 = vadd.f32 %v678_v55, %v677_v47  ;;  %v4478_v24 = vld [vmem:[#allocation16 + $0x10] sm:$0xff]  ;;  %v809_v32 = vadd.f32 %v778_v62, %v777_v14 }
 0x13d   :  { %v4424_v25 = vpop.permute.xlu0 %525  ;;  %3454 = vtanh.f32 %v612_v26  ;;  %v4451_v51 = vpop.permute.xlu1 %529  ;;  %v626_v26 = vmul.f32 %v594_v58, %v4384_v45  ;;  %v623_v7 = vmul.f32 %v591_v1, %v4405_v63 }
 0x13e   :  { %3456 = vtanh.f32 %v616_v30  ;;  %v818_v30 = vadd.f32 %v782_v56, %v781_v8 }
 0x13f   :  { %3458 = vtanh.f32 %v619_v42  ;;  %v4484_v42 = vadd.f32 %v786_v12, %v785_v48 }
 0x140   :  { %v3443_v54 = vpop.eup %3442  ;;  %3460 = vtanh.f32 %v625_v50  ;;  %v4489_v50 = vld [vmem:[#allocation16 + $0x18] sm:$0xff] }
 0x141   :  { %v177_v35 = vpop.permute.xlu0 %176  ;;  %v3445_v61 = vpop.eup %3444  ;;  %v240_v17 = vmul.f32 %v3443_v54, %v4459_v59  ;;  %v328_v27 = vmul.f32 %v3443_v54, %v4464_v4 }
 0x142   :  { %v216_v52 = vsub.f32 %v177_v35, %v4390_v49  ;;  %v3447_v6 = vpop.eup %3446  ;;  %v481_v35 = vpop.permute.xlu1 %480  ;;  %v679_v44 = vmul.f32 %v3445_v61, %v4474_v15  ;;  %v783_v62 = vmul.f32 %v3445_v61, %v4478_v24 }
 0x143   :  { %v675_v40 = vmul.f32 %v3447_v6, %v4474_v15  ;;  %v779_v55 = vmul.f32 %v3447_v6, %v4478_v24  ;;  %v248_v56 = vrot.slane %v240_v17, 4  ;;  %v336_v0 = vrot.slane %v328_v27, 4 }
 0x144   :  { %v3449_v13 = vpop.eup %3448  ;;  %v224_v18 = vmul.f32 %v216_v52, %v4402_v60  ;;  %v4494_v52 = vld [vmem:[%s6077_s9 + $0x18] sm:$0xff]  ;;  %v715_v11 = vadd.f32 %v714_v23, %v679_v44  ;;  %v597_v23 = vsub.f32 %v4424_v25, %v4372_v38 }
 0x145   :  { %v3451_v21 = vpop.eup %3450  ;;  %v241_v47 = vmul.f32 %v3449_v13, %v4459_v59  ;;  %v4496_v54 = vpop.permute.xlu0 %514  ;;  %v329_v57 = vmul.f32 %v3449_v13, %v4464_v4  ;;  %v706_v48 = vadd.f32 %v705_v31, %v675_v40  ;;  %v249_v22 = vadd.f32 %v248_v56, %v240_v17 }
 0x146   :  { %v3453_v29 = vpop.eup %3452  ;;  %3462 = vtanh.f32 %v224_v18  ;;  %v686_v8 = vmul.f32 %v3451_v21, %v4444_v41  ;;  %v790_v13 = vmul.f32 %v3451_v21, %v4439_v37  ;;  %v4510_v16 = vpop.permute.xlu1 %544  ;;  %v337_v9 = vadd.f32 %v336_v0, %v328_v27 }
 0x147   :  { %v3455_v36 = vpop.eup %3454  ;;  %3464 = vtanh.f32 %v626_v26  ;;  %v685_v10 = vmul.f32 %v3453_v29, %v4437_v34  ;;  %v789_v14 = vmul.f32 %v3453_v29, %v4447_v46  ;;  %v254_v18 = vrot.slane %v241_v47, 4 }
 0x148   :  { %v3457_v58 = vpop.eup %3456  ;;  %v676_v12 = vmul.f32 %v3455_v36, %v4494_v52  ;;  %v780_v6 = vmul.f32 %v3455_v36, %v4489_v50  ;;  %v810_v26 = vadd.f32 %v809_v32, %v779_v55  ;;  %v342_v19 = vrot.slane %v329_v57, 4 }
 0x149   :  { %v3459_v61 = vpop.eup %3458  ;;  %v784_v28 = vmul.f32 %v3457_v58, %v4489_v50  ;;  %v588_v36 = vsub.f32 %v481_v35, %v4410_v5  ;;  %v4514_v31 = vpop.permute.xlu0 %548  ;;  %v819_v40 = vadd.f32 %v818_v30, %v783_v62  ;;  %v4516_v29 = vadd.f32 %v686_v8, %v685_v10 }
 0x14a   :  { %v3461_v21 = vpop.eup %3460  ;;  %v707_v2 = vadd.f32 %v706_v48, %v676_v12  ;;  %v811_v32 = vadd.f32 %v810_v26, %v780_v6  ;;  %v4518_v17 = vadd.f32 %v790_v13, %v789_v14  ;;  %v683_v55 = vmul.f32 %v3459_v61, %v4474_v15  ;;  %v184_v25 = vpop.permute.xlu1 %183 }
 0x14b   :  { %v255_v56 = vadd.f32 %v254_v18, %v241_v47  ;;  %v250_v27 = vrot.slane %v249_v22, 2  ;;  %v343_v44 = vadd.f32 %v342_v19, %v329_v57  ;;  %v680_v35 = vmul.f32 %v3457_v58, %v4494_v52 }
 0x14c   :  { %v820_v0 = vadd.f32 %v819_v40, %v784_v28  ;;  %v689_v1 = vmul.f32 %v3461_v21, %v4437_v34  ;;  %v338_v30 = vrot.slane %v337_v9, 2  ;;  %3466 = vtanh.f32 %v623_v7 }
 0x14d   :  { %v620_v62 = vmul.f32 %v588_v36, %v4419_v20  ;;  %v787_v10 = vmul.f32 %v3459_v61, %v4478_v24  ;;  %v708_v12 = vrot.slane %v707_v2, 4  ;;  %v812_v6 = vrot.slane %v811_v32, 4  ;;  %v500_v13 = vpop.permute.xlu0 %499 }
 0x14e   :  { %v598_v47 = vsub.f32 %v4451_v51, %v4374_v39  ;;  %v793_v19 = vmul.f32 %v3461_v21, %v4447_v46  ;;  %v4531_v57 = vadd.f32 %v4482_v33, %v683_v55  ;;  %v256_v58 = vrot.slane %v255_v56, 2  ;;  %v534_v3 = vpop.permute.xlu1 %533 }
 0x14f   :  { %v629_v7 = vmul.f32 %v597_v23, %v4381_v43  ;;  %v251_v14 = vadd.f32 %v250_v27, %v249_v22  ;;  %v344_v18 = vrot.slane %v343_v44, 2  ;;  %v716_v26 = vadd.f32 %v715_v11, %v680_v35 }
 0x150   :  { %v3463_v8 = vpop.eup %3462  ;;  %v821_v61 = vrot.slane %v820_v0, 4  ;;  %v339_v28 = vadd.f32 %v338_v30, %v337_v9  ;;  %3468 = vtanh.f32 %v620_v62  ;;  %v4537_v40 = vadd.f32 %v4484_v42, %v787_v10 }
 0x151   :  { %v3465_v48 = vpop.eup %3464  ;;  %v242_v36 = vmul.f32 %v3463_v8, %v4459_v59  ;;  %v330_v51 = vmul.f32 %v3463_v8, %v4464_v4  ;;  %v709_v21 = vadd.f32 %v708_v12, %v707_v2  ;;  %v813_v33 = vadd.f32 %v812_v6, %v811_v32  ;;  %v4543_v2 = vpop.permute.xlu0 %563 }
 0x152   :  { %v630_v55 = vmul.f32 %v598_v47, %v4384_v45  ;;  %v690_v23 = vmul.f32 %v3465_v48, %v4444_v41  ;;  %v794_v22 = vmul.f32 %v3465_v48, %v4439_v37  ;;  %v257_v27 = vadd.f32 %v256_v58, %v255_v56 }
 0x153   :  { %3470 = vtanh.f32 %v629_v7  ;;  %v252_v11 = vrot.slane %v251_v14, 1  ;;  %v345_v9 = vadd.f32 %v344_v18, %v343_v44  ;;  %v717_v35 = vrot.slane %v716_v26, 4 }
 0x154   :  { %v822_v30 = vadd.f32 %v821_v61, %v820_v0  ;;  %v340_v8 = vrot.slane %v339_v28, 1  ;;  %v260_v62 = vrot.slane %v242_v36, 4  ;;  %v348_v4 = vrot.slane %v330_v51, 4 }
 0x155   :  { %v217_v42 = vsub.f32 %v184_v25, %v4390_v49  ;;  %v710_v32 = vrot.slane %v709_v21, 2  ;;  %v814_v10 = vrot.slane %v813_v33, 2  ;;  %3472 = vtanh.f32 %v630_v55 }
 0x156   :  { %v595_v12 = vsub.f32 %v4496_v54, %v4394_v53  ;;  %v3467_v56 = vpop.eup %3466  ;;  %v4547_v6 = vadd.f32 %v690_v23, %v689_v1  ;;  %v4549_v44 = vadd.f32 %v794_v22, %v793_v19  ;;  %v258_v0 = vrot.slane %v257_v27, 1  ;;  %v4561_v22 = vpop.permute.xlu1 %567 }
 0x157   :  { %v592_v47 = vsub.f32 %v500_v13, %v4410_v5  ;;  %v4552_v48 = vadd.f32 %v252_v11, %v251_v14  ;;  %v346_v58 = vrot.slane %v345_v9, 1  ;;  %v718_v25 = vadd.f32 %v717_v35, %v716_v26 }
 0x158   :  { %v823_v7 = vrot.slane %v822_v30, 2  ;;  %v4554_v18 = vadd.f32 %v340_v8, %v339_v28  ;;  %v261_v61 = vadd.f32 %v260_v62, %v242_v36  ;;  %v349_v55 = vadd.f32 %v348_v4, %v330_v51  ;;  %v191_v36 = vpop.permute.xlu0 %190 }
 0x159   :  { %v225_v59 = vmul.f32 %v217_v42, %v4402_v60  ;;  %v4557_v54 = vadd.f32 %v710_v32, %v709_v21  ;;  %v815_v1 = vadd.f32 %v814_v10, %v813_v33  ;;  %v687_v19 = vmul.f32 %v3467_v56, %v4474_v15 }
 0x15a   :  { %v627_v23 = vmul.f32 %v595_v12, %v4405_v63  ;;  %v3469_v13 = vpop.eup %3468  ;;  %v259_v14 = vadd.f32 %v258_v0, %v257_v27  ;;  %v791_v26 = vmul.f32 %v3467_v56, %v4478_v24  ;;  %v601_v28 = vsub.f32 %v4510_v16, %v4372_v38  ;;  %v519_v0 = vpop.permute.xlu1 %518 }
 0x15b   :  { %v624_v4 = vmul.f32 %v592_v47, %v4419_v20  ;;  %v347_v51 = vadd.f32 %v346_v58, %v345_v9  ;;  %v719_v21 = vrot.slane %v718_v25, 2  ;;  %v824_v33 = vadd.f32 %v823_v7, %v822_v30 }
 0x15c   :  { %v602_v11 = vsub.f32 %v4514_v31, %v4374_v39  ;;  %v262_v8 = vrot.slane %v261_v61, 2  ;;  %v350_v62 = vrot.slane %v349_v55, 2  ;;  %3474 = vtanh.f32 %v225_v59 }
 0x15d   :  { %v3471_v35 = vpop.eup %3470  ;;  %v599_v27 = vsub.f32 %v534_v3, %v4394_v53  ;;  %v684_v42 = vmul.f32 %v3469_v13, %v4494_v52  ;;  %v788_v16 = vmul.f32 %v3469_v13, %v4489_v50  ;;  %3476 = vtanh.f32 %v627_v23 }
 0x15e   :  { %v218_v32 = vsub.f32 %v191_v36, %v4390_v49  ;;  %v712_v9 = vrot.slane %v4557_v54, 1  ;;  %v816_v10 = vrot.slane %v815_v1, 1  ;;  %v633_v30 = vmul.f32 %v601_v28, %v4381_v43 }
 0x15f   :  { %3478 = vtanh.f32 %v624_v4  ;;  %v3473_v31 = vpop.eup %3472  ;;  %v825_v12 = vrot.slane %v824_v33, 1  ;;  %v4576_v56 = vadd.f32 %v4516_v29, %v687_v19  ;;  %v4579_v3 = vadd.f32 %v4518_v17, %v791_v26 }
 0x160   :  { %v634_v59 = vmul.f32 %v602_v11, %v4384_v45  ;;  %v4582_v47 = vadd.f32 %v719_v21, %v718_v25  ;;  %v263_v58 = vadd.f32 %v262_v8, %v261_v61  ;;  %v351_v7 = vadd.f32 %v350_v62, %v349_v55  ;;  %v553_v61 = vpop.permute.xlu0 %552  ;;  %v198_v62 = vpop.permute.xlu1 %197 }
 0x161   :  { %v631_v23 = vmul.f32 %v599_v27, %v4405_v63  ;;  %v693_v13 = vmul.f32 %v3471_v35, %v4437_v34  ;;  %v725_v28 = vadd.f32 %v4531_v57, %v684_v42  ;;  %v829_v29 = vadd.f32 %v4537_v40, %v788_v16 }
 0x162   :  { %v226_v19 = vmul.f32 %v218_v32, %v4402_v60  ;;  %v797_v17 = vmul.f32 %v3471_v35, %v4447_v46  ;;  %v694_v26 = vmul.f32 %v3473_v31, %v4444_v41  ;;  %3480 = vtanh.f32 %v633_v30 }
 0x163   :  { %v605_v25 = vsub.f32 %v4543_v2, %v4372_v38  ;;  %v826_v55 = vadd.f32 %v825_v12, %v824_v33  ;;  %v798_v4 = vmul.f32 %v3473_v31, %v4439_v37  ;;  %3482 = vtanh.f32 %v634_v59  ;;  %v6152_v12 = vld [vmem:[#allocation32_spill] sm:$0xff] }
 0x164   :  { %v596_v36 = vsub.f32 %v519_v0, %v4410_v5  ;;  %v264_v57 = vrot.slane %v263_v58, 1  ;;  %v352_v21 = vrot.slane %v351_v7, 1  ;;  %3484 = vtanh.f32 %v631_v23  ;;  %v6153_v0 = vld [vmem:[#allocation33_spill] sm:$0xff] }
 0x165   :  { %v606_v40 = vsub.f32 %v4561_v22, %v4374_v39  ;;  %v817_v11 = vadd.f32 %v816_v10, %v815_v1  ;;  %v726_v35 = vrot.slane %v725_v28, 4  ;;  %v830_v8 = vrot.slane %v829_v29, 4 }
 0x166   :  { %3486 = vtanh.f32 %v226_v19  ;;  %v3475_v27 = vpop.eup %3474  ;;  %v311_v38 = vsel %vm310_vm0, %v259_v14, %v4552_v48  ;;  %v398_v2 = vsel %vm310_vm0, %v347_v51, %v4554_v18  ;;  %v721_v33 = vrot.slane %v4582_v47, 1  ;;  %v538_v51 = vpop.permute.xlu0 %537 }
 0x167   :  { %v637_v42 = vmul.f32 %v605_v25, %v4381_v43  ;;  %v3477_v16 = vpop.eup %3476  ;;  %v4604_v32 = vsel %vm310_vm0, %v826_v55, %v817_v11  ;;  %v4606_v39 = vadd.f32 %v694_v26, %v693_v13  ;;  %v4608_v1 = vadd.f32 %v798_v4, %v797_v17 }
 0x168   :  { %v628_v22 = vmul.f32 %v596_v36, %v4419_v20  ;;  %v265_v30 = vadd.f32 %v264_v57, %v263_v58  ;;  %v353_v48 = vadd.f32 %v352_v21, %v351_v7  ;;  %v638_v14 = vmul.f32 %v606_v40, %v4384_v45 }
 0x169   :  { %v3479_v10 = vpop.eup %3478  ;;  %v603_v18 = vsub.f32 %v553_v61, %v4394_v53  ;;  %v727_v31 = vadd.f32 %v726_v35, %v725_v28  ;;  %v831_v43 = vadd.f32 %v830_v8, %v829_v29  ;;  %v243_v59 = vmul.f32 %v3475_v27, %v6152_v12  ;;  %v4621_v28 = vpop.permute.xlu1 %571 }
 0x16a   :  { %v331_v23 = vmul.f32 %v3475_v27, %v6153_v0  ;;  %v691_v13 = vmul.f32 %v3477_v16, %v4474_v15  ;;  %v795_v19 = vmul.f32 %v3477_v16, %v4478_v24  ;;  %3488 = vtanh.f32 %v637_v42 }
 0x16b   :  { %v219_v17 = vsub.f32 %v198_v62, %v4390_v49  ;;  %v688_v58 = vmul.f32 %v3479_v10, %v4494_v52  ;;  %v792_v45 = vmul.f32 %v3479_v10, %v4489_v50  ;;  %3490 = vtanh.f32 %v628_v22  ;;  %v205_v22 = vpop.permute.xlu0 %204 }
 0x16c   :  { %v600_v7 = vsub.f32 %v538_v51, %v4410_v5  ;;  %v3481_v29 = vpop.eup %3480  ;;  %v4624_v26 = vsel %vm312_vm1, %v265_v30, %v311_v38  ;;  %v4627_v25 = vsel %vm312_vm1, %v353_v48, %v398_v2  ;;  %3492 = vtanh.f32 %v638_v14 }
 0x16d   :  { %v635_v61 = vmul.f32 %v603_v18, %v4405_v63  ;;  %v3483_v55 = vpop.eup %3482  ;;  %v728_v4 = vrot.slane %v727_v31, 2  ;;  %v832_v36 = vrot.slane %v831_v43, 2  ;;  %v266_v57 = vrot.slane %v243_v59, 4  ;;  %v557_v18 = vpop.permute.xlu1 %556 }
 0x16e   :  { %v354_v21 = vrot.slane %v331_v23, 4  ;;  %v3485_v40 = vpop.eup %3484  ;;  %v4631_v11 = vadd.f32 %v4547_v6, %v691_v13  ;;  %v4634_v35 = vadd.f32 %v4549_v44, %v795_v19  ;;  %v227_v8 = vmul.f32 %v219_v17, %v4402_v60 }
 0x16f   :  { %v607_v62 = vsub.f32 %v4621_v28, %v4394_v53  ;;  %v697_v38 = vmul.f32 %v3481_v29, %v4437_v34  ;;  %v734_v2 = vadd.f32 %v4576_v56, %v688_v58  ;;  %v838_v42 = vadd.f32 %v4579_v3, %v792_v45 }
 0x170   :  { %v3487_v27 = vpop.eup %3486  ;;  %v632_v16 = vmul.f32 %v600_v7, %v4419_v20  ;;  %v801_v6 = vmul.f32 %v3481_v29, %v4447_v46  ;;  %v698_v44 = vmul.f32 %v3483_v55, %v4444_v41  ;;  %v802_v10 = vmul.f32 %v3483_v55, %v4439_v37  ;;  %v212_v55 = vpop.permute.xlu0 %211 }
 0x171   :  { %3494 = vtanh.f32 %v635_v61  ;;  %v4646_v30 = vadd.f32 %v728_v4, %v727_v31  ;;  %v833_v53 = vadd.f32 %v832_v36, %v831_v43  ;;  %v267_v48 = vadd.f32 %v266_v57, %v243_v59 }
 0x172   :  { %v355_v14 = vadd.f32 %v354_v21, %v331_v23  ;;  %v695_v56 = vmul.f32 %v3485_v40, %v4474_v15  ;;  %v799_v3 = vmul.f32 %v3485_v40, %v4478_v24  ;;  %v244_v51 = vmul.f32 %v3487_v27, %v6152_v12 }
 0x173   :  { %3496 = vtanh.f32 %v227_v8  ;;  %v735_v13 = vrot.slane %v734_v2, 4  ;;  %v839_v19 = vrot.slane %v838_v42, 4  ;;  %v220_v17 = vsub.f32 %v205_v22, %v4390_v49 }
 0x174   :  { %3498 = vtanh.f32 %v632_v16  ;;  %v3489_v58 = vpop.eup %3488  ;;  %v4652_v45 = vadd.f32 %v698_v44, %v697_v38  ;;  %v4654_v31 = vadd.f32 %v802_v10, %v801_v6  ;;  %v332_v43 = vmul.f32 %v3487_v27, %v6153_v0  ;;  %v576_v44 = vpop.permute.xlu1 %575 }
 0x175   :  { %v604_v59 = vsub.f32 %v557_v18, %v4410_v5  ;;  %v3491_v23 = vpop.eup %3490  ;;  %v834_v7 = vrot.slane %v833_v53, 1  ;;  %v268_v28 = vrot.slane %v267_v48, 2  ;;  %v356_v29 = vrot.slane %v355_v14, 2 }
 0x176   :  { %v228_v61 = vmul.f32 %v220_v17, %v4402_v60  ;;  %v3493_v4 = vpop.eup %3492  ;;  %v730_v36 = vrot.slane %v4646_v30, 1  ;;  %v4661_v57 = vadd.f32 %v4606_v39, %v695_v56  ;;  %v272_v21 = vrot.slane %v244_v51, 4 }
 0x177   :  { %v636_v40 = vmul.f32 %v604_v59, %v4419_v20  ;;  %v736_v8 = vadd.f32 %v735_v13, %v734_v2  ;;  %v840_v27 = vadd.f32 %v839_v19, %v838_v42  ;;  %v855_v38 = vadd.f32 %v4608_v1, %v799_v3 }
 0x178   :  { %3500 = vtanh.f32 %v228_v61  ;;  %v360_v16 = vrot.slane %v332_v43, 4  ;;  %v796_v22 = vmul.f32 %v3491_v23, %v4489_v50  ;;  %v221_v6 = vsub.f32 %v212_v55, %v4390_v49 }
 0x179   :  { %3502 = vtanh.f32 %v636_v40  ;;  %v835_v10 = vadd.f32 %v834_v7, %v833_v53  ;;  %v269_v18 = vadd.f32 %v268_v28, %v267_v48  ;;  %v357_v17 = vadd.f32 %v356_v29, %v355_v14 }
 0x17a   :  { %v639_v39 = vmul.f32 %v607_v62, %v4405_v63  ;;  %v701_v59 = vmul.f32 %v3489_v58, %v4437_v34  ;;  %v805_v2 = vmul.f32 %v3489_v58, %v4447_v46  ;;  %v273_v42 = vadd.f32 %v272_v21, %v244_v51 }
 0x17b   :  { %v3495_v56 = vpop.eup %3494  ;;  %v692_v1 = vmul.f32 %v3491_v23, %v4494_v52  ;;  %v737_v3 = vrot.slane %v736_v8, 2  ;;  %v841_v13 = vrot.slane %v840_v27, 2  ;;  %v702_v19 = vmul.f32 %v3493_v4, %v4444_v41 }
 0x17c   :  { %v608_v49 = vsub.f32 %v576_v44, %v4410_v5  ;;  %v806_v48 = vmul.f32 %v3493_v4, %v4439_v37  ;;  %v361_v14 = vadd.f32 %v360_v16, %v332_v43  ;;  %v847_v63 = vadd.f32 %v4634_v35, %v796_v22 }
 0x17d   :  { %v3497_v53 = vpop.eup %3496  ;;  %v229_v34 = vmul.f32 %v221_v6, %v4402_v60  ;;  %v270_v46 = vrot.slane %v269_v18, 1  ;;  %v358_v51 = vrot.slane %v357_v17, 1  ;;  %3504 = vtanh.f32 %v639_v39 }
 0x17e   :  { %v3499_v62 = vpop.eup %3498  ;;  %v333_v58 = vmul.f32 %v3497_v53, %v6153_v0  ;;  %v4679_v23 = vsel %vm312_vm1, %v835_v10, %v4604_v32  ;;  %v274_v41 = vrot.slane %v273_v42, 2  ;;  %v743_v5 = vadd.f32 %v4631_v11, %v692_v1 }
 0x17f   :  { %v800_v37 = vmul.f32 %v3499_v62, %v4489_v50  ;;  %v4683_v43 = vadd.f32 %v737_v3, %v736_v8  ;;  %v842_v35 = vadd.f32 %v841_v13, %v840_v27  ;;  %v803_v60 = vmul.f32 %v3495_v56, %v4478_v24 }
 0x180   :  { %v640_v7 = vmul.f32 %v608_v49, %v4419_v20  ;;  %v4687_v28 = vadd.f32 %v702_v19, %v701_v59  ;;  %v362_v29 = vrot.slane %v361_v14, 2  ;;  %v848_v61 = vrot.slane %v847_v63, 4 }
 0x181   :  { %3506 = vtanh.f32 %v229_v34  ;;  %v271_v32 = vadd.f32 %v270_v46, %v269_v18  ;;  %v359_v4 = vadd.f32 %v358_v51, %v357_v17  ;;  %v872_v21 = vadd.f32 %v806_v48, %v805_v2 }
 0x182   :  { %v3501_v55 = vpop.eup %3500  ;;  %v366_v40 = vrot.slane %v333_v58, 4  ;;  %v275_v16 = vadd.f32 %v274_v41, %v273_v42  ;;  %v744_v22 = vrot.slane %v743_v5, 4  ;;  %v856_v8 = vadd.f32 %v855_v38, %v800_v37 }
 0x183   :  { %v3503_v11 = vpop.eup %3502  ;;  %v334_v27 = vmul.f32 %v3501_v55, %v6153_v0  ;;  %v864_v6 = vadd.f32 %v4654_v31, %v803_v60  ;;  %v245_v20 = vmul.f32 %v3497_v53, %v6152_v12  ;;  %3508 = vtanh.f32 %v640_v7 }
 0x184   :  { %v804_v44 = vmul.f32 %v3503_v11, %v4489_v50  ;;  %v363_v10 = vadd.f32 %v362_v29, %v361_v14  ;;  %v849_v39 = vadd.f32 %v848_v61, %v847_v63  ;;  %v246_v18 = vmul.f32 %v3501_v55, %v6152_v12 }
 0x185   :  { %v372_v17 = vrot.slane %v334_v27, 4  ;;  %v843_v59 = vrot.slane %v842_v35, 1  ;;  %v699_v2 = vmul.f32 %v3495_v56, %v4474_v15  ;;  %v367_v42 = vadd.f32 %v366_v40, %v333_v58 }
 0x186   :  { %v865_v1 = vadd.f32 %v864_v6, %v804_v44  ;;  %v4697_v38 = vsel %vm314_vm2, %v271_v32, %v4624_v26  ;;  %v4701_v31 = vsel %vm314_vm2, %v359_v4, %v4627_v25  ;;  %v857_v3 = vrot.slane %v856_v8, 4 }
 0x187   :  { %v373_v13 = vadd.f32 %v372_v17, %v334_v27  ;;  %v3505_v19 = vpop.eup %3504  ;;  %v276_v49 = vrot.slane %v275_v16, 1  ;;  %v4703_v53 = vadd.f32 %v744_v22, %v743_v5  ;;  %v278_v48 = vrot.slane %v245_v20, 4 }
 0x188   :  { %v866_v14 = vrot.slane %v865_v1, 4  ;;  %v364_v63 = vrot.slane %v363_v10, 1  ;;  %v850_v56 = vrot.slane %v849_v39, 2  ;;  %v696_v34 = vmul.f32 %v3499_v62, %v4494_v52 }
 0x189   :  { %v284_v46 = vrot.slane %v246_v18, 4  ;;  %v4706_v51 = vadd.f32 %v843_v59, %v842_v35  ;;  %v760_v26 = vadd.f32 %v4652_v45, %v699_v2  ;;  %v368_v58 = vrot.slane %v367_v42, 2 }
 0x18a   :  { %v700_v25 = vmul.f32 %v3503_v11, %v4494_v52  ;;  %v858_v37 = vadd.f32 %v857_v3, %v856_v8  ;;  %v703_v60 = vmul.f32 %v3505_v19, %v4474_v15  ;;  %v807_v5 = vmul.f32 %v3505_v19, %v4478_v24 }
 0x18b   :  { %v3507_v41 = vpop.eup %3506  ;;  %v374_v7 = vrot.slane %v373_v13, 2  ;;  %v4712_v29 = vadd.f32 %v276_v49, %v275_v16  ;;  %v746_v61 = vrot.slane %v4703_v53, 2  ;;  %v279_v62 = vadd.f32 %v278_v48, %v245_v20 }
 0x18c   :  { %v867_v55 = vadd.f32 %v866_v14, %v865_v1  ;;  %v365_v35 = vadd.f32 %v364_v63, %v363_v10  ;;  %v851_v32 = vadd.f32 %v850_v56, %v849_v39  ;;  %v752_v45 = vadd.f32 %v4661_v57, %v696_v34 }
 0x18d   :  { %v285_v4 = vadd.f32 %v284_v46, %v246_v18  ;;  %v3509_v40 = vpop.eup %3508  ;;  %v369_v11 = vadd.f32 %v368_v58, %v367_v42  ;;  %v761_v22 = vadd.f32 %v760_v26, %v700_v25  ;;  %v247_v15 = vmul.f32 %v3507_v41, %v6152_v12 }
 0x18e   :  { %v335_v24 = vmul.f32 %v3507_v41, %v6153_v0  ;;  %v859_v16 = vrot.slane %v858_v37, 2  ;;  %v769_v8 = vadd.f32 %v4687_v28, %v703_v60  ;;  %v873_v27 = vadd.f32 %v872_v21, %v807_v5 }
 0x18f   :  { %v375_v6 = vadd.f32 %v374_v7, %v373_v13  ;;  %v280_v20 = vrot.slane %v279_v62, 2  ;;  %v868_v44 = vrot.slane %v867_v55, 2  ;;  %v290_v10 = vrot.slane %v247_v15, 4 }
 0x190   :  { %v378_v57 = vrot.slane %v335_v24, 4  ;;  %v753_v39 = vrot.slane %v752_v45, 4  ;;  %v286_v18 = vrot.slane %v285_v4, 2  ;;  %v704_v17 = vmul.f32 %v3509_v40, %v4494_v52 }
 0x191   :  { %v808_v12 = vmul.f32 %v3509_v40, %v4489_v50  ;;  %v370_v59 = vrot.slane %v369_v11, 1  ;;  %v762_v0 = vrot.slane %v761_v22, 4  ;;  %v291_v2 = vadd.f32 %v290_v10, %v247_v15 }
 0x192   :  { %v379_v42 = vadd.f32 %v378_v57, %v335_v24  ;;  %v860_v1 = vadd.f32 %v859_v16, %v858_v37  ;;  %v376_v28 = vrot.slane %v375_v6, 1  ;;  %v770_v21 = vadd.f32 %v769_v8, %v704_v17 }
 0x193   :  { %v874_v3 = vadd.f32 %v873_v27, %v808_v12  ;;  %v281_v13 = vadd.f32 %v280_v20, %v279_v62  ;;  %v869_v19 = vadd.f32 %v868_v44, %v867_v55  ;;  %v292_v49 = vrot.slane %v291_v2, 2 }
 0x194   :  { %v380_v48 = vrot.slane %v379_v42, 2  ;;  %v852_v14 = vrot.slane %v851_v32, 1  ;;  %v287_v63 = vadd.f32 %v286_v18, %v285_v4  ;;  %v771_v56 = vrot.slane %v770_v21, 4 }
 0x195   :  { %v875_v34 = vrot.slane %v874_v3, 4  ;;  %v371_v46 = vadd.f32 %v370_v59, %v369_v11  ;;  %v754_v52 = vadd.f32 %v753_v39, %v752_v45  ;;  %v293_v26 = vadd.f32 %v292_v49, %v291_v2 }
 0x196   :  { %v381_v50 = vadd.f32 %v380_v48, %v379_v42  ;;  %v861_v58 = vrot.slane %v860_v1, 1  ;;  %v377_v25 = vadd.f32 %v376_v28, %v375_v6  ;;  %v763_v41 = vadd.f32 %v762_v0, %v761_v22  ;;  %v3416_v6 = vld [vmem:[%s6080_s12] ss:$0 sm:$0xff] }
 0x197   :  { %v876_v60 = vadd.f32 %v875_v34, %v874_v3  ;;  %v282_v37 = vrot.slane %v281_v13, 1  ;;  %v870_v5 = vrot.slane %v869_v19, 1  ;;  %v772_v40 = vadd.f32 %v771_v56, %v770_v21  ;;  %v4757_v48 = vld [vmem:[%s6078_s10] ss:$0 sm:$0xff] }
 0x198   :  { %v382_v7 = vrot.slane %v381_v50, 1  ;;  %v401_v62 = vsel %vm316_vm3, %v365_v35, %v4701_v31  ;;  %v853_v55 = vadd.f32 %v852_v14, %v851_v32  ;;  %v288_v15 = vrot.slane %v287_v63, 1 }
 0x199   :  { %v877_v4 = vrot.slane %v876_v60, 2  ;;  %v402_v24 = vsel %vm318_vm4, %v371_v46, %v401_v62  ;;  %v755_v11 = vrot.slane %v754_v52, 2  ;;  %v294_v45 = vrot.slane %v293_v26, 1 }
 0x19a   :  { %v383_v16 = vadd.f32 %v382_v7, %v381_v50  ;;  %v862_v8 = vadd.f32 %v861_v58, %v860_v1  ;;  %v403_v27 = vsel %vm320_vm5, %v377_v25, %v402_v24  ;;  %v764_v22 = vrot.slane %v763_v41, 2 }
 0x19b   :  { %v878_v20 = vadd.f32 %v877_v4, %v876_v60  ;;  %v283_v44 = vadd.f32 %v282_v37, %v281_v13  ;;  %v871_v10 = vadd.f32 %v870_v5, %v869_v19  ;;  %v773_v35 = vrot.slane %v772_v40, 2  ;;  %v3415_v19 = vld [vmem:[%s6079_s11] ss:$0 sm:$0xff]  ;;  %v6155_v4 = vld [vmem:[#allocation24_spill] sm:$0xff] }
 0x19c   :  { %v404_v31 = vsel %vm322_vm6, %v383_v16, %v403_v27  ;;  %v916_v32 = vsel %vm314_vm2, %v4706_v51, %v4679_v23  ;;  %v747_v57 = vadd.f32 %v746_v61, %v4703_v53  ;;  %v289_v39 = vadd.f32 %v288_v15, %v287_v63  ;;  %v6157_v16 = vld [vmem:[#allocation27_spill] sm:$0xff]  ;;  %v6158_v27 = vld [vmem:[#allocation28_spill] sm:$0xff] }
 0x19d   :  { %v879_v18 = vrot.slane %v878_v20, 1  ;;  %v917_v17 = vsel %vm316_vm3, %v853_v55, %v916_v32  ;;  %v756_v12 = vadd.f32 %v755_v11, %v754_v52  ;;  %v295_v59 = vadd.f32 %v294_v45, %v293_v26  ;;  %v3842_v26 = vld [vmem:[#allocation5] sm:$0xff]  ;;  %v6154_v55 = vld [vmem:[#allocation25_spill] sm:$0xff] }
 0x19e   :  { %v4736_v0 = vadd.f32 %v3416_v6, %v404_v31  ;;  %v317_v2 = vsel %vm316_vm3, %v4712_v29, %v4697_v38  ;;  %v918_v42 = vsel %vm318_vm4, %v862_v8, %v917_v17  ;;  %v765_v1 = vadd.f32 %v764_v22, %v763_v41  ;;  %v6156_v11 = vld [vmem:[#allocation26_spill] sm:$0xff]  ;;  %v6159_v6 = vld [vmem:[#allocation29_spill] sm:$0xff]  ;;  %v6161_v31 = vld [vmem:[#allocation31_spill] sm:$0xff] }
 0x19f   :  { %v880_v23 = vadd.f32 %v879_v18, %v878_v20  ;;  %v739_v51 = vrot.slane %v4683_v43, 1  ;;  %v319_v53 = vsel %vm318_vm4, %v283_v44, %v317_v2  ;;  %v919_v61 = vsel %vm320_vm5, %v871_v10, %v918_v42  ;;  %v6160_v44 = vld [vmem:[#allocation30_spill] sm:$0xff]  ;;  %v4796_v42 = vld [vmem:[#allocation13 + $0x8] sm:$0xff] }
 0x1a0   :  { %v774_v28 = vadd.f32 %v773_v35, %v772_v40  ;;  %v748_v21 = vrot.slane %v747_v57, 1  ;;  %v321_v3 = vsel %vm320_vm5, %v289_v39, %v319_v53  ;;  %v722_v38 = vadd.f32 %v721_v33, %v4582_v47 }
 0x1a1   :  { %v920_v13 = vsel %vm322_vm6, %v880_v23, %v919_v61  ;;  %v757_v29 = vrot.slane %v756_v12, 1  ;;  %v323_v49 = vsel %vm322_vm6, %v295_v59, %v321_v3  ;;  %v731_v63 = vadd.f32 %v730_v36, %v4646_v30  ;;  %v4799_v23 = vld [vmem:[#allocation13] sm:$0xff]  ;;  %v4804_v3 = vld [vmem:[#allocation14 + $0x8] sm:$0xff] }
 0x1a2   :  { %v922_v14 = vadd.f32 %v920_v13, %v4736_v0  ;;  %v766_v56 = vrot.slane %v765_v1, 1  ;;  %v713_v47 = vadd.f32 %v712_v9, %v4557_v54  ;;  %v740_v33 = vadd.f32 %v739_v51, %v4683_v43 }
 0x1a3   :  { %v775_v34 = vrot.slane %v774_v28, 1  ;;  %v749_v46 = vadd.f32 %v748_v21, %v747_v57  ;;  %v4767_v52 = vadd.f32 %v3415_v19, %v323_v49  ;;  %v887_v50 = vmul.f32 %v3842_v26, %v4757_v48 }
 0x1a4   :  { %3510 = vrcp.f32 %v922_v14  ;;  %v897_v58 = vsel %vm310_vm0, %v722_v38, %v713_v47  ;;  %v758_v25 = vadd.f32 %v757_v29, %v756_v12  ;;  %v767_v36 = vadd.f32 %v766_v56, %v765_v1  ;;  %v4807_v38 = vld [vmem:[#allocation14] sm:$0xff]  ;;  %v4812_v56 = vld [vmem:[#allocation13 + $0x10] sm:$0xff] }
 0x1a5   :  { %v898_v30 = vsel %vm312_vm1, %v731_v63, %v897_v58  ;;  %v776_v60 = vadd.f32 %v775_v34, %v774_v28  ;;  %v888_v9 = vadd.f32 %v887_v50, %v4767_v52 }
 0x1a6   :  { %v899_v41 = vsel %vm314_vm2, %v740_v33, %v898_v30 }
 0x1a7   :  { %v900_v54 = vsel %vm316_vm3, %v749_v46, %v899_v41  ;;  %v4823_v41 = vld [vmem:[#allocation13 + $0x18] sm:$0xff] }
 0x1a8   :  { %v901_v43 = vsel %vm318_vm4, %v758_v25, %v900_v54  ;;  %v4819_v25 = vld [vmem:[#allocation14 + $0x10] sm:$0xff] }
 0x1a9   :  { %v902_v37 = vsel %vm320_vm5, %v767_v36, %v901_v43 }
 0x1aa   :  { %v903_v5 = vsel %vm322_vm6, %v776_v60, %v902_v37  ;;  %v4829_v37 = vld [vmem:[#allocation14 + $0x18] sm:$0xff] }
 0x1ab   :  { %v905_v7 = vadd.f32 %v903_v5, %v888_v9 }
 0x1ae   :  { %v3511_v40 = vpop.eup %3510 }
 0x1af   :  { %v4778_v62 = vmul.f32 %v3511_v40, %v905_v7 }
 0x1b1   :  { %v928_v15 = vrot.slane %v4778_v62, %v6154_v55  ;;  %v947_v24 = vrot.slane %v4778_v62, %v6155_v4  ;;  %v966_v45 = vrot.slane %v4778_v62, %v6156_v11  ;;  %v985_v8 = vrot.slane %v4778_v62, %v6157_v16 }
 0x1b2   :  { %v1004_v22 = vrot.slane %v4778_v62, %v6158_v27  ;;  %v1023_v20 = vrot.slane %v4778_v62, %v6159_v6  ;;  %v1042_v10 = vrot.slane %v4778_v62, %v6160_v44  ;;  %v1061_v35 = vrot.slane %v4778_v62, %v6161_v31 }
 0x1b3   :  { %934 = vbcast.lane.b32.xlu1 %v928_v15, 264  ;;  %930 = vbcast.lane.b32.xlu0 %v928_v15, 256 }
 0x1b7   :  { %953 = vbcast.lane.b32.xlu1 %v947_v24, 264  ;;  %949 = vbcast.lane.b32.xlu0 %v947_v24, 256 }
 0x1bb   :  { %972 = vbcast.lane.b32.xlu1 %v966_v45, 264  ;;  %968 = vbcast.lane.b32.xlu0 %v966_v45, 256 }
 0x1bf   :  { %957 = vbcast.lane.b32.xlu1 %v947_v24, 272  ;;  %938 = vbcast.lane.b32.xlu0 %v928_v15, 272 }
 0x1c3   :  { %991 = vbcast.lane.b32.xlu1 %v985_v8, 264  ;;  %987 = vbcast.lane.b32.xlu0 %v985_v8, 256 }
 0x1c7   :  { %1006 = vbcast.lane.b32.xlu1 %v1004_v22, 256  ;;  %976 = vbcast.lane.b32.xlu0 %v966_v45, 272 }
 0x1cb   :  { %942 = vbcast.lane.b32.xlu1 %v928_v15, 280  ;;  %1010 = vbcast.lane.b32.xlu0 %v1004_v22, 264 }
 0x1cf   :  { %995 = vbcast.lane.b32.xlu1 %v985_v8, 272  ;;  %961 = vbcast.lane.b32.xlu0 %v947_v24, 280 }
 0x1d3   :  { %1029 = vbcast.lane.b32.xlu1 %v1023_v20, 264  ;;  %1025 = vbcast.lane.b32.xlu0 %v1023_v20, 256 }
 0x1d7   :  { %1014 = vbcast.lane.b32.xlu1 %v1004_v22, 272  ;;  %980 = vbcast.lane.b32.xlu0 %v966_v45, 280 }
 0x1db   :  { %1048 = vbcast.lane.b32.xlu1 %v1042_v10, 264  ;;  %1044 = vbcast.lane.b32.xlu0 %v1042_v10, 256 }
 0x1df   :  { %1033 = vbcast.lane.b32.xlu1 %v1023_v20, 272  ;;  %999 = vbcast.lane.b32.xlu0 %v985_v8, 280 }
 0x1e3   :  { %1067 = vbcast.lane.b32.xlu1 %v1061_v35, 264  ;;  %1063 = vbcast.lane.b32.xlu0 %v1061_v35, 256 }
 0x1e7   :  { %1052 = vbcast.lane.b32.xlu1 %v1042_v10, 272  ;;  %1018 = vbcast.lane.b32.xlu0 %v1004_v22, 280 }
 0x1eb   :  { %1071 = vbcast.lane.b32.xlu1 %v1061_v35, 272  ;;  %1037 = vbcast.lane.b32.xlu0 %v1023_v20, 280 }
 0x1ef   :  { %1075 = vbcast.lane.b32.xlu1 %v1061_v35, 280  ;;  %1056 = vbcast.lane.b32.xlu0 %v1042_v10, 280 }
 0x225   :  { %v935_v32 = vpop.permute.xlu1 %934  ;;  %v931_v57 = vpop.permute.xlu0 %930 }
 0x226   :  { %v1078_v1 = vsub.f32 %v935_v32, %v4796_v42  ;;  %v1077_v51 = vsub.f32 %v931_v57, %v4799_v23 }
 0x228   :  { %v1110_v13 = vmul.f32 %v4804_v3, %v1078_v1  ;;  %v1109_v29 = vmul.f32 %v4807_v38, %v1077_v51 }
 0x229   :  { %v954_v39 = vpop.permute.xlu1 %953  ;;  %v950_v18 = vpop.permute.xlu0 %949 }
 0x22a   :  { %v1082_v28 = vsub.f32 %v954_v39, %v4796_v42  ;;  %v1081_v21 = vsub.f32 %v950_v18, %v4799_v23  ;;  %3512 = vtanh.f32 %v1110_v13  ;;  %v4853_v13 = vld [vmem:[#allocation16 + $0x8] sm:$0xff] }
 0x22b   :  { %3514 = vtanh.f32 %v1109_v29  ;;  %6162 = vst [vmem:[#allocation32_spill] sm:$0xff] %v4853_v13 }
 0x22c   :  { %v1114_v63 = vmul.f32 %v4804_v3, %v1082_v28  ;;  %v1113_v33 = vmul.f32 %v4807_v38, %v1081_v21 }
 0x22d   :  { %v973_v17 = vpop.permute.xlu1 %972  ;;  %v969_v12 = vpop.permute.xlu0 %968 }
 0x22e   :  { %v1086_v19 = vsub.f32 %v973_v17, %v4796_v42  ;;  %v1085_v34 = vsub.f32 %v969_v12, %v4799_v23  ;;  %3516 = vtanh.f32 %v1114_v63 }
 0x22f   :  { %3518 = vtanh.f32 %v1113_v33 }
 0x230   :  { %v1118_v26 = vmul.f32 %v4804_v3, %v1086_v19  ;;  %v1117_v54 = vmul.f32 %v4807_v38, %v1085_v34  ;;  %v4859_v19 = vld [vmem:[%s6077_s9] sm:$0xff] }
 0x231   :  { %v958_v59 = vpop.permute.xlu1 %957  ;;  %v939_v2 = vpop.permute.xlu0 %938  ;;  %6163 = vst [vmem:[#allocation33_spill] sm:$0xff] %v4859_v19 }
 0x232   :  { %v1079_v47 = vsub.f32 %v939_v2, %v4812_v56  ;;  %v1083_v46 = vsub.f32 %v958_v59, %v4812_v56  ;;  %3520 = vtanh.f32 %v1118_v26 }
 0x234   :  { %v1111_v30 = vmul.f32 %v4819_v25, %v1079_v47  ;;  %v1115_v43 = vmul.f32 %v4819_v25, %v1083_v46  ;;  %v3513_v35 = vpop.eup %3512 }
 0x235   :  { %v992_v53 = vpop.permute.xlu1 %991  ;;  %v988_v61 = vpop.permute.xlu0 %987  ;;  %v1278_v29 = vmul.f32 %v4853_v13, %v3513_v35 }
 0x236   :  { %v1090_v36 = vsub.f32 %v992_v53, %v4796_v42  ;;  %v1089_v9 = vsub.f32 %v988_v61, %v4799_v23  ;;  %3522 = vtanh.f32 %v1111_v30  ;;  %v3515_v57 = vpop.eup %3514  ;;  %v4849_v53 = vld [vmem:[%s6077_s9 + $0x8] sm:$0xff] }
 0x237   :  { %3524 = vtanh.f32 %v1117_v54  ;;  %v1174_v61 = vmul.f32 %v4849_v53, %v3513_v35 }
 0x238   :  { %v1122_v15 = vmul.f32 %v4804_v3, %v1090_v36  ;;  %v1121_v24 = vmul.f32 %v4807_v38, %v1089_v9  ;;  %3526 = vtanh.f32 %v1115_v43  ;;  %v3517_v18 = vpop.eup %3516 }
 0x239   :  { %v1007_v49 = vpop.permute.xlu1 %1006  ;;  %v977_v14 = vpop.permute.xlu0 %976  ;;  %v1178_v33 = vmul.f32 %v4849_v53, %v3517_v18 }
 0x23a   :  { %v1087_v45 = vsub.f32 %v977_v14, %v4812_v56  ;;  %v1093_v8 = vsub.f32 %v1007_v49, %v4799_v23  ;;  %v3519_v12 = vpop.eup %3518  ;;  %v1173_v49 = vmul.f32 %v4859_v19, %v3515_v57  ;;  %v4862_v14 = vld [vmem:[#allocation16] sm:$0xff] }
 0x23b   :  { %6164 = vst [vmem:[#allocation25_spill] sm:$0xff] %v4862_v14  ;;  %v1277_v63 = vmul.f32 %v4862_v14, %v3515_v57  ;;  %v1177_v34 = vmul.f32 %v4859_v19, %v3519_v12 }
 0x23c   :  { %v1119_v39 = vmul.f32 %v4819_v25, %v1087_v45  ;;  %v1125_v17 = vmul.f32 %v4807_v38, %v1093_v8  ;;  %v3521_v21 = vpop.eup %3520  ;;  %v1205_v9 = vadd.f32 %v1174_v61, %v1173_v49  ;;  %v1281_v45 = vmul.f32 %v4862_v14, %v3519_v12  ;;  %v4882_v8 = vld [vmem:[#allocation16 + $0x10] sm:$0xff]  ;;  %v4900_v61 = vld [vmem:[#allocation16 + $0x18] sm:$0xff] }
 0x23d   :  { %v943_v50 = vpop.permute.xlu1 %942  ;;  %v1011_v58 = vpop.permute.xlu0 %1010  ;;  %v1309_v43 = vadd.f32 %v1278_v29, %v1277_v63  ;;  %6166 = vst [vmem:[#allocation26_spill] sm:$0xff] %v4882_v8  ;;  %v1286_v12 = vmul.f32 %v4853_v13, %v3521_v21 }
 0x23e   :  { %v1080_v60 = vsub.f32 %v943_v50, %v4823_v41  ;;  %v1094_v22 = vsub.f32 %v1011_v58, %v4796_v42 }
 0x240   :  { %v1112_v5 = vmul.f32 %v4829_v37, %v1080_v60  ;;  %v1126_v59 = vmul.f32 %v4804_v3, %v1094_v22  ;;  %v3523_v47 = vpop.eup %3522 }
 0x241   :  { %v996_v7 = vpop.permute.xlu1 %995  ;;  %v962_v40 = vpop.permute.xlu0 %961  ;;  %v1279_v22 = vmul.f32 %v4882_v8, %v3523_v47 }
 0x242   :  { %3528 = vtanh.f32 %v1112_v5  ;;  %v1084_v32 = vsub.f32 %v962_v40, %v4823_v41  ;;  %v1091_v2 = vsub.f32 %v996_v7, %v4812_v56  ;;  %v3525_v26 = vpop.eup %3524  ;;  %v1282_v5 = vmul.f32 %v4853_v13, %v3517_v18  ;;  %v4878_v7 = vld [vmem:[%s6077_s9 + $0x10] sm:$0xff] }
 0x243   :  { %3530 = vtanh.f32 %v1122_v15  ;;  %v3527_v60 = vpop.eup %3526  ;;  %6165 = vst [vmem:[#allocation24_spill] sm:$0xff] %v4878_v7  ;;  %v1175_v40 = vmul.f32 %v4878_v7, %v3523_v47  ;;  %v1310_v63 = vadd.f32 %v1309_v43, %v1279_v22 }
 0x244   :  { %3532 = vtanh.f32 %v1121_v24  ;;  %v1116_v28 = vmul.f32 %v4829_v37, %v1084_v32  ;;  %v1123_v50 = vmul.f32 %v4819_v25, %v1091_v2  ;;  %v1214_v24 = vadd.f32 %v1178_v33, %v1177_v34  ;;  %v4897_v2 = vld [vmem:[%s6077_s9 + $0x18] sm:$0xff] }
 0x245   :  { %v1030_v20 = vpop.permute.xlu1 %1029  ;;  %v4837_v10 = vpop.permute.xlu0 %1025  ;;  %3534 = vtanh.f32 %v1119_v39  ;;  %v1182_v32 = vmul.f32 %v4849_v53, %v3521_v21  ;;  %v1179_v29 = vmul.f32 %v4878_v7, %v3527_v60  ;;  %v1283_v49 = vmul.f32 %v4882_v8, %v3527_v60 }
 0x246   :  { %3536 = vtanh.f32 %v1125_v17  ;;  %v1098_v58 = vsub.f32 %v1030_v20, %v4796_v42  ;;  %v1097_v39 = vsub.f32 %v4837_v10, %v4799_v23  ;;  %v1285_v10 = vmul.f32 %v4862_v14, %v3525_v26 }
 0x247   :  { %3538 = vtanh.f32 %v1126_v59  ;;  %v1181_v59 = vmul.f32 %v4859_v19, %v3525_v26  ;;  %v1206_v21 = vadd.f32 %v1205_v9, %v1175_v40 }
 0x248   :  { %3540 = vtanh.f32 %v1116_v28  ;;  %v1130_v57 = vmul.f32 %v4804_v3, %v1098_v58  ;;  %v1327_v44 = vadd.f32 %v1286_v12, %v1285_v10 }
 0x249   :  { %v4844_v1 = vpop.permute.xlu1 %1014  ;;  %v981_v51 = vpop.permute.xlu0 %980  ;;  %3542 = vtanh.f32 %v1123_v50  ;;  %v1129_v50 = vmul.f32 %v4807_v38, %v1097_v39 }
 0x24a   :  { %v1088_v46 = vsub.f32 %v981_v51, %v4823_v41  ;;  %v1095_v58 = vsub.f32 %v4844_v1, %v4812_v56 }
 0x24c   :  { %v3529_v54 = vpop.eup %3528  ;;  %v1120_v20 = vmul.f32 %v4829_v37, %v1088_v46  ;;  %v1318_v46 = vadd.f32 %v1282_v5, %v1281_v45  ;;  %v1215_v5 = vadd.f32 %v1214_v24, %v1179_v29 }
 0x24d   :  { %v4870_v30 = vpop.permute.xlu1 %1048  ;;  %v4872_v36 = vpop.permute.xlu0 %1044  ;;  %v1176_v51 = vmul.f32 %v4897_v2, %v3529_v54  ;;  %v1280_v28 = vmul.f32 %v4900_v61, %v3529_v54 }
 0x24e   :  { %v3531_v15 = vpop.eup %3530  ;;  %3544 = vtanh.f32 %v1120_v20  ;;  %v1223_v20 = vadd.f32 %v1182_v32, %v1181_v59  ;;  %v1319_v45 = vadd.f32 %v1318_v46, %v1283_v49  ;;  %v1102_v27 = vsub.f32 %v4870_v30, %v4796_v42 }
 0x24f   :  { %v3533_v35 = vpop.eup %3532  ;;  %v1186_v47 = vmul.f32 %v4849_v53, %v3531_v15  ;;  %3546 = vtanh.f32 %v1130_v57  ;;  %v1290_v60 = vmul.f32 %v4853_v13, %v3531_v15  ;;  %v1207_v43 = vadd.f32 %v1206_v21, %v1176_v51 }
 0x250   :  { %v1185_v33 = vmul.f32 %v4859_v19, %v3533_v35  ;;  %v3535_v34 = vpop.eup %3534  ;;  %v1289_v9 = vmul.f32 %v4862_v14, %v3533_v35  ;;  %v1311_v40 = vadd.f32 %v1310_v63, %v1280_v28  ;;  %3548 = vtanh.f32 %v1129_v50 }
 0x251   :  { %v4890_v18 = vpop.permute.xlu1 %1033  ;;  %v1000_v17 = vpop.permute.xlu0 %999  ;;  %v1183_v6 = vmul.f32 %v4878_v7, %v3535_v34  ;;  %v1287_v1 = vmul.f32 %v4882_v8, %v3535_v34  ;;  %v1127_v15 = vmul.f32 %v4819_v25, %v1095_v58  ;;  %v1101_v35 = vsub.f32 %v4872_v36, %v4799_v23 }
 0x252   :  { %v3537_v31 = vpop.eup %3536  ;;  %v1232_v39 = vadd.f32 %v1186_v47, %v1185_v33  ;;  %v1092_v32 = vsub.f32 %v1000_v17, %v4823_v41  ;;  %v1336_v59 = vadd.f32 %v1290_v60, %v1289_v9  ;;  %v1208_v51 = vrot.slane %v1207_v43, 4 }
 0x253   :  { %v3539_v22 = vpop.eup %3538  ;;  %v1312_v28 = vrot.slane %v1311_v40, 4  ;;  %v1189_v49 = vmul.f32 %v4859_v19, %v3537_v31  ;;  %v1293_v30 = vmul.f32 %v4862_v14, %v3537_v31  ;;  %v4928_v47 = vadd.f32 %v1223_v20, %v1183_v6 }
 0x254   :  { %v3541_v57 = vpop.eup %3540  ;;  %v1190_v10 = vmul.f32 %v4849_v53, %v3539_v22  ;;  %v1294_v21 = vmul.f32 %v4853_v13, %v3539_v22  ;;  %v1134_v17 = vmul.f32 %v4804_v3, %v1102_v27  ;;  %v1099_v33 = vsub.f32 %v4890_v18, %v4812_v56 }
 0x255   :  { %v1068_v26 = vpop.permute.xlu1 %1067  ;;  %v4911_v54 = vpop.permute.xlu0 %1063  ;;  %v1180_v63 = vmul.f32 %v4897_v2, %v3541_v57  ;;  %v1284_v36 = vmul.f32 %v4900_v61, %v3541_v57  ;;  %v1328_v34 = vadd.f32 %v1327_v44, %v1287_v1  ;;  %3550 = vtanh.f32 %v1127_v15 }
 0x256   :  { %v3543_v29 = vpop.eup %3542  ;;  %v1133_v46 = vmul.f32 %v4807_v38, %v1101_v35  ;;  %v1124_v50 = vmul.f32 %v4829_v37, %v1092_v32  ;;  %v1209_v60 = vadd.f32 %v1208_v51, %v1207_v43  ;;  %v1313_v9 = vadd.f32 %v1312_v28, %v1311_v40 }
 0x257   :  { %v4936_v22 = vadd.f32 %v1190_v10, %v1189_v49  ;;  %v1187_v6 = vmul.f32 %v4878_v7, %v3543_v29  ;;  %v4939_v57 = vadd.f32 %v1294_v21, %v1293_v30  ;;  %v1216_v27 = vadd.f32 %v1215_v5, %v1180_v63 }
 0x258   :  { %v3545_v58 = vpop.eup %3544  ;;  %3552 = vtanh.f32 %v1124_v50  ;;  %v1106_v44 = vsub.f32 %v1068_v26, %v4796_v42  ;;  %v1291_v1 = vmul.f32 %v4882_v8, %v3543_v29  ;;  %v1320_v15 = vadd.f32 %v1319_v45, %v1284_v36 }
 0x259   :  { %v1053_v12 = vpop.permute.xlu1 %1052  ;;  %v1019_v24 = vpop.permute.xlu0 %1018  ;;  %3554 = vtanh.f32 %v1134_v17  ;;  %v1131_v35 = vmul.f32 %v4819_v25, %v1099_v33  ;;  %v1288_v43 = vmul.f32 %v4900_v61, %v3545_v58  ;;  %v1105_v32 = vsub.f32 %v4911_v54, %v4799_v23 }
 0x25a   :  { %v3547_v20 = vpop.eup %3546  ;;  %3556 = vtanh.f32 %v1133_v46  ;;  %v1138_v40 = vmul.f32 %v4804_v3, %v1106_v44  ;;  %v1210_v51 = vrot.slane %v1209_v60, 2  ;;  %v1314_v5 = vrot.slane %v1313_v9, 2 }
 0x25b   :  { %v4948_v28 = vadd.f32 %v1232_v39, %v1187_v6  ;;  %v1194_v26 = vmul.f32 %v4849_v53, %v3547_v20  ;;  %v3549_v29 = vpop.eup %3548  ;;  %v1217_v45 = vrot.slane %v1216_v27, 4  ;;  %v1137_v49 = vmul.f32 %v4807_v38, %v1105_v32 }
 0x25c   :  { %v1103_v30 = vsub.f32 %v1053_v12, %v4812_v56  ;;  %v1096_v21 = vsub.f32 %v1019_v24, %v4823_v41  ;;  %v1321_v63 = vrot.slane %v1320_v15, 4  ;;  %3558 = vtanh.f32 %v1131_v35 }
 0x25d   :  { %v1072_v31 = vpop.permute.xlu1 %1071  ;;  %v1038_v18 = vpop.permute.xlu0 %1037  ;;  %v1329_v17 = vadd.f32 %v1328_v34, %v1288_v43  ;;  %3560 = vtanh.f32 %v1138_v40  ;;  %v1193_v50 = vmul.f32 %v4859_v19, %v3549_v29  ;;  %v1184_v6 = vmul.f32 %v4897_v2, %v3545_v58 }
 0x25e   :  { %v1107_v36 = vsub.f32 %v1072_v31, %v4812_v56  ;;  %v1100_v54 = vsub.f32 %v1038_v18, %v4823_v41  ;;  %v1128_v39 = vmul.f32 %v4829_v37, %v1096_v21  ;;  %3562 = vtanh.f32 %v1137_v49 }
 0x25f   :  { %v1135_v12 = vmul.f32 %v4819_v25, %v1103_v30  ;;  %v3551_v24 = vpop.eup %3550  ;;  %v1315_v44 = vadd.f32 %v1314_v5, %v1313_v9  ;;  %v1337_v35 = vadd.f32 %v1336_v59, %v1291_v1  ;;  %v1298_v31 = vmul.f32 %v4853_v13, %v3547_v20 }
 0x260   :  { %v1139_v34 = vmul.f32 %v4819_v25, %v1107_v36  ;;  %v1218_v18 = vadd.f32 %v1217_v45, %v1216_v27  ;;  %v1297_v43 = vmul.f32 %v4862_v14, %v3549_v29  ;;  %v1132_v40 = vmul.f32 %v4829_v37, %v1100_v54 }
 0x261   :  { %v1076_v10 = vpop.permute.xlu1 %1075  ;;  %v1057_v46 = vpop.permute.xlu0 %1056  ;;  %v4966_v21 = vadd.f32 %v1210_v51, %v1209_v60  ;;  %v1330_v58 = vrot.slane %v1329_v17, 4  ;;  %3564 = vtanh.f32 %v1128_v39  ;;  %v1322_v59 = vadd.f32 %v1321_v63, %v1320_v15 }
 0x262   :  { %v1108_v33 = vsub.f32 %v1076_v10, %v4823_v41  ;;  %v1104_v32 = vsub.f32 %v1057_v46, %v4823_v41  ;;  %v3553_v10 = vpop.eup %3552  ;;  %v1250_v1 = vadd.f32 %v1194_v26, %v1193_v50  ;;  %v1225_v20 = vadd.f32 %v4928_v47, %v1184_v6 }
 0x263   :  { %v3555_v9 = vpop.eup %3554  ;;  %3566 = vtanh.f32 %v1135_v12  ;;  %v1316_v5 = vrot.slane %v1315_v44, 1  ;;  %v1191_v29 = vmul.f32 %v4878_v7, %v3551_v24  ;;  %v1292_v45 = vmul.f32 %v4900_v61, %v3553_v10 }
 0x264   :  { %v1140_v49 = vmul.f32 %v4829_v37, %v1108_v33  ;;  %v3557_v27 = vpop.eup %3556  ;;  %3568 = vtanh.f32 %v1139_v34  ;;  %v1219_v30 = vrot.slane %v1218_v18, 2  ;;  %v1295_v60 = vmul.f32 %v4882_v8, %v3551_v24 }
 0x265   :  { %3570 = vtanh.f32 %v1132_v40  ;;  %v1136_v51 = vmul.f32 %v4829_v37, %v1104_v32  ;;  %v1331_v36 = vadd.f32 %v1330_v58, %v1329_v17  ;;  %v1188_v15 = vmul.f32 %v4897_v2, %v3553_v10 }
 0x266   :  { %v1338_v26 = vadd.f32 %v1337_v35, %v1292_v45  ;;  %3572 = vtanh.f32 %v1140_v49  ;;  %v3559_v47 = vpop.eup %3558  ;;  %v1323_v63 = vrot.slane %v1322_v59, 2  ;;  %v1226_v54 = vrot.slane %v1225_v20, 4 }
 0x267   :  { %v1198_v39 = vmul.f32 %v4849_v53, %v3555_v9  ;;  %v1197_v33 = vmul.f32 %v4859_v19, %v3557_v27  ;;  %v3561_v46 = vpop.eup %3560  ;;  %v4977_v50 = vadd.f32 %v1316_v5, %v1315_v44  ;;  %v1354_v6 = vadd.f32 %v1298_v31, %v1297_v43 }
 0x268   :  { %v1302_v12 = vmul.f32 %v4853_v13, %v3555_v9  ;;  %v1301_v24 = vmul.f32 %v4862_v14, %v3557_v27  ;;  %v3563_v17 = vpop.eup %3562  ;;  %v1242_v34 = vadd.f32 %v4936_v22, %v1191_v29  ;;  %v1346_v35 = vadd.f32 %v4939_v57, %v1295_v60 }
 0x269   :  { %v1339_v40 = vrot.slane %v1338_v26, 4  ;;  %3574 = vtanh.f32 %v1136_v51  ;;  %v1332_v32 = vrot.slane %v1331_v36, 2  ;;  %v1195_v10 = vmul.f32 %v4878_v7, %v3559_v47 }
 0x26a   :  { %v1299_v58 = vmul.f32 %v4882_v8, %v3559_v47  ;;  %v1234_v44 = vadd.f32 %v4948_v28, %v1188_v15  ;;  %v4986_v49 = vadd.f32 %v1219_v30, %v1218_v18  ;;  %v4988_v31 = vadd.f32 %v1323_v63, %v1322_v59 }
 0x26b   :  { %v4990_v43 = vadd.f32 %v1226_v54, %v1225_v20  ;;  %v1259_v9 = vadd.f32 %v1198_v39, %v1197_v33  ;;  %v3565_v27 = vpop.eup %3564  ;;  %v1363_v22 = vadd.f32 %v1302_v12, %v1301_v24  ;;  %v1202_v57 = vmul.f32 %v4849_v53, %v3561_v46 }
 0x26c   :  { %v1306_v5 = vmul.f32 %v4853_v13, %v3561_v46  ;;  %v1201_v29 = vmul.f32 %v4859_v19, %v3563_v17  ;;  %v1340_v60 = vadd.f32 %v1339_v40, %v1338_v26  ;;  %v1305_v51 = vmul.f32 %v4862_v14, %v3563_v17 }
 0x26d   :  { %v3567_v45 = vpop.eup %3566  ;;  %v1192_v28 = vmul.f32 %v4897_v2, %v3565_v27  ;;  %v1296_v18 = vmul.f32 %v4900_v61, %v3565_v27  ;;  %v4998_v20 = vadd.f32 %v1332_v32, %v1331_v36  ;;  %v1251_v30 = vadd.f32 %v1250_v1, %v1195_v10 }
 0x26e   :  { %v3569_v59 = vpop.eup %3568  ;;  %v1355_v15 = vadd.f32 %v1354_v6, %v1299_v58  ;;  %v1235_v47 = vrot.slane %v1234_v44, 4  ;;  %v1268_v12 = vadd.f32 %v1202_v57, %v1201_v29  ;;  %v1199_v24 = vmul.f32 %v4878_v7, %v3567_v45 }
 0x26f   :  { %v3571_v63 = vpop.eup %3570  ;;  %v1243_v54 = vadd.f32 %v1242_v34, %v1192_v28  ;;  %v1347_v39 = vadd.f32 %v1346_v35, %v1296_v18  ;;  %v1203_v33 = vmul.f32 %v4878_v7, %v3569_v59  ;;  %v1307_v46 = vmul.f32 %v4882_v8, %v3569_v59 }
 0x270   :  { %v3573_v26 = vpop.eup %3572  ;;  %v1196_v17 = vmul.f32 %v4897_v2, %v3571_v63  ;;  %v1300_v40 = vmul.f32 %v4900_v61, %v3571_v63  ;;  %v1341_v36 = vrot.slane %v1340_v60, 2  ;;  %v1372_v32 = vadd.f32 %v1306_v5, %v1305_v51 }
 0x271   :  { %v1303_v1 = vmul.f32 %v4882_v8, %v3567_v45  ;;  %v1348_v6 = vrot.slane %v1347_v39, 4  ;;  %v1244_v10 = vrot.slane %v1243_v54, 4  ;;  %v1269_v34 = vadd.f32 %v1268_v12, %v1203_v33 }
 0x272   :  { %v1252_v35 = vadd.f32 %v1251_v30, %v1196_v17  ;;  %v1356_v58 = vadd.f32 %v1355_v15, %v1300_v40  ;;  %v1373_v18 = vadd.f32 %v1372_v32, %v1307_v46  ;;  %v1204_v57 = vmul.f32 %v4897_v2, %v3573_v26 }
 0x273   :  { %v3575_v27 = vpop.eup %3574  ;;  %v1349_v28 = vadd.f32 %v1348_v6, %v1347_v39  ;;  %v1308_v29 = vmul.f32 %v4900_v61, %v3573_v26  ;;  %v1236_v59 = vadd.f32 %v1235_v47, %v1234_v44  ;;  %v1260_v7 = vadd.f32 %v1259_v9, %v1199_v24 }
 0x274   :  { %v1253_v14 = vrot.slane %v1252_v35, 4  ;;  %v1357_v63 = vrot.slane %v1356_v58, 4  ;;  %v1364_v19 = vadd.f32 %v1363_v22, %v1303_v1  ;;  %v1270_v51 = vadd.f32 %v1269_v34, %v1204_v57 }
 0x275   :  { %v1350_v5 = vrot.slane %v1349_v28, 2  ;;  %v1374_v45 = vadd.f32 %v1373_v18, %v1308_v29  ;;  %v1342_v8 = vadd.f32 %v1341_v36, %v1340_v60  ;;  %v1200_v30 = vmul.f32 %v4897_v2, %v3575_v27 }
 0x276   :  { %v1358_v13 = vadd.f32 %v1357_v63, %v1356_v58  ;;  %v1304_v15 = vmul.f32 %v4900_v61, %v3575_v27  ;;  %v1245_v39 = vadd.f32 %v1244_v10, %v1243_v54  ;;  %v1254_v46 = vadd.f32 %v1253_v14, %v1252_v35 }
 0x277   :  { %v1351_v33 = vadd.f32 %v1350_v5, %v1349_v28  ;;  %v1375_v12 = vrot.slane %v1374_v45, 4  ;;  %v1271_v26 = vrot.slane %v1270_v51, 4  ;;  %v1261_v44 = vadd.f32 %v1260_v7, %v1200_v30 }
 0x278   :  { %v1359_v17 = vrot.slane %v1358_v13, 2  ;;  %v1365_v9 = vadd.f32 %v1364_v19, %v1304_v15  ;;  %v1325_v47 = vrot.slane %v4988_v31, 1  ;;  %v1228_v22 = vrot.slane %v4990_v43, 2 }
 0x279   :  { %v1334_v24 = vrot.slane %v4998_v20, 1  ;;  %v1376_v60 = vadd.f32 %v1375_v12, %v1374_v45  ;;  %v1237_v40 = vrot.slane %v1236_v59, 2  ;;  %v1262_v32 = vrot.slane %v1261_v44, 4 }
 0x27a   :  { %v1360_v36 = vadd.f32 %v1359_v17, %v1358_v13  ;;  %v1366_v1 = vrot.slane %v1365_v9, 4  ;;  %v1343_v6 = vrot.slane %v1342_v8, 1  ;;  %v1246_v54 = vrot.slane %v1245_v39, 2 }
 0x27b   :  { %v1255_v10 = vrot.slane %v1254_v46, 2  ;;  %v1377_v14 = vrot.slane %v1376_v60, 2  ;;  %v1352_v34 = vrot.slane %v1351_v33, 1  ;;  %v1272_v35 = vadd.f32 %v1271_v26, %v1270_v51 }
 0x27c   :  { %v1263_v58 = vadd.f32 %v1262_v32, %v1261_v44  ;;  %v1367_v7 = vadd.f32 %v1366_v1, %v1365_v9  ;;  %v1326_v19 = vadd.f32 %v1325_v47, %v4988_v31  ;;  %v1229_v27 = vadd.f32 %v1228_v22, %v4990_v43 }
 0x27d   :  { %v1361_v28 = vrot.slane %v1360_v36, 1  ;;  %v1378_v18 = vadd.f32 %v1377_v14, %v1376_v60  ;;  %v1335_v57 = vadd.f32 %v1334_v24, %v4998_v20  ;;  %v1238_v29 = vadd.f32 %v1237_v40, %v1236_v59 }
 0x27e   :  { %v1264_v13 = vrot.slane %v1263_v58, 2  ;;  %v1368_v63 = vrot.slane %v1367_v7, 2  ;;  %v1221_v5 = vrot.slane %v4986_v49, 1  ;;  %v1344_v45 = vadd.f32 %v1343_v6, %v1342_v8 }
 0x27f   :  { %v1247_v30 = vadd.f32 %v1246_v54, %v1245_v39  ;;  %v1379_v15 = vrot.slane %v1378_v18, 1  ;;  %v1353_v12 = vadd.f32 %v1352_v34, %v1351_v33  ;;  %v1256_v51 = vadd.f32 %v1255_v10, %v1254_v46 }
 0x280   :  { %v1273_v17 = vrot.slane %v1272_v35, 2  ;;  %v1369_v26 = vadd.f32 %v1368_v63, %v1367_v7  ;;  %v1408_v31 = vsel %vm310_vm0, %v1326_v19, %v4977_v50  ;;  %v1230_v43 = vrot.slane %v1229_v27, 1 }
 0x281   :  { %v1362_v44 = vadd.f32 %v1361_v28, %v1360_v36  ;;  %v1265_v9 = vadd.f32 %v1264_v13, %v1263_v58  ;;  %v1212_v20 = vrot.slane %v4966_v21, 1  ;;  %v1409_v59 = vsel %vm312_vm1, %v1335_v57, %v1408_v31  ;;  %v6168_v31 = vld [vmem:[#allocation29_spill] sm:$0xff] }
 0x282   :  { %v1239_v47 = vrot.slane %v1238_v29, 1  ;;  %v1370_v22 = vrot.slane %v1369_v26, 1  ;;  %v1222_v8 = vadd.f32 %v1221_v5, %v4986_v49  ;;  %v1410_v39 = vsel %vm314_vm2, %v1344_v45, %v1409_v59 }
 0x283   :  { %v1248_v33 = vrot.slane %v1247_v30, 1  ;;  %v1380_v46 = vadd.f32 %v1379_v15, %v1378_v18  ;;  %v1411_v24 = vsel %vm316_vm3, %v1353_v12, %v1410_v39  ;;  %v1257_v60 = vrot.slane %v1256_v51, 1 }
 0x284   :  { %v1274_v40 = vadd.f32 %v1273_v17, %v1272_v35  ;;  %v1371_v50 = vadd.f32 %v1370_v22, %v1369_v26  ;;  %v1231_v32 = vadd.f32 %v1230_v43, %v1229_v27  ;;  %v1412_v36 = vsel %vm318_vm4, %v1362_v44, %v1411_v24  ;;  %v6167_v17 = vld [vmem:[#allocation28_spill] sm:$0xff]  ;;  %v6169_v44 = vld [vmem:[#allocation30_spill] sm:$0xff] }
 0x285   :  { %v1266_v1 = vrot.slane %v1265_v9, 1  ;;  %v1213_v6 = vadd.f32 %v1212_v20, %v4966_v21  ;;  %v1240_v54 = vadd.f32 %v1239_v47, %v1238_v29  ;;  %v1249_v14 = vadd.f32 %v1248_v33, %v1247_v30  ;;  %v6170_v20 = vld [vmem:[#allocation31_spill] sm:$0xff] }
 0x286   :  { %v1413_v10 = vsel %vm320_vm5, %v1371_v50, %v1412_v36  ;;  %v1258_v58 = vadd.f32 %v1257_v60, %v1256_v51  ;;  %v1275_v7 = vrot.slane %v1274_v40, 1  ;;  %v1381_v29 = vmul.f32 %v4757_v48, %v4778_v62 }
 0x287   :  { %v1414_v49 = vsel %vm322_vm6, %v1380_v46, %v1413_v10  ;;  %v1391_v34 = vsel %vm310_vm0, %v1222_v8, %v1213_v6  ;;  %v1267_v27 = vadd.f32 %v1266_v1, %v1265_v9 }
 0x288   :  { %v1416_v19 = vadd.f32 %v1414_v49, %v4736_v0  ;;  %v1392_v35 = vsel %vm312_vm1, %v1231_v32, %v1391_v34  ;;  %v1276_v57 = vadd.f32 %v1275_v7, %v1274_v40  ;;  %v1382_v5 = vadd.f32 %v1381_v29, %v4767_v52 }
 0x289   :  { %v1393_v28 = vsel %vm314_vm2, %v1240_v54, %v1392_v35 }
 0x28a   :  { %3576 = vrcp.f32 %v1416_v19  ;;  %v1394_v21 = vsel %vm316_vm3, %v1249_v14, %v1393_v28 }
 0x28b   :  { %v1395_v18 = vsel %vm318_vm4, %v1258_v58, %v1394_v21 }
 0x28c   :  { %v1396_v13 = vsel %vm320_vm5, %v1267_v27, %v1395_v18 }
 0x28d   :  { %v1397_v63 = vsel %vm322_vm6, %v1276_v57, %v1396_v13 }
 0x28e   :  { %v1399_v45 = vadd.f32 %v1397_v63, %v1382_v5 }
 0x294   :  { %v3577_v30 = vpop.eup %3576 }
 0x295   :  { %v5039_v15 = vmul.f32 %v3577_v30, %v1399_v45 }
 0x297   :  { %v1422_v12 = vrot.slane %v5039_v15, %v6154_v55  ;;  %v1441_v51 = vrot.slane %v5039_v15, %v6155_v4  ;;  %v1460_v48 = vrot.slane %v5039_v15, %v6156_v11  ;;  %v1479_v62 = vrot.slane %v5039_v15, %v6157_v16 }
 0x298   :  { %v1498_v26 = vrot.slane %v5039_v15, %v6167_v17  ;;  %v1517_v43 = vrot.slane %v5039_v15, %v6168_v31  ;;  %v1536_v9 = vrot.slane %v5039_v15, %v6169_v44  ;;  %v1555_v59 = vrot.slane %v5039_v15, %v6170_v20 }
 0x299   :  { %1428 = vbcast.lane.b32.xlu1 %v1422_v12, 264  ;;  %1424 = vbcast.lane.b32.xlu0 %v1422_v12, 256 }
 0x29d   :  { %1447 = vbcast.lane.b32.xlu1 %v1441_v51, 264  ;;  %1443 = vbcast.lane.b32.xlu0 %v1441_v51, 256 }
 0x2a1   :  { %1466 = vbcast.lane.b32.xlu1 %v1460_v48, 264  ;;  %1462 = vbcast.lane.b32.xlu0 %v1460_v48, 256 }
 0x2a5   :  { %1451 = vbcast.lane.b32.xlu1 %v1441_v51, 272  ;;  %1432 = vbcast.lane.b32.xlu0 %v1422_v12, 272 }
 0x2a9   :  { %1485 = vbcast.lane.b32.xlu1 %v1479_v62, 264  ;;  %1481 = vbcast.lane.b32.xlu0 %v1479_v62, 256 }
 0x2ad   :  { %1500 = vbcast.lane.b32.xlu1 %v1498_v26, 256  ;;  %1470 = vbcast.lane.b32.xlu0 %v1460_v48, 272 }
 0x2b1   :  { %1436 = vbcast.lane.b32.xlu1 %v1422_v12, 280  ;;  %1504 = vbcast.lane.b32.xlu0 %v1498_v26, 264 }
 0x2b5   :  { %1489 = vbcast.lane.b32.xlu1 %v1479_v62, 272  ;;  %1455 = vbcast.lane.b32.xlu0 %v1441_v51, 280 }
 0x2b9   :  { %1523 = vbcast.lane.b32.xlu1 %v1517_v43, 264  ;;  %1519 = vbcast.lane.b32.xlu0 %v1517_v43, 256 }
 0x2bd   :  { %1508 = vbcast.lane.b32.xlu1 %v1498_v26, 272  ;;  %1474 = vbcast.lane.b32.xlu0 %v1460_v48, 280 }
 0x2c1   :  { %1542 = vbcast.lane.b32.xlu1 %v1536_v9, 264  ;;  %1538 = vbcast.lane.b32.xlu0 %v1536_v9, 256 }
 0x2c5   :  { %1527 = vbcast.lane.b32.xlu1 %v1517_v43, 272  ;;  %1493 = vbcast.lane.b32.xlu0 %v1479_v62, 280 }
 0x2c9   :  { %1561 = vbcast.lane.b32.xlu1 %v1555_v59, 264  ;;  %1557 = vbcast.lane.b32.xlu0 %v1555_v59, 256 }
 0x2cd   :  { %1546 = vbcast.lane.b32.xlu1 %v1536_v9, 272  ;;  %1512 = vbcast.lane.b32.xlu0 %v1498_v26, 280 }
 0x2d1   :  { %1565 = vbcast.lane.b32.xlu1 %v1555_v59, 272  ;;  %1531 = vbcast.lane.b32.xlu0 %v1517_v43, 280 }
 0x2d5   :  { %1569 = vbcast.lane.b32.xlu1 %v1555_v59, 280  ;;  %1550 = vbcast.lane.b32.xlu0 %v1536_v9, 280 }
 0x30b   :  { %v1429_v47 = vpop.permute.xlu1 %1428  ;;  %v1425_v22 = vpop.permute.xlu0 %1424 }
 0x30c   :  { %v1572_v40 = vsub.f32 %v1429_v47, %v4796_v42  ;;  %v1571_v50 = vsub.f32 %v1425_v22, %v4799_v23 }
 0x30e   :  { %v1604_v54 = vmul.f32 %v4804_v3, %v1572_v40  ;;  %v1603_v10 = vmul.f32 %v4807_v38, %v1571_v50 }
 0x30f   :  { %v1448_v8 = vpop.permute.xlu1 %1447  ;;  %v1444_v39 = vpop.permute.xlu0 %1443 }
 0x310   :  { %v1576_v1 = vsub.f32 %v1448_v8, %v4796_v42  ;;  %v1575_v6 = vsub.f32 %v1444_v39, %v4799_v23  ;;  %3578 = vtanh.f32 %v1604_v54  ;;  %v6171_v54 = vld [vmem:[#allocation32_spill] sm:$0xff] }
 0x311   :  { %3580 = vtanh.f32 %v1603_v10 }
 0x312   :  { %v1608_v58 = vmul.f32 %v4804_v3, %v1576_v1  ;;  %v1607_v19 = vmul.f32 %v4807_v38, %v1575_v6 }
 0x313   :  { %v1467_v33 = vpop.permute.xlu1 %1466  ;;  %v1463_v46 = vpop.permute.xlu0 %1462 }
 0x314   :  { %v1580_v14 = vsub.f32 %v1467_v33, %v4796_v42  ;;  %v1579_v35 = vsub.f32 %v1463_v46, %v4799_v23  ;;  %3582 = vtanh.f32 %v1608_v58 }
 0x315   :  { %3584 = vtanh.f32 %v1607_v19 }
 0x316   :  { %v1612_v28 = vmul.f32 %v4804_v3, %v1580_v14  ;;  %v1611_v63 = vmul.f32 %v4807_v38, %v1579_v35  ;;  %v6172_v14 = vld [vmem:[#allocation33_spill] sm:$0xff] }
 0x317   :  { %v1452_v24 = vpop.permute.xlu1 %1451  ;;  %v1433_v60 = vpop.permute.xlu0 %1432 }
 0x318   :  { %v1573_v7 = vsub.f32 %v1433_v60, %v4812_v56  ;;  %v1577_v27 = vsub.f32 %v1452_v24, %v4812_v56  ;;  %3586 = vtanh.f32 %v1612_v28 }
 0x31a   :  { %v1605_v57 = vmul.f32 %v4819_v25, %v1573_v7  ;;  %v1609_v45 = vmul.f32 %v4819_v25, %v1577_v27  ;;  %v3579_v22 = vpop.eup %3578 }
 0x31b   :  { %v1486_v32 = vpop.permute.xlu1 %1485  ;;  %v1482_v36 = vpop.permute.xlu0 %1481  ;;  %v1772_v10 = vmul.f32 %v6171_v54, %v3579_v22 }
 0x31c   :  { %v1584_v29 = vsub.f32 %v1486_v32, %v4796_v42  ;;  %v1583_v5 = vsub.f32 %v1482_v36, %v4799_v23  ;;  %3588 = vtanh.f32 %v1605_v57  ;;  %v3581_v39 = vpop.eup %3580  ;;  %v1668_v36 = vmul.f32 %v4849_v53, %v3579_v22 }
 0x31d   :  { %3590 = vtanh.f32 %v1611_v63 }
 0x31e   :  { %v1616_v48 = vmul.f32 %v4804_v3, %v1584_v29  ;;  %v1615_v62 = vmul.f32 %v4807_v38, %v1583_v5  ;;  %3592 = vtanh.f32 %v1609_v45  ;;  %v3583_v46 = vpop.eup %3582  ;;  %v6174_v5 = vld [vmem:[#allocation24_spill] sm:$0xff] }
 0x31f   :  { %v1501_v49 = vpop.permute.xlu1 %1500  ;;  %v1471_v34 = vpop.permute.xlu0 %1470  ;;  %v1776_v63 = vmul.f32 %v6171_v54, %v3583_v46 }
 0x320   :  { %v1581_v26 = vsub.f32 %v1471_v34, %v4812_v56  ;;  %v1587_v43 = vsub.f32 %v1501_v49, %v4799_v23  ;;  %v3585_v60 = vpop.eup %3584  ;;  %v1667_v49 = vmul.f32 %v6172_v14, %v3581_v39  ;;  %v6173_v34 = vld [vmem:[#allocation25_spill] sm:$0xff] }
 0x321   :  { %v1771_v58 = vmul.f32 %v6173_v34, %v3581_v39 }
 0x322   :  { %v1613_v33 = vmul.f32 %v4819_v25, %v1581_v26  ;;  %v1619_v24 = vmul.f32 %v4807_v38, %v1587_v43  ;;  %v3587_v6 = vpop.eup %3586  ;;  %v1699_v29 = vadd.f32 %v1668_v36, %v1667_v49  ;;  %v5111_v26 = vld [vmem:[#allocation14 + $0x8] sm:$0xff] }
 0x323   :  { %v1437_v21 = vpop.permute.xlu1 %1436  ;;  %v1505_v18 = vpop.permute.xlu0 %1504  ;;  %v1780_v39 = vmul.f32 %v6171_v54, %v3587_v6 }
 0x324   :  { %v1574_v13 = vsub.f32 %v1437_v21, %v4823_v41  ;;  %v1588_v9 = vsub.f32 %v1505_v18, %v4796_v42 }
 0x326   :  { %v1606_v30 = vmul.f32 %v4829_v37, %v1574_v13  ;;  %v1620_v23 = vmul.f32 %v4804_v3, %v1588_v9  ;;  %v3589_v38 = vpop.eup %3588  ;;  %v1672_v3 = vmul.f32 %v4849_v53, %v3583_v46  ;;  %v1803_v13 = vadd.f32 %v1772_v10, %v1771_v58  ;;  %v5114_v9 = vld [vmem:[#allocation13] sm:$0xff]  ;;  %v5134_v58 = vld [vmem:[#allocation13 + $0x10] sm:$0xff] }
 0x327   :  { %v1490_v12 = vpop.permute.xlu1 %1489  ;;  %v1456_v51 = vpop.permute.xlu0 %1455  ;;  %v1669_v45 = vmul.f32 %v6174_v5, %v3589_v38  ;;  %v5131_v10 = vld [vmem:[#allocation14] sm:$0xff] }
 0x328   :  { %3594 = vtanh.f32 %v1606_v30  ;;  %v1578_v8 = vsub.f32 %v1456_v51, %v4823_v41  ;;  %v1585_v40 = vsub.f32 %v1490_v12, %v4812_v56  ;;  %v1671_v56 = vmul.f32 %v6172_v14, %v3585_v60  ;;  %v3591_v19 = vpop.eup %3590 }
 0x329   :  { %3596 = vtanh.f32 %v1616_v48  ;;  %v3593_v18 = vpop.eup %3592  ;;  %v1775_v12 = vmul.f32 %v6173_v34, %v3585_v60 }
 0x32a   :  { %3598 = vtanh.f32 %v1615_v62  ;;  %v1610_v1 = vmul.f32 %v4829_v37, %v1578_v8  ;;  %v1617_v35 = vmul.f32 %v4819_v25, %v1585_v40  ;;  %v1708_v30 = vadd.f32 %v1672_v3, %v1671_v56  ;;  %v6175_v25 = vld [vmem:[#allocation26_spill] sm:$0xff] }
 0x32b   :  { %v1524_v59 = vpop.permute.xlu1 %1523  ;;  %v5082_v47 = vpop.permute.xlu0 %1519  ;;  %3600 = vtanh.f32 %v1613_v33  ;;  %v1773_v51 = vmul.f32 %v6175_v25, %v3589_v38  ;;  %v1676_v62 = vmul.f32 %v4849_v53, %v3587_v6  ;;  %v1673_v60 = vmul.f32 %v6174_v5, %v3593_v18 }
 0x32c   :  { %3602 = vtanh.f32 %v1619_v24  ;;  %v1592_v27 = vsub.f32 %v1524_v59, %v4796_v42  ;;  %v1591_v59 = vsub.f32 %v5082_v47, %v5114_v9  ;;  %v1779_v24 = vmul.f32 %v6173_v34, %v3591_v19 }
 0x32d   :  { %3604 = vtanh.f32 %v1620_v23  ;;  %v1777_v23 = vmul.f32 %v6175_v25, %v3593_v18  ;;  %v1700_v40 = vadd.f32 %v1699_v29, %v1669_v45  ;;  %v1804_v47 = vadd.f32 %v1803_v13, %v1773_v51 }
 0x32e   :  { %3606 = vtanh.f32 %v1610_v1  ;;  %v1624_v43 = vmul.f32 %v5111_v26, %v1592_v27  ;;  %v1812_v6 = vadd.f32 %v1776_v63, %v1775_v12  ;;  %v1623_v49 = vmul.f32 %v5131_v10, %v1591_v59 }
 0x32f   :  { %v5089_v50 = vpop.permute.xlu1 %1508  ;;  %v1475_v32 = vpop.permute.xlu0 %1474  ;;  %3608 = vtanh.f32 %v1617_v35  ;;  %v1821_v13 = vadd.f32 %v1780_v39, %v1779_v24  ;;  %v1709_v63 = vadd.f32 %v1708_v30, %v1673_v60 }
 0x330   :  { %v1582_v7 = vsub.f32 %v1475_v32, %v4823_v41  ;;  %v1589_v38 = vsub.f32 %v5089_v50, %v5134_v58  ;;  %v1813_v45 = vadd.f32 %v1812_v6, %v1777_v23 }
 0x332   :  { %v3595_v57 = vpop.eup %3594  ;;  %v1614_v42 = vmul.f32 %v4829_v37, %v1582_v7  ;;  %v1675_v37 = vmul.f32 %v6172_v14, %v3591_v19 }
 0x333   :  { %v5101_v28 = vpop.permute.xlu1 %1542  ;;  %v5103_v21 = vpop.permute.xlu0 %1538  ;;  %v1670_v33 = vmul.f32 %v4897_v2, %v3595_v57  ;;  %v1774_v46 = vmul.f32 %v4900_v61, %v3595_v57 }
 0x334   :  { %v3597_v41 = vpop.eup %3596  ;;  %3610 = vtanh.f32 %v1614_v42  ;;  %v1717_v29 = vadd.f32 %v1676_v62, %v1675_v37  ;;  %v1595_v30 = vsub.f32 %v5103_v21, %v5114_v9  ;;  %v5155_v62 = vld [vmem:[#allocation13 + $0x18] sm:$0xff] }
 0x335   :  { %v3599_v48 = vpop.eup %3598  ;;  %v1680_v32 = vmul.f32 %v4849_v53, %v3597_v41  ;;  %3612 = vtanh.f32 %v1624_v43  ;;  %v1784_v19 = vmul.f32 %v6171_v54, %v3597_v41  ;;  %v1701_v27 = vadd.f32 %v1700_v40, %v1670_v33  ;;  %v5146_v43 = vld [vmem:[#allocation13 + $0x8] sm:$0xff]  ;;  %6176 = vst [vmem:[#allocation27_spill] sm:$0xff] %v5155_v62 }
 0x336   :  { %v1679_v36 = vmul.f32 %v6172_v14, %v3599_v48  ;;  %v3601_v1 = vpop.eup %3600  ;;  %v1783_v35 = vmul.f32 %v6173_v34, %v3599_v48  ;;  %v1805_v18 = vadd.f32 %v1804_v47, %v1774_v46  ;;  %v1596_v41 = vsub.f32 %v5101_v28, %v5146_v43  ;;  %v5150_v48 = vld [vmem:[#allocation14 + $0x10] sm:$0xff] }
 0x337   :  { %v5118_v22 = vpop.permute.xlu1 %1527  ;;  %v5120_v8 = vpop.permute.xlu0 %1493  ;;  %v1677_v50 = vmul.f32 %v6174_v5, %v3601_v1  ;;  %v1781_v42 = vmul.f32 %v6175_v25, %v3601_v1  ;;  %3614 = vtanh.f32 %v1623_v49  ;;  %v1621_v59 = vmul.f32 %v5150_v48, %v1589_v38 }
 0x338   :  { %v3603_v7 = vpop.eup %3602  ;;  %v1726_v51 = vadd.f32 %v1680_v32, %v1679_v36  ;;  %v1586_v39 = vsub.f32 %v5120_v8, %v5155_v62  ;;  %v5161_v46 = vadd.f32 %v1784_v19, %v1783_v35  ;;  %v1702_v24 = vrot.slane %v1701_v27, 4 }
 0x339   :  { %v3605_v57 = vpop.eup %3604  ;;  %v1806_v28 = vrot.slane %v1805_v18, 4  ;;  %v1683_v40 = vmul.f32 %v6172_v14, %v3603_v7  ;;  %v1787_v47 = vmul.f32 %v6173_v34, %v3603_v7  ;;  %v5168_v36 = vadd.f32 %v1717_v29, %v1677_v50  ;;  %v5175_v14 = vld [vmem:[#allocation14 + $0x18] sm:$0xff] }
 0x33a   :  { %v3607_v12 = vpop.eup %3606  ;;  %v1684_v60 = vmul.f32 %v4849_v53, %v3605_v57  ;;  %v1788_v21 = vmul.f32 %v6171_v54, %v3605_v57  ;;  %v1628_v1 = vmul.f32 %v5111_v26, %v1596_v41  ;;  %v1593_v6 = vsub.f32 %v5118_v22, %v5134_v58  ;;  %6177 = vst [vmem:[#allocation32_spill] sm:$0xff] %v5175_v14 }
 0x33b   :  { %v5138_v3 = vpop.permute.xlu1 %1561  ;;  %v5140_v56 = vpop.permute.xlu0 %1557  ;;  %v1674_v32 = vmul.f32 %v4897_v2, %v3607_v12  ;;  %v1778_v8 = vmul.f32 %v4900_v61, %v3607_v12  ;;  %v1822_v49 = vadd.f32 %v1821_v13, %v1781_v42  ;;  %3616 = vtanh.f32 %v1621_v59 }
 0x33c   :  { %v3609_v23 = vpop.eup %3608  ;;  %v1627_v53 = vmul.f32 %v5131_v10, %v1595_v30  ;;  %v1618_v34 = vmul.f32 %v5175_v14, %v1586_v39  ;;  %v1703_v2 = vadd.f32 %v1702_v24, %v1701_v27  ;;  %v1807_v7 = vadd.f32 %v1806_v28, %v1805_v18 }
 0x33d   :  { %v5178_v19 = vadd.f32 %v1684_v60, %v1683_v40  ;;  %v1681_v35 = vmul.f32 %v6174_v5, %v3609_v23  ;;  %v5181_v29 = vadd.f32 %v1788_v21, %v1787_v47  ;;  %v1710_v22 = vadd.f32 %v1709_v63, %v1674_v32 }
 0x33e   :  { %v3611_v38 = vpop.eup %3610  ;;  %3618 = vtanh.f32 %v1618_v34  ;;  %v1600_v13 = vsub.f32 %v5138_v3, %v5146_v43  ;;  %v1785_v50 = vmul.f32 %v6175_v25, %v3609_v23  ;;  %v1814_v42 = vadd.f32 %v1813_v45, %v1778_v8  ;;  %v5196_v25 = vld [vmem:[%s6077_s9 + $0x8] sm:$0xff]  ;;  %v5210_v8 = vld [vmem:[%s6077_s9] sm:$0xff] }
 0x33f   :  { %v5159_v37 = vpop.permute.xlu1 %1546  ;;  %v1513_v33 = vpop.permute.xlu0 %1512  ;;  %3620 = vtanh.f32 %v1628_v1  ;;  %v1625_v27 = vmul.f32 %v5150_v48, %v1593_v6  ;;  %v1782_v18 = vmul.f32 %v4900_v61, %v3611_v38  ;;  %v1599_v41 = vsub.f32 %v5140_v56, %v5114_v9  ;;  %6178 = vst [vmem:[#allocation33_spill] sm:$0xff] %v5196_v25  ;;  %6179 = vst [vmem:[#allocation25_spill] sm:$0xff] %v5210_v8 }
 0x340   :  { %v3613_v57 = vpop.eup %3612  ;;  %3622 = vtanh.f32 %v1627_v53  ;;  %v1632_v5 = vmul.f32 %v5111_v26, %v1600_v13  ;;  %v1704_v63 = vrot.slane %v1703_v2, 2  ;;  %v1808_v59 = vrot.slane %v1807_v7, 2 }
 0x341   :  { %v5191_v30 = vadd.f32 %v1726_v51, %v1681_v35  ;;  %v1688_v3 = vmul.f32 %v5196_v25, %v3613_v57  ;;  %v3615_v39 = vpop.eup %3614  ;;  %v1711_v61 = vrot.slane %v1710_v22, 4  ;;  %v1631_v24 = vmul.f32 %v5131_v10, %v1599_v41 }
 0x342   :  { %v1597_v28 = vsub.f32 %v5159_v37, %v5134_v58  ;;  %v1590_v56 = vsub.f32 %v1513_v33, %v5155_v62  ;;  %v1815_v60 = vrot.slane %v1814_v42, 4  ;;  %3624 = vtanh.f32 %v1625_v27  ;;  %v5216_v33 = vld [vmem:[%s6077_s9 + $0x18] sm:$0xff]  ;;  %v5225_v27 = vld [vmem:[#allocation16] sm:$0xff] }
 0x343   :  { %v1566_v54 = vpop.permute.xlu1 %1565  ;;  %v1532_v12 = vpop.permute.xlu0 %1531  ;;  %v1823_v40 = vadd.f32 %v1822_v49, %v1782_v18  ;;  %3626 = vtanh.f32 %v1632_v5  ;;  %v1687_v37 = vmul.f32 %v5210_v8, %v3615_v39  ;;  %v1678_v1 = vmul.f32 %v5216_v33, %v3611_v38  ;;  %6181 = vst [vmem:[#allocation26_spill] sm:$0xff] %v5225_v27 }
 0x344   :  { %v1601_v51 = vsub.f32 %v1566_v54, %v5134_v58  ;;  %v1594_v23 = vsub.f32 %v1532_v12, %v5155_v62  ;;  %v1622_v47 = vmul.f32 %v5175_v14, %v1590_v56  ;;  %3628 = vtanh.f32 %v1631_v24  ;;  %v5221_v54 = vld [vmem:[#allocation16 + $0x8] sm:$0xff] }
 0x345   :  { %v1629_v6 = vmul.f32 %v5150_v48, %v1597_v28  ;;  %v3617_v49 = vpop.eup %3616  ;;  %v1809_v53 = vadd.f32 %v1808_v59, %v1807_v7  ;;  %v1831_v34 = vadd.f32 %v5161_v46, %v1785_v50  ;;  %6180 = vst [vmem:[#allocation24_spill] sm:$0xff] %v5221_v54  ;;  %v1792_v35 = vmul.f32 %v5221_v54, %v3613_v57 }
 0x346   :  { %v1633_v13 = vmul.f32 %v5150_v48, %v1601_v51  ;;  %v1712_v12 = vadd.f32 %v1711_v61, %v1710_v22  ;;  %v1791_v18 = vmul.f32 %v5225_v27, %v3615_v39  ;;  %v1626_v38 = vmul.f32 %v5175_v14, %v1594_v23  ;;  %v5237_v39 = vld [vmem:[%s6077_s9 + $0x10] sm:$0xff] }
 0x347   :  { %v1570_v45 = vpop.permute.xlu1 %1569  ;;  %v1551_v32 = vpop.permute.xlu0 %1550  ;;  %v1824_v7 = vrot.slane %v1823_v40, 4  ;;  %3630 = vtanh.f32 %v1622_v47  ;;  %v1816_v57 = vadd.f32 %v1815_v60, %v1814_v42  ;;  %v1744_v59 = vadd.f32 %v1688_v3, %v1687_v37  ;;  %6182 = vst [vmem:[#allocation34_spill] sm:$0xff] %v5237_v39  ;;  %v5243_v42 = vld [vmem:[#allocation16 + $0x10] sm:$0xff] }
 0x348   :  { %v1602_v21 = vsub.f32 %v1570_v45, %v5155_v62  ;;  %v1598_v5 = vsub.f32 %v1551_v32, %v5155_v62  ;;  %v3619_v41 = vpop.eup %3618  ;;  %v5230_v45 = vadd.f32 %v1704_v63, %v1703_v2  ;;  %v1719_v22 = vadd.f32 %v5168_v36, %v1678_v1  ;;  %v5240_v63 = vld [vmem:[#allocation16 + $0x18] sm:$0xff]  ;;  %6183 = vst [vmem:[#allocation35_spill] sm:$0xff] %v5243_v42 }
 0x349   :  { %v3621_v50 = vpop.eup %3620  ;;  %3632 = vtanh.f32 %v1629_v6  ;;  %v1810_v24 = vrot.slane %v1809_v53, 1  ;;  %v1685_v2 = vmul.f32 %v5237_v39, %v3617_v49  ;;  %v1786_v28 = vmul.f32 %v5240_v63, %v3619_v41 }
 0x34a   :  { %v1634_v46 = vmul.f32 %v5175_v14, %v1602_v21  ;;  %v3623_v61 = vpop.eup %3622  ;;  %3634 = vtanh.f32 %v1633_v13  ;;  %v1713_v56 = vrot.slane %v1712_v12, 2  ;;  %v1789_v36 = vmul.f32 %v5243_v42, %v3617_v49 }
 0x34b   :  { %3636 = vtanh.f32 %v1626_v38  ;;  %v1630_v3 = vmul.f32 %v5175_v14, %v1598_v5  ;;  %v1825_v60 = vadd.f32 %v1824_v7, %v1823_v40  ;;  %v1682_v51 = vmul.f32 %v5216_v33, %v3619_v41 }
 0x34c   :  { %v1832_v23 = vadd.f32 %v1831_v34, %v1786_v28  ;;  %3638 = vtanh.f32 %v1634_v46  ;;  %v3625_v47 = vpop.eup %3624  ;;  %v1817_v21 = vrot.slane %v1816_v57, 2  ;;  %v1720_v32 = vrot.slane %v1719_v22, 4 }
 0x34d   :  { %v1692_v37 = vmul.f32 %v5196_v25, %v3621_v50  ;;  %v1691_v1 = vmul.f32 %v5210_v8, %v3623_v61  ;;  %v3627_v6 = vpop.eup %3626  ;;  %v5250_v13 = vadd.f32 %v1810_v24, %v1809_v53  ;;  %v1848_v62 = vadd.f32 %v1792_v35, %v1791_v18 }
 0x34e   :  { %v1796_v49 = vmul.f32 %v5221_v54, %v3621_v50  ;;  %v1795_v38 = vmul.f32 %v5225_v27, %v3623_v61  ;;  %v3629_v40 = vpop.eup %3628  ;;  %v1736_v5 = vadd.f32 %v5178_v19, %v1685_v2  ;;  %v1840_v34 = vadd.f32 %v5181_v29, %v1789_v36 }
 0x34f   :  { %v1833_v41 = vrot.slane %v1832_v23, 4  ;;  %3640 = vtanh.f32 %v1630_v3  ;;  %v1826_v7 = vrot.slane %v1825_v60, 2  ;;  %v1689_v46 = vmul.f32 %v5237_v39, %v3625_v47 }
 0x350   :  { %v1793_v28 = vmul.f32 %v5243_v42, %v3625_v47  ;;  %v1728_v53 = vadd.f32 %v5191_v30, %v1682_v51  ;;  %v5259_v24 = vadd.f32 %v1713_v56, %v1712_v12  ;;  %v5261_v35 = vadd.f32 %v1817_v21, %v1816_v57 }
 0x351   :  { %v5263_v18 = vadd.f32 %v1720_v32, %v1719_v22  ;;  %v1753_v50 = vadd.f32 %v1692_v37, %v1691_v1  ;;  %v3631_v61 = vpop.eup %3630  ;;  %v1857_v19 = vadd.f32 %v1796_v49, %v1795_v38  ;;  %v1696_v29 = vmul.f32 %v5196_v25, %v3627_v6 }
 0x352   :  { %v1800_v2 = vmul.f32 %v5221_v54, %v3627_v6  ;;  %v1695_v36 = vmul.f32 %v5210_v8, %v3629_v40  ;;  %v1834_v14 = vadd.f32 %v1833_v41, %v1832_v23  ;;  %v1799_v47 = vmul.f32 %v5225_v27, %v3629_v40 }
 0x353   :  { %v3633_v3 = vpop.eup %3632  ;;  %v1686_v30 = vmul.f32 %v5216_v33, %v3631_v61  ;;  %v1790_v12 = vmul.f32 %v5240_v63, %v3631_v61  ;;  %v5271_v22 = vadd.f32 %v1826_v7, %v1825_v60  ;;  %v1745_v56 = vadd.f32 %v1744_v59, %v1689_v46 }
 0x354   :  { %v3635_v57 = vpop.eup %3634  ;;  %v1849_v51 = vadd.f32 %v1848_v62, %v1793_v28  ;;  %v1729_v21 = vrot.slane %v1728_v53, 4  ;;  %v1762_v38 = vadd.f32 %v1696_v29, %v1695_v36  ;;  %v1693_v40 = vmul.f32 %v5237_v39, %v3633_v3 }
 0x355   :  { %v3637_v32 = vpop.eup %3636  ;;  %v1737_v37 = vadd.f32 %v1736_v5, %v1686_v30  ;;  %v1841_v1 = vadd.f32 %v1840_v34, %v1790_v12  ;;  %v1697_v6 = vmul.f32 %v5237_v39, %v3635_v57  ;;  %v1801_v49 = vmul.f32 %v5243_v42, %v3635_v57 }
 0x356   :  { %v3639_v23 = vpop.eup %3638  ;;  %v1690_v41 = vmul.f32 %v5216_v33, %v3637_v32  ;;  %v1794_v61 = vmul.f32 %v5240_v63, %v3637_v32  ;;  %v1835_v60 = vrot.slane %v1834_v14, 2  ;;  %v1866_v7 = vadd.f32 %v1800_v2, %v1799_v47 }
 0x357   :  { %v1797_v62 = vmul.f32 %v5243_v42, %v3633_v3  ;;  %v1842_v59 = vrot.slane %v1841_v1, 4  ;;  %v1738_v46 = vrot.slane %v1737_v37, 4  ;;  %v1763_v5 = vadd.f32 %v1762_v38, %v1697_v6 }
 0x358   :  { %v1746_v34 = vadd.f32 %v1745_v56, %v1690_v41  ;;  %v1850_v28 = vadd.f32 %v1849_v51, %v1794_v61  ;;  %v1867_v57 = vadd.f32 %v1866_v7, %v1801_v49  ;;  %v1698_v29 = vmul.f32 %v5216_v33, %v3639_v23 }
 0x359   :  { %v3641_v30 = vpop.eup %3640  ;;  %v1843_v12 = vadd.f32 %v1842_v59, %v1841_v1  ;;  %v1802_v36 = vmul.f32 %v5240_v63, %v3639_v23  ;;  %v1730_v39 = vadd.f32 %v1729_v21, %v1728_v53  ;;  %v1754_v27 = vadd.f32 %v1753_v50, %v1693_v40 }
 0x35a   :  { %v1747_v8 = vrot.slane %v1746_v34, 4  ;;  %v1851_v32 = vrot.slane %v1850_v28, 4  ;;  %v1858_v54 = vadd.f32 %v1857_v19, %v1797_v62  ;;  %v1764_v47 = vadd.f32 %v1763_v5, %v1698_v29 }
 0x35b   :  { %v1844_v2 = vrot.slane %v1843_v12, 2  ;;  %v1868_v3 = vadd.f32 %v1867_v57, %v1802_v36  ;;  %v1836_v42 = vadd.f32 %v1835_v60, %v1834_v14  ;;  %v1694_v56 = vmul.f32 %v5216_v33, %v3641_v30 }
 0x35c   :  { %v1852_v25 = vadd.f32 %v1851_v32, %v1850_v28  ;;  %v1798_v51 = vmul.f32 %v5240_v63, %v3641_v30  ;;  %v1739_v1 = vadd.f32 %v1738_v46, %v1737_v37  ;;  %v1748_v49 = vadd.f32 %v1747_v8, %v1746_v34 }
 0x35d   :  { %v1845_v6 = vadd.f32 %v1844_v2, %v1843_v12  ;;  %v1869_v38 = vrot.slane %v1868_v3, 4  ;;  %v1765_v23 = vrot.slane %v1764_v47, 4  ;;  %v1755_v53 = vadd.f32 %v1754_v27, %v1694_v56 }
 0x35e   :  { %v1853_v41 = vrot.slane %v1852_v25, 2  ;;  %v1859_v50 = vadd.f32 %v1858_v54, %v1798_v51  ;;  %v1819_v21 = vrot.slane %v5261_v35, 1  ;;  %v1722_v19 = vrot.slane %v5263_v18, 2 }
 0x35f   :  { %v1828_v40 = vrot.slane %v5271_v22, 1  ;;  %v1870_v14 = vadd.f32 %v1869_v38, %v1868_v3  ;;  %v1731_v61 = vrot.slane %v1730_v39, 2  ;;  %v1756_v7 = vrot.slane %v1755_v53, 4 }
 0x360   :  { %v1854_v60 = vadd.f32 %v1853_v41, %v1852_v25  ;;  %v1860_v62 = vrot.slane %v1859_v50, 4  ;;  %v1837_v59 = vrot.slane %v1836_v42, 1  ;;  %v1740_v37 = vrot.slane %v1739_v1, 2 }
 0x361   :  { %v1749_v46 = vrot.slane %v1748_v49, 2  ;;  %v1871_v8 = vrot.slane %v1870_v14, 2  ;;  %v1846_v5 = vrot.slane %v1845_v6, 1  ;;  %v1766_v34 = vadd.f32 %v1765_v23, %v1764_v47 }
 0x362   :  { %v1757_v28 = vadd.f32 %v1756_v7, %v1755_v53  ;;  %v1861_v27 = vadd.f32 %v1860_v62, %v1859_v50  ;;  %v1820_v54 = vadd.f32 %v1819_v21, %v5261_v35  ;;  %v1723_v30 = vadd.f32 %v1722_v19, %v5263_v18 }
 0x363   :  { %v1855_v12 = vrot.slane %v1854_v60, 1  ;;  %v1872_v57 = vadd.f32 %v1871_v8, %v1870_v14  ;;  %v1829_v29 = vadd.f32 %v1828_v40, %v5271_v22  ;;  %v1732_v36 = vadd.f32 %v1731_v61, %v1730_v39 }
 0x364   :  { %v1758_v25 = vrot.slane %v1757_v28, 2  ;;  %v1862_v32 = vrot.slane %v1861_v27, 2  ;;  %v1715_v2 = vrot.slane %v5259_v24, 1  ;;  %v1838_v3 = vadd.f32 %v1837_v59, %v1836_v42 }
 0x365   :  { %v1741_v56 = vadd.f32 %v1740_v37, %v1739_v1  ;;  %v1873_v51 = vrot.slane %v1872_v57, 1  ;;  %v1847_v38 = vadd.f32 %v1846_v5, %v1845_v6  ;;  %v1750_v47 = vadd.f32 %v1749_v46, %v1748_v49 }
 0x366   :  { %v1767_v41 = vrot.slane %v1766_v34, 2  ;;  %v1863_v23 = vadd.f32 %v1862_v32, %v1861_v27  ;;  %v1902_v35 = vsel %vm310_vm0, %v1820_v54, %v5250_v13  ;;  %v1724_v18 = vrot.slane %v1723_v30, 1 }
 0x367   :  { %v1856_v53 = vadd.f32 %v1855_v12, %v1854_v60  ;;  %v1759_v50 = vadd.f32 %v1758_v25, %v1757_v28  ;;  %v1706_v22 = vrot.slane %v5230_v45, 1  ;;  %v1903_v39 = vsel %vm312_vm1, %v1829_v29, %v1902_v35 }
 0x368   :  { %v1733_v21 = vrot.slane %v1732_v36, 1  ;;  %v1864_v19 = vrot.slane %v1863_v23, 1  ;;  %v1716_v42 = vadd.f32 %v1715_v2, %v5259_v24  ;;  %v1904_v1 = vsel %vm314_vm2, %v1838_v3, %v1903_v39 }
 0x369   :  { %v1742_v6 = vrot.slane %v1741_v56, 1  ;;  %v1874_v49 = vadd.f32 %v1873_v51, %v1872_v57  ;;  %v1905_v40 = vsel %vm316_vm3, %v1847_v38, %v1904_v1  ;;  %v1751_v14 = vrot.slane %v1750_v47, 1 }
 0x36a   :  { %v1768_v61 = vadd.f32 %v1767_v41, %v1766_v34  ;;  %v1865_v13 = vadd.f32 %v1864_v19, %v1863_v23  ;;  %v1725_v7 = vadd.f32 %v1724_v18, %v1723_v30  ;;  %v1906_v60 = vsel %vm318_vm4, %v1856_v53, %v1905_v40 }
 0x36b   :  { %v1760_v62 = vrot.slane %v1759_v50, 1  ;;  %v1707_v59 = vadd.f32 %v1706_v22, %v5230_v45  ;;  %v1734_v37 = vadd.f32 %v1733_v21, %v1732_v36  ;;  %v1743_v8 = vadd.f32 %v1742_v6, %v1741_v56  ;;  %v5310_v36 = vld [vmem:[%s6078_s10] ss:$0 sm:$0xff] }
 0x36c   :  { %v1907_v46 = vsel %vm320_vm5, %v1865_v13, %v1906_v60  ;;  %v1752_v28 = vadd.f32 %v1751_v14, %v1750_v47  ;;  %v1769_v27 = vrot.slane %v1768_v61, 1  ;;  %v1875_v25 = vmul.f32 %v5310_v36, %v5039_v15 }
 0x36d   :  { %v1908_v24 = vsel %vm322_vm6, %v1874_v49, %v1907_v46  ;;  %v1885_v5 = vsel %vm310_vm0, %v1716_v42, %v1707_v59  ;;  %v1761_v30 = vadd.f32 %v1760_v62, %v1759_v50 }
 0x36e   :  { %v1910_v54 = vadd.f32 %v1908_v24, %v4736_v0  ;;  %v1886_v34 = vsel %vm312_vm1, %v1725_v7, %v1885_v5  ;;  %v1770_v29 = vadd.f32 %v1769_v27, %v1768_v61  ;;  %v1876_v3 = vadd.f32 %v1875_v25, %v4767_v52 }
 0x36f   :  { %v1887_v12 = vsel %vm314_vm2, %v1734_v37, %v1886_v34 }
 0x370   :  { %3642 = vrcp.f32 %v1910_v54  ;;  %v1888_v45 = vsel %vm316_vm3, %v1743_v8, %v1887_v12 }
 0x371   :  { %v1889_v57 = vsel %vm318_vm4, %v1752_v28, %v1888_v45 }
 0x372   :  { %v1890_v32 = vsel %vm320_vm5, %v1761_v30, %v1889_v57 }
 0x373   :  { %v1891_v2 = vsel %vm322_vm6, %v1770_v29, %v1890_v32  ;;  %v6184_v29 = vld [vmem:[#allocation27_spill] sm:$0xff] }
 0x374   :  { %v1893_v56 = vadd.f32 %v1891_v2, %v1876_v3 }
 0x37a   :  { %v3643_v51 = vpop.eup %3642 }
 0x37b   :  { %v5317_v38 = vmul.f32 %v3643_v51, %v1893_v56  ;;  %v6185_v56 = vld [vmem:[#allocation32_spill] sm:$0xff] }
 0x37d   :  { %v1916_v47 = vrot.slane %v5317_v38, %v6154_v55  ;;  %v1935_v41 = vrot.slane %v5317_v38, %v6155_v4  ;;  %v1954_v15 = vrot.slane %v5317_v38, %v6156_v11  ;;  %v1973_v23 = vrot.slane %v5317_v38, %v6157_v16 }
 0x37e   :  { %v1992_v35 = vrot.slane %v5317_v38, %v6167_v17  ;;  %v2011_v18 = vrot.slane %v5317_v38, %v6168_v31  ;;  %v2030_v53 = vrot.slane %v5317_v38, %v6169_v44  ;;  %v2049_v50 = vrot.slane %v5317_v38, %v6170_v20 }
 0x37f   :  { %1922 = vbcast.lane.b32.xlu1 %v1916_v47, 264  ;;  %1918 = vbcast.lane.b32.xlu0 %v1916_v47, 256 }
 0x383   :  { %1941 = vbcast.lane.b32.xlu1 %v1935_v41, 264  ;;  %1937 = vbcast.lane.b32.xlu0 %v1935_v41, 256 }
 0x387   :  { %1960 = vbcast.lane.b32.xlu1 %v1954_v15, 264  ;;  %1956 = vbcast.lane.b32.xlu0 %v1954_v15, 256 }
 0x38b   :  { %1945 = vbcast.lane.b32.xlu1 %v1935_v41, 272  ;;  %1926 = vbcast.lane.b32.xlu0 %v1916_v47, 272 }
 0x38f   :  { %1979 = vbcast.lane.b32.xlu1 %v1973_v23, 264  ;;  %1975 = vbcast.lane.b32.xlu0 %v1973_v23, 256 }
 0x393   :  { %1994 = vbcast.lane.b32.xlu1 %v1992_v35, 256  ;;  %1964 = vbcast.lane.b32.xlu0 %v1954_v15, 272 }
 0x397   :  { %1930 = vbcast.lane.b32.xlu1 %v1916_v47, 280  ;;  %1998 = vbcast.lane.b32.xlu0 %v1992_v35, 264 }
 0x39b   :  { %1983 = vbcast.lane.b32.xlu1 %v1973_v23, 272  ;;  %1949 = vbcast.lane.b32.xlu0 %v1935_v41, 280 }
 0x39f   :  { %2017 = vbcast.lane.b32.xlu1 %v2011_v18, 264  ;;  %2013 = vbcast.lane.b32.xlu0 %v2011_v18, 256 }
 0x3a3   :  { %2002 = vbcast.lane.b32.xlu1 %v1992_v35, 272  ;;  %1968 = vbcast.lane.b32.xlu0 %v1954_v15, 280 }
 0x3a7   :  { %2036 = vbcast.lane.b32.xlu1 %v2030_v53, 264  ;;  %2032 = vbcast.lane.b32.xlu0 %v2030_v53, 256 }
 0x3ab   :  { %2021 = vbcast.lane.b32.xlu1 %v2011_v18, 272  ;;  %1987 = vbcast.lane.b32.xlu0 %v1973_v23, 280 }
 0x3af   :  { %2055 = vbcast.lane.b32.xlu1 %v2049_v50, 264  ;;  %2051 = vbcast.lane.b32.xlu0 %v2049_v50, 256 }
 0x3b3   :  { %2040 = vbcast.lane.b32.xlu1 %v2030_v53, 272  ;;  %2006 = vbcast.lane.b32.xlu0 %v1992_v35, 280 }
 0x3b7   :  { %2059 = vbcast.lane.b32.xlu1 %v2049_v50, 272  ;;  %2025 = vbcast.lane.b32.xlu0 %v2011_v18, 280 }
 0x3bb   :  { %2063 = vbcast.lane.b32.xlu1 %v2049_v50, 280  ;;  %2044 = vbcast.lane.b32.xlu0 %v2030_v53, 280 }
 0x3f1   :  { %v1923_v22 = vpop.permute.xlu1 %1922  ;;  %v1919_v39 = vpop.permute.xlu0 %1918 }
 0x3f2   :  { %v2066_v40 = vsub.f32 %v1923_v22, %v5146_v43  ;;  %v2065_v14 = vsub.f32 %v1919_v39, %v5114_v9 }
 0x3f4   :  { %v2098_v62 = vmul.f32 %v5111_v26, %v2066_v40  ;;  %v2097_v59 = vmul.f32 %v5131_v10, %v2065_v14 }
 0x3f5   :  { %v1942_v21 = vpop.permute.xlu1 %1941  ;;  %v1938_v19 = vpop.permute.xlu0 %1937 }
 0x3f6   :  { %v2070_v7 = vsub.f32 %v1942_v21, %v5146_v43  ;;  %v2069_v60 = vsub.f32 %v1938_v19, %v5114_v9  ;;  %3644 = vtanh.f32 %v2098_v62 }
 0x3f7   :  { %3646 = vtanh.f32 %v2097_v59 }
 0x3f8   :  { %v2102_v24 = vmul.f32 %v5111_v26, %v2070_v7  ;;  %v2101_v28 = vmul.f32 %v5131_v10, %v2069_v60  ;;  %v6186_v7 = vld [vmem:[#allocation33_spill] sm:$0xff] }
 0x3f9   :  { %v1961_v42 = vpop.permute.xlu1 %1960  ;;  %v1957_v1 = vpop.permute.xlu0 %1956 }
 0x3fa   :  { %v2074_v37 = vsub.f32 %v1961_v42, %v5146_v43  ;;  %v2073_v27 = vsub.f32 %v1957_v1, %v5114_v9  ;;  %3648 = vtanh.f32 %v2102_v24 }
 0x3fb   :  { %3650 = vtanh.f32 %v2101_v28 }
 0x3fc   :  { %v2106_v34 = vmul.f32 %v5111_v26, %v2074_v37  ;;  %v2105_v32 = vmul.f32 %v5131_v10, %v2073_v27  ;;  %v6187_v37 = vld [vmem:[#allocation24_spill] sm:$0xff] }
 0x3fd   :  { %v1946_v6 = vpop.permute.xlu1 %1945  ;;  %v1927_v49 = vpop.permute.xlu0 %1926 }
 0x3fe   :  { %v2067_v5 = vsub.f32 %v1927_v49, %v5134_v58  ;;  %v2071_v54 = vsub.f32 %v1946_v6, %v5134_v58  ;;  %3652 = vtanh.f32 %v2106_v34 }
 0x400   :  { %v2099_v45 = vmul.f32 %v5150_v48, %v2067_v5  ;;  %v2103_v3 = vmul.f32 %v5150_v48, %v2071_v54  ;;  %v3645_v39 = vpop.eup %3644  ;;  %v6189_v5 = vld [vmem:[#allocation26_spill] sm:$0xff] }
 0x401   :  { %v1980_v61 = vpop.permute.xlu1 %1979  ;;  %v1976_v13 = vpop.permute.xlu0 %1975  ;;  %v2162_v60 = vmul.f32 %v6186_v7, %v3645_v39 }
 0x402   :  { %v2078_v57 = vsub.f32 %v1980_v61, %v5146_v43  ;;  %v2077_v2 = vsub.f32 %v1976_v13, %v5114_v9  ;;  %3654 = vtanh.f32 %v2099_v45  ;;  %v3647_v19 = vpop.eup %3646 }
 0x403   :  { %3656 = vtanh.f32 %v2105_v32  ;;  %v2265_v28 = vmul.f32 %v6189_v5, %v3647_v19 }
 0x404   :  { %v2110_v15 = vmul.f32 %v5111_v26, %v2078_v57  ;;  %v2109_v23 = vmul.f32 %v5131_v10, %v2077_v2  ;;  %3658 = vtanh.f32 %v2103_v3  ;;  %v3649_v1 = vpop.eup %3648 }
 0x405   :  { %v1995_v46 = vpop.permute.xlu1 %1994  ;;  %v1965_v8 = vpop.permute.xlu0 %1964  ;;  %v2166_v54 = vmul.f32 %v6186_v7, %v3649_v1 }
 0x406   :  { %v2075_v35 = vsub.f32 %v1965_v8, %v5134_v58  ;;  %v2081_v18 = vsub.f32 %v1995_v46, %v5114_v9  ;;  %v3651_v49 = vpop.eup %3650  ;;  %v2266_v46 = vmul.f32 %v6187_v37, %v3645_v39  ;;  %v6188_v8 = vld [vmem:[#allocation25_spill] sm:$0xff]  ;;  %v6191_v39 = vld [vmem:[#allocation35_spill] sm:$0xff] }
 0x407   :  { %v2161_v24 = vmul.f32 %v6188_v8, %v3647_v19  ;;  %v2165_v34 = vmul.f32 %v6188_v8, %v3651_v49 }
 0x408   :  { %v2107_v42 = vmul.f32 %v5150_v48, %v2075_v35  ;;  %v2113_v6 = vmul.f32 %v5131_v10, %v2081_v18  ;;  %v3653_v59 = vpop.eup %3652 }
 0x409   :  { %v1931_v30 = vpop.permute.xlu1 %1930  ;;  %v1999_v12 = vpop.permute.xlu0 %1998  ;;  %v2202_v18 = vadd.f32 %v2166_v54, %v2165_v34 }
 0x40a   :  { %v2068_v25 = vsub.f32 %v1931_v30, %v6184_v29  ;;  %v2082_v53 = vsub.f32 %v1999_v12, %v5146_v43 }
 0x40c   :  { %v2100_v51 = vmul.f32 %v6185_v56, %v2068_v25  ;;  %v2114_v40 = vmul.f32 %v5111_v26, %v2082_v53  ;;  %v3655_v27 = vpop.eup %3654  ;;  %v2269_v53 = vmul.f32 %v6189_v5, %v3651_v49 }
 0x40d   :  { %v1984_v47 = vpop.permute.xlu1 %1983  ;;  %v1950_v41 = vpop.permute.xlu0 %1949 }
 0x40e   :  { %3660 = vtanh.f32 %v2100_v51  ;;  %v2072_v21 = vsub.f32 %v1950_v41, %v6184_v29  ;;  %v2079_v14 = vsub.f32 %v1984_v47, %v5134_v58  ;;  %v3657_v12 = vpop.eup %3656  ;;  %v2193_v51 = vadd.f32 %v2162_v60, %v2161_v24 }
 0x40f   :  { %3662 = vtanh.f32 %v2110_v15  ;;  %v3659_v2 = vpop.eup %3658  ;;  %v2297_v47 = vadd.f32 %v2266_v46, %v2265_v28  ;;  %v2270_v41 = vmul.f32 %v6187_v37, %v3649_v1  ;;  %v6190_v15 = vld [vmem:[#allocation34_spill] sm:$0xff]  ;;  %v2169_v49 = vmul.f32 %v6188_v8, %v3657_v12 }
 0x410   :  { %3664 = vtanh.f32 %v2109_v23  ;;  %v2104_v62 = vmul.f32 %v6185_v56, %v2072_v21  ;;  %v2111_v45 = vmul.f32 %v5150_v48, %v2079_v14  ;;  %v2163_v23 = vmul.f32 %v6190_v15, %v3655_v27 }
 0x411   :  { %v2018_v50 = vpop.permute.xlu1 %2017  ;;  %v5360_v22 = vpop.permute.xlu0 %2013  ;;  %3666 = vtanh.f32 %v2107_v42  ;;  %v2267_v21 = vmul.f32 %v6191_v39, %v3655_v27  ;;  %v2170_v42 = vmul.f32 %v6186_v7, %v3653_v59  ;;  %v2273_v46 = vmul.f32 %v6189_v5, %v3657_v12 }
 0x412   :  { %3668 = vtanh.f32 %v2113_v6  ;;  %v2086_v57 = vsub.f32 %v2018_v50, %v5146_v43  ;;  %v2167_v24 = vmul.f32 %v6190_v15, %v3659_v2  ;;  %v2271_v28 = vmul.f32 %v6191_v39, %v3659_v2 }
 0x413   :  { %3670 = vtanh.f32 %v2114_v40  ;;  %v2085_v40 = vsub.f32 %v5360_v22, %v5114_v9  ;;  %v2194_v27 = vadd.f32 %v2193_v51, %v2163_v23  ;;  %v2298_v54 = vadd.f32 %v2297_v47, %v2267_v21 }
 0x414   :  { %3672 = vtanh.f32 %v2104_v62  ;;  %v2118_v6 = vmul.f32 %v5111_v26, %v2086_v57 }
 0x415   :  { %v5367_v61 = vpop.permute.xlu1 %2002  ;;  %v1969_v13 = vpop.permute.xlu0 %1968  ;;  %3674 = vtanh.f32 %v2111_v45  ;;  %v2117_v45 = vmul.f32 %v5131_v10, %v2085_v40 }
 0x416   :  { %v2076_v30 = vsub.f32 %v1969_v13, %v6184_v29  ;;  %v2274_v13 = vmul.f32 %v6187_v37, %v3653_v59  ;;  %v2083_v57 = vsub.f32 %v5367_v61, %v5134_v58 }
 0x418   :  { %v3661_v3 = vpop.eup %3660  ;;  %v2108_v50 = vmul.f32 %v6185_v56, %v2076_v30  ;;  %v2306_v30 = vadd.f32 %v2270_v41, %v2269_v53  ;;  %v2315_v44 = vadd.f32 %v2274_v13, %v2273_v46  ;;  %v2203_v41 = vadd.f32 %v2202_v18, %v2167_v24 }
 0x419   :  { %v5379_v25 = vpop.permute.xlu1 %2036  ;;  %v5381_v32 = vpop.permute.xlu0 %2032  ;;  %v2164_v60 = vmul.f32 %v5216_v33, %v3661_v3  ;;  %v2268_v62 = vmul.f32 %v5240_v63, %v3661_v3 }
 0x41a   :  { %v3663_v35 = vpop.eup %3662  ;;  %3676 = vtanh.f32 %v2108_v50  ;;  %v2211_v50 = vadd.f32 %v2170_v42, %v2169_v49  ;;  %v2307_v53 = vadd.f32 %v2306_v30, %v2271_v28  ;;  %v2090_v17 = vsub.f32 %v5379_v25, %v5146_v43 }
 0x41b   :  { %v3665_v19 = vpop.eup %3664  ;;  %v2174_v22 = vmul.f32 %v6186_v7, %v3663_v35  ;;  %3678 = vtanh.f32 %v2118_v6  ;;  %v2278_v2 = vmul.f32 %v6187_v37, %v3663_v35  ;;  %v2195_v47 = vadd.f32 %v2194_v27, %v2164_v60 }
 0x41c   :  { %v2173_v34 = vmul.f32 %v6188_v8, %v3665_v19  ;;  %v3667_v59 = vpop.eup %3666  ;;  %v2277_v51 = vmul.f32 %v6189_v5, %v3665_v19  ;;  %v2299_v23 = vadd.f32 %v2298_v54, %v2268_v62  ;;  %3680 = vtanh.f32 %v2117_v45 }
 0x41d   :  { %v5392_v1 = vpop.permute.xlu1 %2021  ;;  %v1988_v14 = vpop.permute.xlu0 %1987  ;;  %v2171_v31 = vmul.f32 %v6190_v15, %v3667_v59  ;;  %v2275_v61 = vmul.f32 %v6191_v39, %v3667_v59  ;;  %v2115_v35 = vmul.f32 %v5150_v48, %v2083_v57  ;;  %v2089_v19 = vsub.f32 %v5381_v32, %v5114_v9 }
 0x41e   :  { %v3669_v20 = vpop.eup %3668  ;;  %v2220_v40 = vadd.f32 %v2174_v22, %v2173_v34  ;;  %v2080_v42 = vsub.f32 %v1988_v14, %v6184_v29  ;;  %v2324_v49 = vadd.f32 %v2278_v2, %v2277_v51  ;;  %v2196_v60 = vrot.slane %v2195_v47, 4 }
 0x41f   :  { %v3671_v21 = vpop.eup %3670  ;;  %v2300_v62 = vrot.slane %v2299_v23, 4  ;;  %v2177_v28 = vmul.f32 %v6188_v8, %v3669_v20  ;;  %v2281_v25 = vmul.f32 %v6189_v5, %v3669_v20  ;;  %v5423_v22 = vadd.f32 %v2211_v50, %v2171_v31 }
 0x420   :  { %v3673_v6 = vpop.eup %3672  ;;  %v2178_v46 = vmul.f32 %v6186_v7, %v3671_v21  ;;  %v2282_v27 = vmul.f32 %v6187_v37, %v3671_v21  ;;  %v2122_v14 = vmul.f32 %v5111_v26, %v2090_v17  ;;  %v2087_v34 = vsub.f32 %v5392_v1, %v5134_v58 }
 0x421   :  { %v2056_v12 = vpop.permute.xlu1 %2055  ;;  %v5406_v3 = vpop.permute.xlu0 %2051  ;;  %v2168_v54 = vmul.f32 %v5216_v33, %v3673_v6  ;;  %v2272_v32 = vmul.f32 %v5240_v63, %v3673_v6  ;;  %v2316_v59 = vadd.f32 %v2315_v44, %v2275_v61  ;;  %3682 = vtanh.f32 %v2115_v35 }
 0x422   :  { %v3675_v24 = vpop.eup %3674  ;;  %v2121_v30 = vmul.f32 %v5131_v10, %v2089_v19  ;;  %v2112_v45 = vmul.f32 %v6185_v56, %v2080_v42  ;;  %v2197_v2 = vadd.f32 %v2196_v60, %v2195_v47  ;;  %v2301_v51 = vadd.f32 %v2300_v62, %v2299_v23 }
 0x423   :  { %v5431_v21 = vadd.f32 %v2178_v46, %v2177_v28  ;;  %v2175_v31 = vmul.f32 %v6190_v15, %v3675_v24  ;;  %v5434_v6 = vadd.f32 %v2282_v27, %v2281_v25  ;;  %v2204_v17 = vadd.f32 %v2203_v41, %v2168_v54 }
 0x424   :  { %v3677_v57 = vpop.eup %3676  ;;  %3684 = vtanh.f32 %v2112_v45  ;;  %v2094_v44 = vsub.f32 %v2056_v12, %v5146_v43  ;;  %v2279_v61 = vmul.f32 %v6191_v39, %v3675_v24  ;;  %v2308_v35 = vadd.f32 %v2307_v53, %v2272_v32 }
 0x425   :  { %v2041_v13 = vpop.permute.xlu1 %2040  ;;  %v2007_v18 = vpop.permute.xlu0 %2006  ;;  %3686 = vtanh.f32 %v2122_v14  ;;  %v2119_v19 = vmul.f32 %v5150_v48, %v2087_v34  ;;  %v2276_v47 = vmul.f32 %v5240_v63, %v3677_v57  ;;  %v2093_v42 = vsub.f32 %v5406_v3, %v5114_v9 }
 0x426   :  { %v3679_v50 = vpop.eup %3678  ;;  %3688 = vtanh.f32 %v2121_v30  ;;  %v2126_v23 = vmul.f32 %v5111_v26, %v2094_v44  ;;  %v2198_v60 = vrot.slane %v2197_v2, 2  ;;  %v2302_v41 = vrot.slane %v2301_v51, 2 }
 0x427   :  { %v5443_v62 = vadd.f32 %v2220_v40, %v2175_v31  ;;  %v2182_v43 = vmul.f32 %v6186_v7, %v3679_v50  ;;  %v3681_v46 = vpop.eup %3680  ;;  %v2205_v53 = vrot.slane %v2204_v17, 4  ;;  %v2125_v24 = vmul.f32 %v5131_v10, %v2093_v42 }
 0x428   :  { %v2091_v28 = vsub.f32 %v2041_v13, %v5134_v58  ;;  %v2084_v25 = vsub.f32 %v2007_v18, %v6184_v29  ;;  %v2309_v27 = vrot.slane %v2308_v35, 4  ;;  %3690 = vtanh.f32 %v2119_v19 }
 0x429   :  { %v2060_v20 = vpop.permute.xlu1 %2059  ;;  %v2026_v1 = vpop.permute.xlu0 %2025  ;;  %v2317_v3 = vadd.f32 %v2316_v59, %v2276_v47  ;;  %3692 = vtanh.f32 %v2126_v23  ;;  %v2181_v14 = vmul.f32 %v6188_v8, %v3681_v46  ;;  %v2172_v10 = vmul.f32 %v5216_v33, %v3677_v57 }
 0x42a   :  { %v2095_v26 = vsub.f32 %v2060_v20, %v5134_v58  ;;  %v2088_v9 = vsub.f32 %v2026_v1, %v6184_v29  ;;  %v2116_v40 = vmul.f32 %v6185_v56, %v2084_v25  ;;  %3694 = vtanh.f32 %v2125_v24 }
 0x42b   :  { %v2123_v13 = vmul.f32 %v5150_v48, %v2091_v28  ;;  %v3683_v18 = vpop.eup %3682  ;;  %v2303_v34 = vadd.f32 %v2302_v41, %v2301_v51  ;;  %v2325_v30 = vadd.f32 %v2324_v49, %v2279_v61  ;;  %v2286_v58 = vmul.f32 %v6187_v37, %v3679_v50 }
 0x42c   :  { %v2127_v59 = vmul.f32 %v5150_v48, %v2095_v26  ;;  %v2206_v45 = vadd.f32 %v2205_v53, %v2204_v17  ;;  %v2285_v20 = vmul.f32 %v6189_v5, %v3681_v46  ;;  %v2120_v31 = vmul.f32 %v6185_v56, %v2088_v9 }
 0x42d   :  { %v2064_v12 = vpop.permute.xlu1 %2063  ;;  %v2045_v32 = vpop.permute.xlu0 %2044  ;;  %v5461_v19 = vadd.f32 %v2198_v60, %v2197_v2  ;;  %v2318_v57 = vrot.slane %v2317_v3, 4  ;;  %3696 = vtanh.f32 %v2116_v40  ;;  %v2310_v49 = vadd.f32 %v2309_v27, %v2308_v35 }
 0x42e   :  { %v2096_v54 = vsub.f32 %v2064_v12, %v6184_v29  ;;  %v2092_v44 = vsub.f32 %v2045_v32, %v6184_v29  ;;  %v3685_v1 = vpop.eup %3684  ;;  %v2238_v61 = vadd.f32 %v2182_v43, %v2181_v14  ;;  %v2213_v50 = vadd.f32 %v5423_v22, %v2172_v10 }
 0x42f   :  { %v3687_v51 = vpop.eup %3686  ;;  %3698 = vtanh.f32 %v2123_v13  ;;  %v2304_v17 = vrot.slane %v2303_v34, 1  ;;  %v2179_v23 = vmul.f32 %v6190_v15, %v3683_v18  ;;  %v2280_v42 = vmul.f32 %v5240_v63, %v3685_v1 }
 0x430   :  { %v2128_v47 = vmul.f32 %v6185_v56, %v2096_v54  ;;  %v3689_v48 = vpop.eup %3688  ;;  %3700 = vtanh.f32 %v2127_v59  ;;  %v2207_v29 = vrot.slane %v2206_v45, 2  ;;  %v2283_v2 = vmul.f32 %v6191_v39, %v3683_v18 }
 0x431   :  { %3702 = vtanh.f32 %v2120_v31  ;;  %v2124_v60 = vmul.f32 %v6185_v56, %v2092_v44  ;;  %v2319_v41 = vadd.f32 %v2318_v57, %v2317_v3  ;;  %v2176_v35 = vmul.f32 %v5216_v33, %v3685_v1 }
 0x432   :  { %v2326_v43 = vadd.f32 %v2325_v30, %v2280_v42  ;;  %3704 = vtanh.f32 %v2128_v47  ;;  %v3691_v22 = vpop.eup %3690  ;;  %v2311_v12 = vrot.slane %v2310_v49, 2  ;;  %v2214_v46 = vrot.slane %v2213_v50, 4 }
 0x433   :  { %v2186_v53 = vmul.f32 %v6186_v7, %v3687_v51  ;;  %v2185_v24 = vmul.f32 %v6188_v8, %v3689_v48  ;;  %v3693_v28 = vpop.eup %3692  ;;  %v5472_v25 = vadd.f32 %v2304_v17, %v2303_v34  ;;  %v2342_v27 = vadd.f32 %v2286_v58, %v2285_v20 }
 0x434   :  { %v2290_v26 = vmul.f32 %v6187_v37, %v3687_v51  ;;  %v2289_v56 = vmul.f32 %v6189_v5, %v3689_v48  ;;  %v3695_v9 = vpop.eup %3694  ;;  %v2230_v3 = vadd.f32 %v5431_v21, %v2179_v23  ;;  %v2334_v40 = vadd.f32 %v5434_v6, %v2283_v2 }
 0x435   :  { %v2327_v54 = vrot.slane %v2326_v43, 4  ;;  %3706 = vtanh.f32 %v2124_v60  ;;  %v2320_v32 = vrot.slane %v2319_v41, 2  ;;  %v2183_v14 = vmul.f32 %v6190_v15, %v3691_v22 }
 0x436   :  { %v2287_v10 = vmul.f32 %v6191_v39, %v3691_v22  ;;  %v2222_v13 = vadd.f32 %v5443_v62, %v2176_v35  ;;  %v5481_v18 = vadd.f32 %v2207_v29, %v2206_v45  ;;  %v5483_v34 = vadd.f32 %v2311_v12, %v2310_v49 }
 0x437   :  { %v5485_v30 = vadd.f32 %v2214_v46, %v2213_v50  ;;  %v2247_v58 = vadd.f32 %v2186_v53, %v2185_v24  ;;  %v3697_v59 = vpop.eup %3696  ;;  %v2351_v21 = vadd.f32 %v2290_v26, %v2289_v56  ;;  %v2190_v6 = vmul.f32 %v6186_v7, %v3693_v28 }
 0x438   :  { %v2294_v20 = vmul.f32 %v6187_v37, %v3693_v28  ;;  %v2189_v31 = vmul.f32 %v6188_v8, %v3695_v9  ;;  %v2328_v1 = vadd.f32 %v2327_v54, %v2326_v43  ;;  %v2293_v57 = vmul.f32 %v6189_v5, %v3695_v9 }
 0x439   :  { %v3699_v44 = vpop.eup %3698  ;;  %v2180_v62 = vmul.f32 %v5216_v33, %v3697_v59  ;;  %v2284_v45 = vmul.f32 %v5240_v63, %v3697_v59  ;;  %v5493_v51 = vadd.f32 %v2320_v32, %v2319_v41  ;;  %v2239_v49 = vadd.f32 %v2238_v61, %v2183_v14 }
 0x43a   :  { %v3701_v47 = vpop.eup %3700  ;;  %v2343_v50 = vadd.f32 %v2342_v27, %v2287_v10  ;;  %v2223_v48 = vrot.slane %v2222_v13, 4  ;;  %v2256_v29 = vadd.f32 %v2190_v6, %v2189_v31  ;;  %v2187_v5 = vmul.f32 %v6190_v15, %v3699_v44 }
 0x43b   :  { %v3703_v17 = vpop.eup %3702  ;;  %v2231_v7 = vadd.f32 %v2230_v3, %v2180_v62  ;;  %v2335_v23 = vadd.f32 %v2334_v40, %v2284_v45  ;;  %v2191_v37 = vmul.f32 %v6190_v15, %v3701_v47  ;;  %v2295_v8 = vmul.f32 %v6191_v39, %v3701_v47  ;;  %v5504_v15 = vld [vmem:[%s6077_s9 + $0x18] sm:$0xff] }
 0x43c   :  { %v3705_v42 = vpop.eup %3704  ;;  %v2184_v2 = vmul.f32 %v5216_v33, %v3703_v17  ;;  %v2288_v60 = vmul.f32 %v5240_v63, %v3703_v17  ;;  %v2329_v41 = vrot.slane %v2328_v1, 2  ;;  %v2360_v35 = vadd.f32 %v2294_v20, %v2293_v57 }
 0x43d   :  { %v2291_v61 = vmul.f32 %v6191_v39, %v3699_v44  ;;  %v2336_v43 = vrot.slane %v2335_v23, 4  ;;  %v2232_v22 = vrot.slane %v2231_v7, 4  ;;  %v2257_v12 = vadd.f32 %v2256_v29, %v2191_v37 }
 0x43e   :  { %v2240_v46 = vadd.f32 %v2239_v49, %v2184_v2  ;;  %v2344_v53 = vadd.f32 %v2343_v50, %v2288_v60  ;;  %v2361_v27 = vadd.f32 %v2360_v35, %v2295_v8  ;;  %v2192_v33 = vmul.f32 %v5504_v15, %v3705_v42 }
 0x43f   :  { %v3707_v24 = vpop.eup %3706  ;;  %v2337_v28 = vadd.f32 %v2336_v43, %v2335_v23  ;;  %v2296_v26 = vmul.f32 %v5240_v63, %v3705_v42  ;;  %v2224_v56 = vadd.f32 %v2223_v48, %v2222_v13  ;;  %v2248_v9 = vadd.f32 %v2247_v58, %v2187_v5 }
 0x440   :  { %v2241_v39 = vrot.slane %v2240_v46, 4  ;;  %v2345_v3 = vrot.slane %v2344_v53, 4  ;;  %v2352_v40 = vadd.f32 %v2351_v21, %v2291_v61  ;;  %v2258_v32 = vadd.f32 %v2257_v12, %v2192_v33 }
 0x441   :  { %v2338_v54 = vrot.slane %v2337_v28, 2  ;;  %v2362_v14 = vadd.f32 %v2361_v27, %v2296_v26  ;;  %v2330_v10 = vadd.f32 %v2329_v41, %v2328_v1  ;;  %v2188_v6 = vmul.f32 %v5504_v15, %v3707_v24 }
 0x442   :  { %v2346_v59 = vadd.f32 %v2345_v3, %v2344_v53  ;;  %v2292_v20 = vmul.f32 %v5240_v63, %v3707_v24  ;;  %v2233_v31 = vadd.f32 %v2232_v22, %v2231_v7  ;;  %v2242_v57 = vadd.f32 %v2241_v39, %v2240_v46 }
 0x443   :  { %v2339_v44 = vadd.f32 %v2338_v54, %v2337_v28  ;;  %v2363_v62 = vrot.slane %v2362_v14, 4  ;;  %v2259_v47 = vrot.slane %v2258_v32, 4  ;;  %v2249_v13 = vadd.f32 %v2248_v9, %v2188_v6 }
 0x444   :  { %v2347_v45 = vrot.slane %v2346_v59, 2  ;;  %v2353_v58 = vadd.f32 %v2352_v40, %v2292_v20  ;;  %v2313_v49 = vrot.slane %v5483_v34, 1  ;;  %v2216_v21 = vrot.slane %v5485_v30, 2 }
 0x445   :  { %v2322_v50 = vrot.slane %v5493_v51, 1  ;;  %v2364_v1 = vadd.f32 %v2363_v62, %v2362_v14  ;;  %v2225_v48 = vrot.slane %v2224_v56, 2  ;;  %v2250_v23 = vrot.slane %v2249_v13, 4 }
 0x446   :  { %v2348_v17 = vadd.f32 %v2347_v45, %v2346_v59  ;;  %v2354_v37 = vrot.slane %v2353_v58, 4  ;;  %v2331_v63 = vrot.slane %v2330_v10, 1  ;;  %v2234_v7 = vrot.slane %v2233_v31, 2 }
 0x447   :  { %v2243_v8 = vrot.slane %v2242_v57, 2  ;;  %v2365_v42 = vrot.slane %v2364_v1, 2  ;;  %v2340_v29 = vrot.slane %v2339_v44, 1  ;;  %v2260_v5 = vadd.f32 %v2259_v47, %v2258_v32 }
 0x448   :  { %v2251_v2 = vadd.f32 %v2250_v23, %v2249_v13  ;;  %v2355_v60 = vadd.f32 %v2354_v37, %v2353_v58  ;;  %v2314_v41 = vadd.f32 %v2313_v49, %v5483_v34  ;;  %v2217_v35 = vadd.f32 %v2216_v21, %v5485_v30 }
 0x449   :  { %v2349_v61 = vrot.slane %v2348_v17, 1  ;;  %v2366_v43 = vadd.f32 %v2365_v42, %v2364_v1  ;;  %v2323_v22 = vadd.f32 %v2322_v50, %v5493_v51  ;;  %v2226_v12 = vadd.f32 %v2225_v48, %v2224_v56 }
 0x44a   :  { %v2252_v46 = vrot.slane %v2251_v2, 2  ;;  %v2356_v53 = vrot.slane %v2355_v60, 2  ;;  %v2209_v24 = vrot.slane %v5481_v18, 1  ;;  %v2332_v28 = vadd.f32 %v2331_v63, %v2330_v10 }
 0x44b   :  { %v2235_v27 = vadd.f32 %v2234_v7, %v2233_v31  ;;  %v2367_v33 = vrot.slane %v2366_v43, 1  ;;  %v2341_v26 = vadd.f32 %v2340_v29, %v2339_v44  ;;  %v2244_v9 = vadd.f32 %v2243_v8, %v2242_v57 }
 0x44c   :  { %v2261_v39 = vrot.slane %v2260_v5, 2  ;;  %v2357_v3 = vadd.f32 %v2356_v53, %v2355_v60  ;;  %v2396_v34 = vsel %vm310_vm0, %v2314_v41, %v5472_v25  ;;  %v2218_v30 = vrot.slane %v2217_v35, 1 }
 0x44d   :  { %v2350_v40 = vadd.f32 %v2349_v61, %v2348_v17  ;;  %v2253_v54 = vadd.f32 %v2252_v46, %v2251_v2  ;;  %v2200_v51 = vrot.slane %v5461_v19, 1  ;;  %v2397_v56 = vsel %vm312_vm1, %v2323_v22, %v2396_v34  ;;  %v6192_v22 = vld [vmem:[#allocation28_spill] sm:$0xff]  ;;  %v6193_v46 = vld [vmem:[#allocation29_spill] sm:$0xff] }
 0x44e   :  { %v2227_v32 = vrot.slane %v2226_v12, 1  ;;  %v2358_v14 = vrot.slane %v2357_v3, 1  ;;  %v2210_v10 = vadd.f32 %v2209_v24, %v5481_v18  ;;  %v2398_v59 = vsel %vm314_vm2, %v2332_v28, %v2397_v56  ;;  %v6194_v24 = vld [vmem:[#allocation30_spill] sm:$0xff] }
 0x44f   :  { %v2236_v6 = vrot.slane %v2235_v27, 1  ;;  %v2368_v20 = vadd.f32 %v2367_v33, %v2366_v43  ;;  %v2399_v31 = vsel %vm316_vm3, %v2341_v26, %v2398_v59  ;;  %v2245_v44 = vrot.slane %v2244_v9, 1 }
 0x450   :  { %v2262_v57 = vadd.f32 %v2261_v39, %v2260_v5  ;;  %v2359_v25 = vadd.f32 %v2358_v14, %v2357_v3  ;;  %v2219_v62 = vadd.f32 %v2218_v30, %v2217_v35  ;;  %v2400_v45 = vsel %vm318_vm4, %v2350_v40, %v2399_v31  ;;  %v5565_v31 = vld [vmem:[#allocation14 + $0x8] sm:$0xff] }
 0x451   :  { %v2254_v47 = vrot.slane %v2253_v54, 1  ;;  %v2201_v13 = vadd.f32 %v2200_v51, %v5461_v19  ;;  %v2228_v58 = vadd.f32 %v2227_v32, %v2226_v12  ;;  %v2237_v21 = vadd.f32 %v2236_v6, %v2235_v27  ;;  %v6195_v27 = vld [vmem:[#allocation31_spill] sm:$0xff]  ;;  %v5557_v51 = vld [vmem:[#allocation13 + $0x8] sm:$0xff] }
 0x452   :  { %v2401_v49 = vsel %vm320_vm5, %v2359_v25, %v2400_v45  ;;  %v2246_v1 = vadd.f32 %v2245_v44, %v2244_v9  ;;  %v2263_v48 = vrot.slane %v2262_v57, 1  ;;  %v2369_v42 = vmul.f32 %v5310_v36, %v5317_v38  ;;  %v5560_v32 = vld [vmem:[#allocation13] sm:$0xff] }
 0x453   :  { %v2402_v18 = vsel %vm322_vm6, %v2368_v20, %v2401_v49  ;;  %v2379_v50 = vsel %vm310_vm0, %v2210_v10, %v2201_v13  ;;  %v2255_v37 = vadd.f32 %v2254_v47, %v2253_v54 }
 0x454   :  { %v2404_v17 = vadd.f32 %v2402_v18, %v4736_v0  ;;  %v2380_v23 = vsel %vm312_vm1, %v2219_v62, %v2379_v50  ;;  %v2264_v8 = vadd.f32 %v2263_v48, %v2262_v57  ;;  %v2370_v2 = vadd.f32 %v2369_v42, %v4767_v52  ;;  %v5568_v57 = vld [vmem:[#allocation14] sm:$0xff] }
 0x455   :  { %v2381_v63 = vsel %vm314_vm2, %v2228_v58, %v2380_v23  ;;  %v5573_v58 = vld [vmem:[#allocation13 + $0x10] sm:$0xff] }
 0x456   :  { %3708 = vrcp.f32 %v2404_v17  ;;  %v2382_v19 = vsel %vm316_vm3, %v2237_v21, %v2381_v63  ;;  %v5580_v23 = vld [vmem:[#allocation14 + $0x10] sm:$0xff] }
 0x457   :  { %v2383_v7 = vsel %vm318_vm4, %v2246_v1, %v2382_v19  ;;  %v5584_v19 = vld [vmem:[#allocation13 + $0x18] sm:$0xff] }
 0x458   :  { %v2384_v29 = vsel %vm320_vm5, %v2255_v37, %v2383_v7 }
 0x459   :  { %v2385_v5 = vsel %vm322_vm6, %v2264_v8, %v2384_v29 }
 0x45a   :  { %v2387_v60 = vadd.f32 %v2385_v5, %v2370_v2  ;;  %v5590_v5 = vld [vmem:[#allocation14 + $0x18] sm:$0xff] }
 0x460   :  { %v3709_v41 = vpop.eup %3708 }
 0x461   :  { %v5539_v35 = vmul.f32 %v3709_v41, %v2387_v60 }
 0x463   :  { %v2410_v61 = vrot.slane %v5539_v35, %v6154_v55  ;;  %v2429_v43 = vrot.slane %v5539_v35, %v6155_v4  ;;  %v2448_v36 = vrot.slane %v5539_v35, %v6156_v11  ;;  %v2467_v38 = vrot.slane %v5539_v35, %v6157_v16 }
 0x464   :  { %v2486_v12 = vrot.slane %v5539_v35, %v6192_v22  ;;  %v2505_v53 = vrot.slane %v5539_v35, %v6193_v46  ;;  %v2524_v28 = vrot.slane %v5539_v35, %v6194_v24  ;;  %v2543_v33 = vrot.slane %v5539_v35, %v6195_v27 }
 0x465   :  { %2416 = vbcast.lane.b32.xlu1 %v2410_v61, 264  ;;  %2412 = vbcast.lane.b32.xlu0 %v2410_v61, 256 }
 0x469   :  { %2435 = vbcast.lane.b32.xlu1 %v2429_v43, 264  ;;  %2431 = vbcast.lane.b32.xlu0 %v2429_v43, 256 }
 0x46d   :  { %2454 = vbcast.lane.b32.xlu1 %v2448_v36, 264  ;;  %2450 = vbcast.lane.b32.xlu0 %v2448_v36, 256 }
 0x471   :  { %2439 = vbcast.lane.b32.xlu1 %v2429_v43, 272  ;;  %2420 = vbcast.lane.b32.xlu0 %v2410_v61, 272 }
 0x475   :  { %2473 = vbcast.lane.b32.xlu1 %v2467_v38, 264  ;;  %2469 = vbcast.lane.b32.xlu0 %v2467_v38, 256 }
 0x479   :  { %2488 = vbcast.lane.b32.xlu1 %v2486_v12, 256  ;;  %2458 = vbcast.lane.b32.xlu0 %v2448_v36, 272 }
 0x47d   :  { %2424 = vbcast.lane.b32.xlu1 %v2410_v61, 280  ;;  %2492 = vbcast.lane.b32.xlu0 %v2486_v12, 264 }
 0x481   :  { %2477 = vbcast.lane.b32.xlu1 %v2467_v38, 272  ;;  %2443 = vbcast.lane.b32.xlu0 %v2429_v43, 280 }
 0x485   :  { %2511 = vbcast.lane.b32.xlu1 %v2505_v53, 264  ;;  %2507 = vbcast.lane.b32.xlu0 %v2505_v53, 256 }
 0x489   :  { %2496 = vbcast.lane.b32.xlu1 %v2486_v12, 272  ;;  %2462 = vbcast.lane.b32.xlu0 %v2448_v36, 280 }
 0x48d   :  { %2530 = vbcast.lane.b32.xlu1 %v2524_v28, 264  ;;  %2526 = vbcast.lane.b32.xlu0 %v2524_v28, 256 }
 0x491   :  { %2515 = vbcast.lane.b32.xlu1 %v2505_v53, 272  ;;  %2481 = vbcast.lane.b32.xlu0 %v2467_v38, 280 }
 0x495   :  { %2549 = vbcast.lane.b32.xlu1 %v2543_v33, 264  ;;  %2545 = vbcast.lane.b32.xlu0 %v2543_v33, 256 }
 0x499   :  { %2534 = vbcast.lane.b32.xlu1 %v2524_v28, 272  ;;  %2500 = vbcast.lane.b32.xlu0 %v2486_v12, 280 }
 0x49d   :  { %2553 = vbcast.lane.b32.xlu1 %v2543_v33, 272  ;;  %2519 = vbcast.lane.b32.xlu0 %v2505_v53, 280 }
 0x4a1   :  { %2557 = vbcast.lane.b32.xlu1 %v2543_v33, 280  ;;  %2538 = vbcast.lane.b32.xlu0 %v2524_v28, 280 }
 0x4d7   :  { %v2417_v26 = vpop.permute.xlu1 %2416  ;;  %v2413_v9 = vpop.permute.xlu0 %2412 }
 0x4d8   :  { %v2560_v56 = vsub.f32 %v2417_v26, %v5557_v51  ;;  %v2559_v14 = vsub.f32 %v2413_v9, %v5560_v32 }
 0x4da   :  { %v2592_v44 = vmul.f32 %v5565_v31, %v2560_v56  ;;  %v2591_v25 = vmul.f32 %v5568_v57, %v2559_v14 }
 0x4db   :  { %v2436_v39 = vpop.permute.xlu1 %2435  ;;  %v2432_v3 = vpop.permute.xlu0 %2431 }
 0x4dc   :  { %v2564_v6 = vsub.f32 %v2436_v39, %v5557_v51  ;;  %v2563_v20 = vsub.f32 %v2432_v3, %v5560_v32  ;;  %3710 = vtanh.f32 %v2592_v44  ;;  %v5614_v44 = vld [vmem:[#allocation16 + $0x8] sm:$0xff] }
 0x4dd   :  { %3712 = vtanh.f32 %v2591_v25  ;;  %6196 = vst [vmem:[#allocation27_spill] sm:$0xff] %v5614_v44 }
 0x4de   :  { %v2596_v13 = vmul.f32 %v5565_v31, %v2564_v6  ;;  %v2595_v21 = vmul.f32 %v5568_v57, %v2563_v20 }
 0x4df   :  { %v2455_v34 = vpop.permute.xlu1 %2454  ;;  %v2451_v30 = vpop.permute.xlu0 %2450 }
 0x4e0   :  { %v2568_v62 = vsub.f32 %v2455_v34, %v5557_v51  ;;  %v2567_v18 = vsub.f32 %v2451_v30, %v5560_v32  ;;  %3714 = vtanh.f32 %v2596_v13 }
 0x4e1   :  { %3716 = vtanh.f32 %v2595_v21 }
 0x4e2   :  { %v2600_v1 = vmul.f32 %v5565_v31, %v2568_v62  ;;  %v2599_v8 = vmul.f32 %v5568_v57, %v2567_v18  ;;  %v5620_v62 = vld [vmem:[%s6077_s9] sm:$0xff] }
 0x4e3   :  { %v2440_v40 = vpop.permute.xlu1 %2439  ;;  %v2421_v54 = vpop.permute.xlu0 %2420  ;;  %6197 = vst [vmem:[#allocation32_spill] sm:$0xff] %v5620_v62 }
 0x4e4   :  { %v2561_v49 = vsub.f32 %v2421_v54, %v5573_v58  ;;  %v2565_v50 = vsub.f32 %v2440_v40, %v5573_v58  ;;  %3718 = vtanh.f32 %v2600_v1 }
 0x4e6   :  { %v2593_v37 = vmul.f32 %v5580_v23, %v2561_v49  ;;  %v2597_v29 = vmul.f32 %v5580_v23, %v2565_v50  ;;  %v3711_v33 = vpop.eup %3710 }
 0x4e7   :  { %v2474_v10 = vpop.permute.xlu1 %2473  ;;  %v2470_v59 = vpop.permute.xlu0 %2469  ;;  %v2760_v25 = vmul.f32 %v5614_v44, %v3711_v33 }
 0x4e8   :  { %v2572_v63 = vsub.f32 %v2474_v10, %v5557_v51  ;;  %v2571_v42 = vsub.f32 %v2470_v59, %v5560_v32  ;;  %3720 = vtanh.f32 %v2593_v37  ;;  %v3713_v9 = vpop.eup %3712  ;;  %v5610_v10 = vld [vmem:[%s6077_s9 + $0x8] sm:$0xff] }
 0x4e9   :  { %3722 = vtanh.f32 %v2599_v8  ;;  %v2656_v59 = vmul.f32 %v5610_v10, %v3711_v33 }
 0x4ea   :  { %v2604_v61 = vmul.f32 %v5565_v31, %v2572_v63  ;;  %v2603_v43 = vmul.f32 %v5568_v57, %v2571_v42  ;;  %3724 = vtanh.f32 %v2597_v29  ;;  %v3715_v3 = vpop.eup %3714 }
 0x4eb   :  { %v2489_v45 = vpop.permute.xlu1 %2488  ;;  %v2459_v47 = vpop.permute.xlu0 %2458  ;;  %v2660_v21 = vmul.f32 %v5610_v10, %v3715_v3 }
 0x4ec   :  { %v2569_v36 = vsub.f32 %v2459_v47, %v5573_v58  ;;  %v2575_v38 = vsub.f32 %v2489_v45, %v5560_v32  ;;  %v3717_v30 = vpop.eup %3716  ;;  %v2655_v45 = vmul.f32 %v5620_v62, %v3713_v9  ;;  %v5623_v47 = vld [vmem:[#allocation16] sm:$0xff] }
 0x4ed   :  { %6198 = vst [vmem:[#allocation33_spill] sm:$0xff] %v5623_v47  ;;  %v2759_v13 = vmul.f32 %v5623_v47, %v3713_v9  ;;  %v2659_v18 = vmul.f32 %v5620_v62, %v3717_v30 }
 0x4ee   :  { %v2601_v39 = vmul.f32 %v5580_v23, %v2569_v36  ;;  %v2607_v34 = vmul.f32 %v5568_v57, %v2575_v38  ;;  %v3719_v20 = vpop.eup %3718  ;;  %v2687_v42 = vadd.f32 %v2656_v59, %v2655_v45  ;;  %v2763_v36 = vmul.f32 %v5623_v47, %v3717_v30  ;;  %v5643_v38 = vld [vmem:[#allocation16 + $0x10] sm:$0xff] }
 0x4ef   :  { %v2425_v48 = vpop.permute.xlu1 %2424  ;;  %v2493_v17 = vpop.permute.xlu0 %2492  ;;  %v2791_v29 = vadd.f32 %v2760_v25, %v2759_v13  ;;  %6200 = vst [vmem:[#allocation25_spill] sm:$0xff] %v5643_v38  ;;  %v2768_v30 = vmul.f32 %v5614_v44, %v3719_v20 }
 0x4f0   :  { %v2562_v7 = vsub.f32 %v2425_v48, %v5584_v19  ;;  %v2576_v12 = vsub.f32 %v2493_v17, %v5557_v51 }
 0x4f2   :  { %v2594_v2 = vmul.f32 %v5590_v5, %v2562_v7  ;;  %v2608_v40 = vmul.f32 %v5565_v31, %v2576_v12  ;;  %v3721_v49 = vpop.eup %3720 }
 0x4f3   :  { %v2478_v60 = vpop.permute.xlu1 %2477  ;;  %v2444_v41 = vpop.permute.xlu0 %2443  ;;  %v2761_v12 = vmul.f32 %v5643_v38, %v3721_v49 }
 0x4f4   :  { %3726 = vtanh.f32 %v2594_v2  ;;  %v2566_v26 = vsub.f32 %v2444_v41, %v5584_v19  ;;  %v2573_v54 = vsub.f32 %v2478_v60, %v5573_v58  ;;  %v3723_v1 = vpop.eup %3722  ;;  %v2764_v2 = vmul.f32 %v5614_v44, %v3715_v3  ;;  %v5639_v60 = vld [vmem:[%s6077_s9 + $0x10] sm:$0xff] }
 0x4f5   :  { %3728 = vtanh.f32 %v2604_v61  ;;  %v3725_v7 = vpop.eup %3724  ;;  %6199 = vst [vmem:[#allocation24_spill] sm:$0xff] %v5639_v60  ;;  %v2657_v41 = vmul.f32 %v5639_v60, %v3721_v49  ;;  %v2792_v13 = vadd.f32 %v2791_v29, %v2761_v12 }
 0x4f6   :  { %3730 = vtanh.f32 %v2603_v43  ;;  %v2598_v6 = vmul.f32 %v5590_v5, %v2566_v26  ;;  %v2605_v48 = vmul.f32 %v5580_v23, %v2573_v54  ;;  %v2696_v43 = vadd.f32 %v2660_v21, %v2659_v18 }
 0x4f7   :  { %v2512_v53 = vpop.permute.xlu1 %2511  ;;  %v5598_v28 = vpop.permute.xlu0 %2507  ;;  %3732 = vtanh.f32 %v2601_v39  ;;  %v2664_v26 = vmul.f32 %v5610_v10, %v3719_v20  ;;  %v2661_v25 = vmul.f32 %v5639_v60, %v3725_v7  ;;  %v2765_v45 = vmul.f32 %v5643_v38, %v3725_v7 }
 0x4f8   :  { %3734 = vtanh.f32 %v2607_v34  ;;  %v2580_v17 = vsub.f32 %v2512_v53, %v5557_v51  ;;  %v2579_v39 = vsub.f32 %v5598_v28, %v5560_v32  ;;  %v2688_v28 = vadd.f32 %v2687_v42, %v2657_v41 }
 0x4f9   :  { %3736 = vtanh.f32 %v2608_v40  ;;  %v2663_v40 = vmul.f32 %v5620_v62, %v3723_v1  ;;  %v2800_v18 = vadd.f32 %v2764_v2, %v2763_v36  ;;  %v2697_v2 = vadd.f32 %v2696_v43, %v2661_v25 }
 0x4fa   :  { %3738 = vtanh.f32 %v2598_v6  ;;  %v2612_v9 = vmul.f32 %v5565_v31, %v2580_v17  ;;  %v2767_v6 = vmul.f32 %v5623_v47, %v3723_v1 }
 0x4fb   :  { %v5605_v56 = vpop.permute.xlu1 %2496  ;;  %v2463_v14 = vpop.permute.xlu0 %2462  ;;  %3740 = vtanh.f32 %v2605_v48  ;;  %v2801_v36 = vadd.f32 %v2800_v18, %v2765_v45 }
 0x4fc   :  { %v2570_v50 = vsub.f32 %v2463_v14, %v5584_v19  ;;  %v5656_v14 = vld [vmem:[#allocation16 + $0x18] sm:$0xff]  ;;  %v2577_v48 = vsub.f32 %v5605_v56, %v5573_v58  ;;  %v2809_v27 = vadd.f32 %v2768_v30, %v2767_v6 }
 0x4fe   :  { %v3727_v8 = vpop.eup %3726  ;;  %v2602_v53 = vmul.f32 %v5590_v5, %v2570_v50  ;;  %v2611_v50 = vmul.f32 %v5568_v57, %v2579_v39 }
 0x4ff   :  { %v5631_v37 = vpop.permute.xlu1 %2530  ;;  %v5633_v63 = vpop.permute.xlu0 %2526  ;;  %v2658_v54 = vmul.f32 %v5504_v15, %v3727_v8  ;;  %v2762_v59 = vmul.f32 %v5656_v14, %v3727_v8 }
 0x500   :  { %v3729_v61 = vpop.eup %3728  ;;  %3742 = vtanh.f32 %v2602_v53  ;;  %v2705_v53 = vadd.f32 %v2664_v26, %v2663_v40  ;;  %v2584_v46 = vsub.f32 %v5631_v37, %v5557_v51 }
 0x501   :  { %v3731_v33 = vpop.eup %3730  ;;  %v2668_v49 = vmul.f32 %v5610_v10, %v3729_v61  ;;  %3744 = vtanh.f32 %v2612_v9  ;;  %v2772_v7 = vmul.f32 %v5614_v44, %v3729_v61  ;;  %v2689_v29 = vadd.f32 %v2688_v28, %v2658_v54 }
 0x502   :  { %v2667_v20 = vmul.f32 %v5620_v62, %v3731_v33  ;;  %v3733_v21 = vpop.eup %3732  ;;  %v2771_v42 = vmul.f32 %v5623_v47, %v3731_v33  ;;  %v2793_v41 = vadd.f32 %v2792_v13, %v2762_v59  ;;  %3746 = vtanh.f32 %v2611_v50 }
 0x503   :  { %v5651_v3 = vpop.permute.xlu1 %2515  ;;  %v2482_v34 = vpop.permute.xlu0 %2481  ;;  %v2665_v24 = vmul.f32 %v5639_v60, %v3733_v21  ;;  %v2769_v56 = vmul.f32 %v5643_v38, %v3733_v21  ;;  %v2609_v61 = vmul.f32 %v5580_v23, %v2577_v48  ;;  %v2583_v33 = vsub.f32 %v5633_v63, %v5560_v32 }
 0x504   :  { %v3735_v8 = vpop.eup %3734  ;;  %v2714_v39 = vadd.f32 %v2668_v49, %v2667_v20  ;;  %v2574_v26 = vsub.f32 %v2482_v34, %v5584_v19  ;;  %v2818_v40 = vadd.f32 %v2772_v7, %v2771_v42  ;;  %v2690_v54 = vrot.slane %v2689_v29, 4 }
 0x505   :  { %v3737_v12 = vpop.eup %3736  ;;  %v2794_v59 = vrot.slane %v2793_v41, 4  ;;  %v2671_v45 = vmul.f32 %v5620_v62, %v3735_v8  ;;  %v2775_v37 = vmul.f32 %v5623_v47, %v3735_v8  ;;  %v5684_v49 = vadd.f32 %v2705_v53, %v2665_v24 }
 0x506   :  { %v3739_v9 = vpop.eup %3738  ;;  %v2672_v6 = vmul.f32 %v5610_v10, %v3737_v12  ;;  %v2776_v28 = vmul.f32 %v5614_v44, %v3737_v12  ;;  %v2616_v34 = vmul.f32 %v5565_v31, %v2584_v46  ;;  %v2581_v20 = vsub.f32 %v5651_v3, %v5573_v58 }
 0x507   :  { %v2550_v1 = vpop.permute.xlu1 %2549  ;;  %v5667_v17 = vpop.permute.xlu0 %2545  ;;  %v2662_v13 = vmul.f32 %v5504_v15, %v3739_v9  ;;  %v2766_v63 = vmul.f32 %v5656_v14, %v3739_v9  ;;  %v2810_v21 = vadd.f32 %v2809_v27, %v2769_v56  ;;  %3748 = vtanh.f32 %v2609_v61 }
 0x508   :  { %v3741_v25 = vpop.eup %3740  ;;  %v2615_v18 = vmul.f32 %v5568_v57, %v2583_v33  ;;  %v2606_v50 = vmul.f32 %v5590_v5, %v2574_v26  ;;  %v2691_v7 = vadd.f32 %v2690_v54, %v2689_v29  ;;  %v2795_v42 = vadd.f32 %v2794_v59, %v2793_v41 }
 0x509   :  { %v5692_v12 = vadd.f32 %v2672_v6, %v2671_v45  ;;  %v2669_v24 = vmul.f32 %v5639_v60, %v3741_v25  ;;  %v5695_v9 = vadd.f32 %v2776_v28, %v2775_v37  ;;  %v2698_v46 = vadd.f32 %v2697_v2, %v2662_v13 }
 0x50a   :  { %v3743_v8 = vpop.eup %3742  ;;  %3750 = vtanh.f32 %v2606_v50  ;;  %v2588_v27 = vsub.f32 %v2550_v1, %v5557_v51  ;;  %v2773_v56 = vmul.f32 %v5643_v38, %v3741_v25  ;;  %v2802_v61 = vadd.f32 %v2801_v36, %v2766_v63 }
 0x50b   :  { %v2535_v30 = vpop.permute.xlu1 %2534  ;;  %v2501_v43 = vpop.permute.xlu0 %2500  ;;  %3752 = vtanh.f32 %v2616_v34  ;;  %v2613_v33 = vmul.f32 %v5580_v23, %v2581_v20  ;;  %v2770_v29 = vmul.f32 %v5656_v14, %v3743_v8  ;;  %v2587_v26 = vsub.f32 %v5667_v17, %v5560_v32 }
 0x50c   :  { %v3745_v53 = vpop.eup %3744  ;;  %3754 = vtanh.f32 %v2615_v18  ;;  %v2620_v41 = vmul.f32 %v5565_v31, %v2588_v27  ;;  %v2692_v54 = vrot.slane %v2691_v7, 2  ;;  %v2796_v2 = vrot.slane %v2795_v42, 2 }
 0x50d   :  { %v5704_v59 = vadd.f32 %v2714_v39, %v2669_v24  ;;  %v2676_v1 = vmul.f32 %v5610_v10, %v3745_v53  ;;  %v3747_v25 = vpop.eup %3746  ;;  %v2699_v36 = vrot.slane %v2698_v46, 4  ;;  %v2619_v45 = vmul.f32 %v5568_v57, %v2587_v26 }
 0x50e   :  { %v2585_v37 = vsub.f32 %v2535_v30, %v5573_v58  ;;  %v2578_v28 = vsub.f32 %v2501_v43, %v5584_v19  ;;  %v2803_v13 = vrot.slane %v2802_v61, 4  ;;  %3756 = vtanh.f32 %v2613_v33 }
 0x50f   :  { %v2554_v48 = vpop.permute.xlu1 %2553  ;;  %v2520_v3 = vpop.permute.xlu0 %2519  ;;  %v2811_v34 = vadd.f32 %v2810_v21, %v2770_v29  ;;  %3758 = vtanh.f32 %v2620_v41  ;;  %v2675_v50 = vmul.f32 %v5620_v62, %v3747_v25  ;;  %v2666_v24 = vmul.f32 %v5504_v15, %v3743_v8 }
 0x510   :  { %v2589_v63 = vsub.f32 %v2554_v48, %v5573_v58  ;;  %v2582_v17 = vsub.f32 %v2520_v3, %v5584_v19  ;;  %v2610_v39 = vmul.f32 %v5590_v5, %v2578_v28  ;;  %3760 = vtanh.f32 %v2619_v45 }
 0x511   :  { %v2617_v30 = vmul.f32 %v5580_v23, %v2585_v37  ;;  %v3749_v43 = vpop.eup %3748  ;;  %v2797_v27 = vadd.f32 %v2796_v2, %v2795_v42  ;;  %v2819_v33 = vadd.f32 %v2818_v40, %v2773_v56  ;;  %v2780_v48 = vmul.f32 %v5614_v44, %v3745_v53 }
 0x512   :  { %v2621_v21 = vmul.f32 %v5580_v23, %v2589_v63  ;;  %v2700_v3 = vadd.f32 %v2699_v36, %v2698_v46  ;;  %v2779_v29 = vmul.f32 %v5623_v47, %v3747_v25  ;;  %v2614_v41 = vmul.f32 %v5590_v5, %v2582_v17 }
 0x513   :  { %v2558_v6 = vpop.permute.xlu1 %2557  ;;  %v2539_v18 = vpop.permute.xlu0 %2538  ;;  %v5722_v28 = vadd.f32 %v2692_v54, %v2691_v7  ;;  %v2812_v8 = vrot.slane %v2811_v34, 4  ;;  %3762 = vtanh.f32 %v2610_v39  ;;  %v2804_v40 = vadd.f32 %v2803_v13, %v2802_v61 }
 0x514   :  { %v2590_v20 = vsub.f32 %v2558_v6, %v5584_v19  ;;  %v2586_v26 = vsub.f32 %v2539_v18, %v5584_v19  ;;  %v3751_v6 = vpop.eup %3750  ;;  %v2732_v56 = vadd.f32 %v2676_v1, %v2675_v50  ;;  %v2707_v53 = vadd.f32 %v5684_v49, %v2666_v24 }
 0x515   :  { %v3753_v42 = vpop.eup %3752  ;;  %3764 = vtanh.f32 %v2617_v30  ;;  %v2798_v2 = vrot.slane %v2797_v27, 1  ;;  %v2673_v25 = vmul.f32 %v5639_v60, %v3749_v43  ;;  %v2774_v36 = vmul.f32 %v5656_v14, %v3751_v6 }
 0x516   :  { %v2622_v45 = vmul.f32 %v5590_v5, %v2590_v20  ;;  %v3755_v46 = vpop.eup %3754  ;;  %3766 = vtanh.f32 %v2621_v21  ;;  %v2701_v37 = vrot.slane %v2700_v3, 2  ;;  %v2777_v7 = vmul.f32 %v5643_v38, %v3749_v43 }
 0x517   :  { %3768 = vtanh.f32 %v2614_v41  ;;  %v2618_v54 = vmul.f32 %v5590_v5, %v2586_v26  ;;  %v2813_v63 = vadd.f32 %v2812_v8, %v2811_v34  ;;  %v2670_v61 = vmul.f32 %v5504_v15, %v3751_v6 }
 0x518   :  { %v2820_v1 = vadd.f32 %v2819_v33, %v2774_v36  ;;  %3770 = vtanh.f32 %v2622_v45  ;;  %v3757_v49 = vpop.eup %3756  ;;  %v2805_v13 = vrot.slane %v2804_v40, 2  ;;  %v2708_v17 = vrot.slane %v2707_v53, 4 }
 0x519   :  { %v2680_v39 = vmul.f32 %v5610_v10, %v3753_v42  ;;  %v2679_v20 = vmul.f32 %v5620_v62, %v3755_v46  ;;  %v3759_v18 = vpop.eup %3758  ;;  %v5733_v50 = vadd.f32 %v2798_v2, %v2797_v27  ;;  %v2836_v24 = vadd.f32 %v2780_v48, %v2779_v29 }
 0x51a   :  { %v2784_v30 = vmul.f32 %v5614_v44, %v3753_v42  ;;  %v2783_v43 = vmul.f32 %v5623_v47, %v3755_v46  ;;  %v3761_v34 = vpop.eup %3760  ;;  %v2724_v21 = vadd.f32 %v5692_v12, %v2673_v25  ;;  %v2828_v33 = vadd.f32 %v5695_v9, %v2777_v7 }
 0x51b   :  { %v2821_v41 = vrot.slane %v2820_v1, 4  ;;  %3772 = vtanh.f32 %v2618_v54  ;;  %v2814_v26 = vrot.slane %v2813_v63, 2  ;;  %v2677_v6 = vmul.f32 %v5639_v60, %v3757_v49 }
 0x51c   :  { %v2781_v8 = vmul.f32 %v5643_v38, %v3757_v49  ;;  %v2716_v27 = vadd.f32 %v5704_v59, %v2670_v61  ;;  %v5742_v45 = vadd.f32 %v2701_v37, %v2700_v3  ;;  %v5744_v48 = vadd.f32 %v2805_v13, %v2804_v40 }
 0x51d   :  { %v5746_v29 = vadd.f32 %v2708_v17, %v2707_v53  ;;  %v2741_v42 = vadd.f32 %v2680_v39, %v2679_v20  ;;  %v3763_v46 = vpop.eup %3762  ;;  %v2845_v12 = vadd.f32 %v2784_v30, %v2783_v43  ;;  %v2684_v9 = vmul.f32 %v5610_v10, %v3759_v18 }
 0x51e   :  { %v2788_v2 = vmul.f32 %v5614_v44, %v3759_v18  ;;  %v2683_v25 = vmul.f32 %v5620_v62, %v3761_v34  ;;  %v2822_v7 = vadd.f32 %v2821_v41, %v2820_v1  ;;  %v2787_v54 = vmul.f32 %v5623_v47, %v3761_v34 }
 0x51f   :  { %v3765_v36 = vpop.eup %3764  ;;  %v2674_v59 = vmul.f32 %v5504_v15, %v3763_v46  ;;  %v2778_v3 = vmul.f32 %v5656_v14, %v3763_v46  ;;  %v5754_v53 = vadd.f32 %v2814_v26, %v2813_v63  ;;  %v2733_v37 = vadd.f32 %v2732_v56, %v2677_v6 }
 0x520   :  { %v3767_v40 = vpop.eup %3766  ;;  %v2837_v61 = vadd.f32 %v2836_v24, %v2781_v8  ;;  %v2717_v49 = vrot.slane %v2716_v27, 4  ;;  %v2750_v30 = vadd.f32 %v2684_v9, %v2683_v25  ;;  %v2681_v43 = vmul.f32 %v5639_v60, %v3765_v36 }
 0x521   :  { %v3769_v13 = vpop.eup %3768  ;;  %v2725_v17 = vadd.f32 %v2724_v21, %v2674_v59  ;;  %v2829_v39 = vadd.f32 %v2828_v33, %v2778_v3  ;;  %v2685_v20 = vmul.f32 %v5639_v60, %v3767_v40  ;;  %v2789_v18 = vmul.f32 %v5643_v38, %v3767_v40 }
 0x522   :  { %v3771_v1 = vpop.eup %3770  ;;  %v2678_v34 = vmul.f32 %v5504_v15, %v3769_v13  ;;  %v2782_v41 = vmul.f32 %v5656_v14, %v3769_v13  ;;  %v2823_v63 = vrot.slane %v2822_v7, 2  ;;  %v2854_v26 = vadd.f32 %v2788_v2, %v2787_v54 }
 0x523   :  { %v2785_v56 = vmul.f32 %v5643_v38, %v3765_v36  ;;  %v2830_v24 = vrot.slane %v2829_v39, 4  ;;  %v2726_v6 = vrot.slane %v2725_v17, 4  ;;  %v2751_v21 = vadd.f32 %v2750_v30, %v2685_v20 }
 0x524   :  { %v2734_v33 = vadd.f32 %v2733_v37, %v2678_v34  ;;  %v2838_v8 = vadd.f32 %v2837_v61, %v2782_v41  ;;  %v2855_v3 = vadd.f32 %v2854_v26, %v2789_v18  ;;  %v2686_v9 = vmul.f32 %v5504_v15, %v3771_v1 }
 0x525   :  { %v3773_v46 = vpop.eup %3772  ;;  %v2831_v59 = vadd.f32 %v2830_v24, %v2829_v39  ;;  %v2790_v25 = vmul.f32 %v5656_v14, %v3771_v1  ;;  %v2718_v40 = vadd.f32 %v2717_v49, %v2716_v27  ;;  %v2742_v60 = vadd.f32 %v2741_v42, %v2681_v43 }
 0x526   :  { %v2735_v47 = vrot.slane %v2734_v33, 4  ;;  %v2839_v13 = vrot.slane %v2838_v8, 4  ;;  %v2846_v62 = vadd.f32 %v2845_v12, %v2785_v56  ;;  %v2752_v54 = vadd.f32 %v2751_v21, %v2686_v9 }
 0x527   :  { %v2832_v2 = vrot.slane %v2831_v59, 2  ;;  %v2856_v36 = vadd.f32 %v2855_v3, %v2790_v25  ;;  %v2824_v38 = vadd.f32 %v2823_v63, %v2822_v7  ;;  %v2682_v37 = vmul.f32 %v5504_v15, %v3773_v46 }
 0x528   :  { %v2840_v44 = vadd.f32 %v2839_v13, %v2838_v8  ;;  %v2786_v61 = vmul.f32 %v5656_v14, %v3773_v46  ;;  %v2727_v39 = vadd.f32 %v2726_v6, %v2725_v17  ;;  %v2736_v18 = vadd.f32 %v2735_v47, %v2734_v33 }
 0x529   :  { %v2833_v20 = vadd.f32 %v2832_v2, %v2831_v59  ;;  %v2857_v30 = vrot.slane %v2856_v36, 4  ;;  %v2753_v1 = vrot.slane %v2752_v54, 4  ;;  %v2743_v27 = vadd.f32 %v2742_v60, %v2682_v37 }
 0x52a   :  { %v2841_v34 = vrot.slane %v2840_v44, 2  ;;  %v2847_v42 = vadd.f32 %v2846_v62, %v2786_v61  ;;  %v2807_v49 = vrot.slane %v5744_v48, 1  ;;  %v2710_v12 = vrot.slane %v5746_v29, 2 }
 0x52b   :  { %v2816_v43 = vrot.slane %v5754_v53, 1  ;;  %v2858_v7 = vadd.f32 %v2857_v30, %v2856_v36  ;;  %v2719_v41 = vrot.slane %v2718_v40, 2  ;;  %v2744_v15 = vrot.slane %v2743_v27, 4 }
 0x52c   :  { %v2842_v63 = vadd.f32 %v2841_v34, %v2840_v44  ;;  %v2848_v26 = vrot.slane %v2847_v42, 4  ;;  %v2825_v56 = vrot.slane %v2824_v38, 1  ;;  %v2728_v17 = vrot.slane %v2727_v39, 2 }
 0x52d   :  { %v2737_v24 = vrot.slane %v2736_v18, 2  ;;  %v2859_v47 = vrot.slane %v2858_v7, 2  ;;  %v2834_v6 = vrot.slane %v2833_v20, 1  ;;  %v2754_v21 = vadd.f32 %v2753_v1, %v2752_v54 }
 0x52e   :  { %v2745_v33 = vadd.f32 %v2744_v15, %v2743_v27  ;;  %v2849_v60 = vadd.f32 %v2848_v26, %v2847_v42  ;;  %v2808_v62 = vadd.f32 %v2807_v49, %v5744_v48  ;;  %v2711_v8 = vadd.f32 %v2710_v12, %v5746_v29 }
 0x52f   :  { %v2843_v46 = vrot.slane %v2842_v63, 1  ;;  %v2860_v59 = vadd.f32 %v2859_v47, %v2858_v7  ;;  %v2817_v3 = vadd.f32 %v2816_v43, %v5754_v53  ;;  %v2720_v9 = vadd.f32 %v2719_v41, %v2718_v40 }
 0x530   :  { %v2746_v44 = vrot.slane %v2745_v33, 2  ;;  %v2850_v25 = vrot.slane %v2849_v60, 2  ;;  %v2703_v13 = vrot.slane %v5742_v45, 1  ;;  %v2826_v2 = vadd.f32 %v2825_v56, %v2824_v38 }
 0x531   :  { %v2729_v36 = vadd.f32 %v2728_v17, %v2727_v39  ;;  %v2861_v37 = vrot.slane %v2860_v59, 1  ;;  %v2835_v61 = vadd.f32 %v2834_v6, %v2833_v20  ;;  %v2738_v54 = vadd.f32 %v2737_v24, %v2736_v18 }
 0x532   :  { %v2755_v30 = vrot.slane %v2754_v21, 2  ;;  %v2851_v34 = vadd.f32 %v2850_v25, %v2849_v60  ;;  %v2890_v48 = vsel %vm310_vm0, %v2808_v62, %v5733_v50  ;;  %v2712_v29 = vrot.slane %v2711_v8, 1 }
 0x533   :  { %v2844_v1 = vadd.f32 %v2843_v46, %v2842_v63  ;;  %v2747_v27 = vadd.f32 %v2746_v44, %v2745_v33  ;;  %v2694_v53 = vrot.slane %v5722_v28, 1  ;;  %v2891_v40 = vsel %vm312_vm1, %v2817_v3, %v2890_v48  ;;  %v5793_v3 = vld [vmem:[%s6078_s10] ss:$0 sm:$0xff] }
 0x534   :  { %v2721_v42 = vrot.slane %v2720_v9, 1  ;;  %v2852_v49 = vrot.slane %v2851_v34, 1  ;;  %v2704_v38 = vadd.f32 %v2703_v13, %v5742_v45  ;;  %v2892_v39 = vsel %vm314_vm2, %v2826_v2, %v2891_v40 }
 0x535   :  { %v2730_v20 = vrot.slane %v2729_v36, 1  ;;  %v2862_v18 = vadd.f32 %v2861_v37, %v2860_v59  ;;  %v2893_v12 = vsel %vm316_vm3, %v2835_v61, %v2892_v39  ;;  %v2739_v43 = vrot.slane %v2738_v54, 1 }
 0x536   :  { %v2756_v7 = vadd.f32 %v2755_v30, %v2754_v21  ;;  %v2853_v50 = vadd.f32 %v2852_v49, %v2851_v34  ;;  %v2713_v41 = vadd.f32 %v2712_v29, %v2711_v8  ;;  %v2894_v63 = vsel %vm318_vm4, %v2844_v1, %v2893_v12  ;;  %v6202_v34 = vld [vmem:[#allocation30_spill] sm:$0xff] }
 0x537   :  { %v2748_v15 = vrot.slane %v2747_v27, 1  ;;  %v2695_v26 = vadd.f32 %v2694_v53, %v5722_v28  ;;  %v2722_v56 = vadd.f32 %v2721_v42, %v2720_v9  ;;  %v2731_v24 = vadd.f32 %v2730_v20, %v2729_v36 }
 0x538   :  { %v2895_v17 = vsel %vm320_vm5, %v2853_v50, %v2894_v63  ;;  %v2740_v6 = vadd.f32 %v2739_v43, %v2738_v54  ;;  %v2757_v33 = vrot.slane %v2756_v7, 1  ;;  %v2863_v9 = vmul.f32 %v5793_v3, %v5539_v35 }
 0x539   :  { %v2896_v45 = vsel %vm322_vm6, %v2862_v18, %v2895_v17  ;;  %v2873_v47 = vsel %vm310_vm0, %v2704_v38, %v2695_v26  ;;  %v2749_v62 = vadd.f32 %v2748_v15, %v2747_v27 }
 0x53a   :  { %v2898_v60 = vadd.f32 %v2896_v45, %v4736_v0  ;;  %v2874_v21 = vsel %vm312_vm1, %v2713_v41, %v2873_v47  ;;  %v2758_v59 = vadd.f32 %v2757_v33, %v2756_v7  ;;  %v2864_v13 = vadd.f32 %v2863_v9, %v4767_v52 }
 0x53b   :  { %v2875_v8 = vsel %vm314_vm2, %v2722_v56, %v2874_v21 }
 0x53c   :  { %3774 = vrcp.f32 %v2898_v60  ;;  %v2876_v28 = vsel %vm316_vm3, %v2731_v24, %v2875_v8 }
 0x53d   :  { %v2877_v46 = vsel %vm318_vm4, %v2740_v6, %v2876_v28 }
 0x53e   :  { %v2878_v44 = vsel %vm320_vm5, %v2749_v62, %v2877_v46 }
 0x53f   :  { %v2879_v25 = vsel %vm322_vm6, %v2758_v59, %v2878_v44 }
 0x540   :  { %v2881_v2 = vadd.f32 %v2879_v25, %v2864_v13 }
 0x546   :  { %v3775_v36 = vpop.eup %3774 }
 0x547   :  { %v5800_v37 = vmul.f32 %v3775_v36, %v2881_v2 }
 0x549   :  { %v2904_v61 = vrot.slane %v5800_v37, %v6154_v55  ;;  %v2923_v54 = vrot.slane %v5800_v37, %v6155_v4  ;;  %v2942_v35 = vrot.slane %v5800_v37, %v6156_v11  ;;  %v2961_v30 = vrot.slane %v5800_v37, %v6157_v16  ;;  %v6201_v4 = vld [vmem:[#allocation29_spill] sm:$0xff] }
 0x54a   :  { %v2980_v55 = vrot.slane %v5800_v37, %v6192_v22  ;;  %v2999_v11 = vrot.slane %v5800_v37, %v6201_v4  ;;  %v3018_v16 = vrot.slane %v5800_v37, %v6202_v34  ;;  %v6203_v22 = vld [vmem:[#allocation31_spill] sm:$0xff] }
 0x54b   :  { %2910 = vbcast.lane.b32.xlu1 %v2904_v61, 264  ;;  %2906 = vbcast.lane.b32.xlu0 %v2904_v61, 256  ;;  %v3037_v48 = vrot.slane %v5800_v37, %v6203_v22 }
 0x54f   :  { %2929 = vbcast.lane.b32.xlu1 %v2923_v54, 264  ;;  %2925 = vbcast.lane.b32.xlu0 %v2923_v54, 256 }
 0x553   :  { %2948 = vbcast.lane.b32.xlu1 %v2942_v35, 264  ;;  %2944 = vbcast.lane.b32.xlu0 %v2942_v35, 256 }
 0x557   :  { %2933 = vbcast.lane.b32.xlu1 %v2923_v54, 272  ;;  %2914 = vbcast.lane.b32.xlu0 %v2904_v61, 272 }
 0x55b   :  { %2967 = vbcast.lane.b32.xlu1 %v2961_v30, 264  ;;  %2963 = vbcast.lane.b32.xlu0 %v2961_v30, 256 }
 0x55f   :  { %2982 = vbcast.lane.b32.xlu1 %v2980_v55, 256  ;;  %2952 = vbcast.lane.b32.xlu0 %v2942_v35, 272 }
 0x563   :  { %2918 = vbcast.lane.b32.xlu1 %v2904_v61, 280  ;;  %2986 = vbcast.lane.b32.xlu0 %v2980_v55, 264 }
 0x567   :  { %2971 = vbcast.lane.b32.xlu1 %v2961_v30, 272  ;;  %2937 = vbcast.lane.b32.xlu0 %v2923_v54, 280 }
 0x56b   :  { %3005 = vbcast.lane.b32.xlu1 %v2999_v11, 264  ;;  %3001 = vbcast.lane.b32.xlu0 %v2999_v11, 256 }
 0x56f   :  { %2990 = vbcast.lane.b32.xlu1 %v2980_v55, 272  ;;  %2956 = vbcast.lane.b32.xlu0 %v2942_v35, 280 }
 0x573   :  { %3024 = vbcast.lane.b32.xlu1 %v3018_v16, 264  ;;  %3020 = vbcast.lane.b32.xlu0 %v3018_v16, 256 }
 0x577   :  { %3009 = vbcast.lane.b32.xlu1 %v2999_v11, 272  ;;  %2975 = vbcast.lane.b32.xlu0 %v2961_v30, 280 }
 0x57b   :  { %3043 = vbcast.lane.b32.xlu1 %v3037_v48, 264  ;;  %3039 = vbcast.lane.b32.xlu0 %v3037_v48, 256 }
 0x57f   :  { %3028 = vbcast.lane.b32.xlu1 %v3018_v16, 272  ;;  %2994 = vbcast.lane.b32.xlu0 %v2980_v55, 280 }
 0x583   :  { %3047 = vbcast.lane.b32.xlu1 %v3037_v48, 272  ;;  %3013 = vbcast.lane.b32.xlu0 %v2999_v11, 280 }
 0x587   :  { %3051 = vbcast.lane.b32.xlu1 %v3037_v48, 280  ;;  %3032 = vbcast.lane.b32.xlu0 %v3018_v16, 280 }
 0x5bd   :  { %v2911_v29 = vpop.permute.xlu1 %2910  ;;  %v2907_v1 = vpop.permute.xlu0 %2906 }
 0x5be   :  { %v3054_v39 = vsub.f32 %v2911_v29, %v5557_v51  ;;  %v3053_v20 = vsub.f32 %v2907_v1, %v5560_v32 }
 0x5c0   :  { %v3086_v7 = vmul.f32 %v5565_v31, %v3054_v39  ;;  %v3085_v41 = vmul.f32 %v5568_v57, %v3053_v20 }
 0x5c1   :  { %v2930_v27 = vpop.permute.xlu1 %2929  ;;  %v2926_v53 = vpop.permute.xlu0 %2925 }
 0x5c2   :  { %v3058_v43 = vsub.f32 %v2930_v27, %v5557_v51  ;;  %v3057_v63 = vsub.f32 %v2926_v53, %v5560_v32  ;;  %3776 = vtanh.f32 %v3086_v7 }
 0x5c3   :  { %3778 = vtanh.f32 %v3085_v41  ;;  %v6207_v41 = vld [vmem:[#allocation25_spill] sm:$0xff] }
 0x5c4   :  { %v3090_v17 = vmul.f32 %v5565_v31, %v3058_v43  ;;  %v3089_v47 = vmul.f32 %v5568_v57, %v3057_v63 }
 0x5c5   :  { %v2949_v40 = vpop.permute.xlu1 %2948  ;;  %v2945_v42 = vpop.permute.xlu0 %2944 }
 0x5c6   :  { %v3062_v15 = vsub.f32 %v2949_v40, %v5557_v51  ;;  %v3061_v24 = vsub.f32 %v2945_v42, %v5560_v32  ;;  %3780 = vtanh.f32 %v3090_v17  ;;  %v6205_v42 = vld [vmem:[#allocation32_spill] sm:$0xff] }
 0x5c8   :  { %v3094_v33 = vmul.f32 %v5565_v31, %v3062_v15  ;;  %v3093_v46 = vmul.f32 %v5568_v57, %v3061_v24 }
 0x5c9   :  { %v2934_v49 = vpop.permute.xlu1 %2933  ;;  %v2915_v38 = vpop.permute.xlu0 %2914 }
 0x5ca   :  { %v3055_v50 = vsub.f32 %v2915_v38, %v5573_v58  ;;  %v3059_v6 = vsub.f32 %v2934_v49, %v5573_v58  ;;  %v6206_v38 = vld [vmem:[#allocation33_spill] sm:$0xff] }
 0x5cc   :  { %v3087_v45 = vmul.f32 %v5580_v23, %v3055_v50  ;;  %v3091_v59 = vmul.f32 %v5580_v23, %v3059_v6  ;;  %v3777_v55 = vpop.eup %3776 }
 0x5cd   :  { %v2968_v18 = vpop.permute.xlu1 %2967  ;;  %v2964_v12 = vpop.permute.xlu0 %2963  ;;  %v3150_v27 = vmul.f32 %v5610_v10, %v3777_v55 }
 0x5ce   :  { %v3066_v60 = vsub.f32 %v2968_v18, %v5557_v51  ;;  %v3065_v8 = vsub.f32 %v2964_v12, %v5560_v32  ;;  %3782 = vtanh.f32 %v3087_v45  ;;  %v3779_v16 = vpop.eup %3778 }
 0x5cf   :  { %3784 = vtanh.f32 %v3089_v47  ;;  %v3149_v49 = vmul.f32 %v6205_v42, %v3779_v16  ;;  %v3253_v39 = vmul.f32 %v6206_v38, %v3779_v16 }
 0x5d0   :  { %3786 = vtanh.f32 %v3094_v33  ;;  %v3098_v25 = vmul.f32 %v5565_v31, %v3066_v60  ;;  %v3097_v36 = vmul.f32 %v5568_v57, %v3065_v8  ;;  %v3781_v1 = vpop.eup %3780 }
 0x5d1   :  { %v2983_v26 = vpop.permute.xlu1 %2982  ;;  %v2953_v56 = vpop.permute.xlu0 %2952  ;;  %v3154_v24 = vmul.f32 %v5610_v10, %v3781_v1 }
 0x5d2   :  { %v3069_v9 = vsub.f32 %v2983_v26, %v5560_v32  ;;  %v3063_v61 = vsub.f32 %v2953_v56, %v5573_v58  ;;  %v3181_v56 = vadd.f32 %v3150_v27, %v3149_v49  ;;  %v5895_v49 = vld [vmem:[#allocation13 + $0x10] sm:$0xff] }
 0x5d4   :  { %v3101_v30 = vmul.f32 %v5568_v57, %v3069_v9  ;;  %v3095_v22 = vmul.f32 %v5580_v23, %v3063_v61  ;;  %v6204_v57 = vld [vmem:[#allocation27_spill] sm:$0xff] }
 0x5d5   :  { %v2919_v21 = vpop.permute.xlu1 %2918  ;;  %v2987_v62 = vpop.permute.xlu0 %2986  ;;  %v3254_v40 = vmul.f32 %v6204_v57, %v3777_v55  ;;  %v3258_v45 = vmul.f32 %v6204_v57, %v3781_v1 }
 0x5d6   :  { %v3056_v28 = vsub.f32 %v2919_v21, %v5584_v19  ;;  %v3070_v54 = vsub.f32 %v2987_v62, %v5557_v51 }
 0x5d7   :  { %v3285_v17 = vadd.f32 %v3254_v40, %v3253_v39 }
 0x5d8   :  { %v3088_v44 = vmul.f32 %v5590_v5, %v3056_v28  ;;  %v3102_v48 = vmul.f32 %v5565_v31, %v3070_v54  ;;  %v3783_v53 = vpop.eup %3782  ;;  %v5872_v28 = vld [vmem:[#allocation14 + $0x8] sm:$0xff] }
 0x5d9   :  { %v2972_v13 = vpop.permute.xlu1 %2971  ;;  %v2938_v2 = vpop.permute.xlu0 %2937  ;;  %v3255_v63 = vmul.f32 %v6207_v41, %v3783_v53 }
 0x5da   :  { %3788 = vtanh.f32 %v3088_v44  ;;  %v3060_v35 = vsub.f32 %v2938_v2, %v5584_v19  ;;  %v3067_v29 = vsub.f32 %v2972_v13, %v5573_v58  ;;  %v3785_v12 = vpop.eup %3784  ;;  %v5882_v13 = vld [vmem:[#allocation14] sm:$0xff] }
 0x5db   :  { %3790 = vtanh.f32 %v3093_v46  ;;  %v3787_v31 = vpop.eup %3786  ;;  %v3257_v62 = vmul.f32 %v6206_v38, %v3785_v12  ;;  %v3286_v44 = vadd.f32 %v3285_v17, %v3255_v63  ;;  %v5909_v17 = vld [vmem:[#allocation13] sm:$0xff] }
 0x5dc   :  { %3792 = vtanh.f32 %v3091_v59  ;;  %v3092_v4 = vmul.f32 %v5590_v5, %v3060_v35  ;;  %v3099_v58 = vmul.f32 %v5580_v23, %v3067_v29  ;;  %v3158_v8 = vmul.f32 %v5610_v10, %v3787_v31 }
 0x5dd   :  { %3794 = vtanh.f32 %v3098_v25  ;;  %v3006_v11 = vpop.permute.xlu1 %3005  ;;  %v3002_v34 = vpop.permute.xlu0 %3001  ;;  %v5879_v25 = vld [vmem:[%s6077_s9 + $0x18] sm:$0xff] }
 0x5de   :  { %3796 = vtanh.f32 %v3097_v36  ;;  %v3074_v43 = vsub.f32 %v3006_v11, %v5557_v51  ;;  %v3073_v15 = vsub.f32 %v3002_v34, %v5560_v32  ;;  %v3153_v51 = vmul.f32 %v6205_v42, %v3785_v12 }
 0x5df   :  { %3798 = vtanh.f32 %v3101_v30  ;;  %v3262_v36 = vmul.f32 %v6204_v57, %v3787_v31 }
 0x5e0   :  { %3800 = vtanh.f32 %v3092_v4  ;;  %v3106_v46 = vmul.f32 %v5872_v28, %v3074_v43  ;;  %v3105_v2 = vmul.f32 %v5882_v13, %v3073_v15  ;;  %v3190_v11 = vadd.f32 %v3154_v24, %v3153_v51  ;;  %v5899_v43 = vld [vmem:[#allocation13 + $0x8] sm:$0xff] }
 0x5e1   :  { %v5853_v20 = vpop.permute.xlu1 %2990  ;;  %v2957_v18 = vpop.permute.xlu0 %2956  ;;  %3802 = vtanh.f32 %v3095_v22 }
 0x5e2   :  { %3804 = vtanh.f32 %v3102_v48  ;;  %v3064_v7 = vsub.f32 %v2957_v18, %v5584_v19  ;;  %v6208_v19 = vld [vmem:[#allocation24_spill] sm:$0xff]  ;;  %v3294_v48 = vadd.f32 %v3258_v45, %v3257_v62  ;;  %v3071_v39 = vsub.f32 %v5853_v20, %v5895_v49 }
 0x5e3   :  { %v3151_v33 = vmul.f32 %v6208_v19, %v3783_v53  ;;  %3806 = vtanh.f32 %v3099_v58 }
 0x5e4   :  { %v3789_v50 = vpop.eup %3788  ;;  %v3096_v32 = vmul.f32 %v5590_v5, %v3064_v7 }
 0x5e5   :  { %v3791_v26 = vpop.eup %3790  ;;  %v5862_v47 = vpop.permute.xlu1 %3024  ;;  %v3256_v60 = vmul.f32 %v5656_v14, %v3789_v50  ;;  %v3152_v5 = vmul.f32 %v5879_v25, %v3789_v50  ;;  %v3182_v34 = vadd.f32 %v3181_v56, %v3151_v33 }
 0x5e6   :  { %v5864_v6 = vpop.permute.xlu0 %3020  ;;  %v3793_v23 = vpop.eup %3792  ;;  %v3157_v9 = vmul.f32 %v6205_v42, %v3791_v26  ;;  %v3261_v61 = vmul.f32 %v6206_v38, %v3791_v26  ;;  %3808 = vtanh.f32 %v3096_v32  ;;  %v3078_v7 = vsub.f32 %v5862_v47, %v5899_v43  ;;  %v5918_v32 = vld [vmem:[#allocation14 + $0x10] sm:$0xff] }
 0x5e7   :  { %v3795_v21 = vpop.eup %3794  ;;  %v3155_v54 = vmul.f32 %v6208_v19, %v3793_v23  ;;  %v3259_v35 = vmul.f32 %v6207_v41, %v3793_v23  ;;  %v3287_v16 = vadd.f32 %v3286_v44, %v3256_v60  ;;  %3810 = vtanh.f32 %v3106_v46  ;;  %v5924_v46 = vld [vmem:[#allocation13 + $0x18] sm:$0xff] }
 0x5e8   :  { %v3797_v59 = vpop.eup %3796  ;;  %v3162_v29 = vmul.f32 %v5610_v10, %v3795_v21  ;;  %v3199_v53 = vadd.f32 %v3158_v8, %v3157_v9  ;;  %v3183_v40 = vadd.f32 %v3182_v34, %v3152_v5  ;;  %3812 = vtanh.f32 %v3105_v2 }
 0x5e9   :  { %v5889_v30 = vpop.permute.xlu1 %3009  ;;  %v3799_v4 = vpop.eup %3798  ;;  %v3161_v1 = vmul.f32 %v6205_v42, %v3797_v59  ;;  %v3303_v12 = vadd.f32 %v3262_v36, %v3261_v61  ;;  %v3191_v31 = vadd.f32 %v3190_v11, %v3155_v54  ;;  %v3295_v58 = vadd.f32 %v3294_v48, %v3259_v35  ;;  %v3902_v48 = vld [vmem:[#allocation14 + $0x18] sm:$0xff] }
 0x5ea   :  { %v5891_v55 = vpop.permute.xlu0 %2975  ;;  %v3801_v22 = vpop.eup %3800  ;;  %v3266_v15 = vmul.f32 %v6204_v57, %v3795_v21  ;;  %v3288_v26 = vrot.slane %v3287_v16, 4  ;;  %v3077_v20 = vsub.f32 %v5864_v6, %v5909_v17  ;;  %v3265_v45 = vmul.f32 %v6206_v38, %v3797_v59 }
 0x5eb   :  { %v3803_v27 = vpop.eup %3802  ;;  %v3260_v56 = vmul.f32 %v5656_v14, %v3801_v22  ;;  %v3208_v24 = vadd.f32 %v3162_v29, %v3161_v1  ;;  %v3165_v51 = vmul.f32 %v6205_v42, %v3799_v4  ;;  %v3184_v33 = vrot.slane %v3183_v40, 4 }
 0x5ec   :  { %v3805_v18 = vpop.eup %3804  ;;  %v3159_v23 = vmul.f32 %v6208_v19, %v3803_v27  ;;  %v3263_v47 = vmul.f32 %v6207_v41, %v3803_v27  ;;  %v3103_v21 = vmul.f32 %v5918_v32, %v3071_v39  ;;  %v3156_v6 = vmul.f32 %v5879_v25, %v3801_v22 }
 0x5ed   :  { %v5903_v50 = vpop.permute.xlu1 %3043  ;;  %v3166_v60 = vmul.f32 %v5610_v10, %v3805_v18  ;;  %v3807_v62 = vpop.eup %3806  ;;  %v3270_v8 = vmul.f32 %v6204_v57, %v3805_v18  ;;  %v3110_v38 = vmul.f32 %v5872_v28, %v3078_v7  ;;  %v3068_v41 = vsub.f32 %v5891_v55, %v5924_v46  ;;  %v5933_v57 = vld [vmem:[#allocation16] sm:$0xff]  ;;  %v5944_v18 = vld [vmem:[#allocation16 + $0x10] sm:$0xff] }
 0x5ee   :  { %v5905_v63 = vpop.permute.xlu0 %3039  ;;  %v3289_v9 = vadd.f32 %v3288_v26, %v3287_v16  ;;  %v3296_v10 = vadd.f32 %v3295_v58, %v3260_v56  ;;  %v3109_v44 = vmul.f32 %v5882_v13, %v3077_v20  ;;  %v3075_v5 = vsub.f32 %v5889_v30, %v5895_v49  ;;  %v5958_v56 = vld [vmem:[#allocation16 + $0x8] sm:$0xff] }
 0x5ef   :  { %v5931_v2 = vadd.f32 %v3266_v15, %v3265_v45  ;;  %v3269_v36 = vmul.f32 %v5933_v57, %v3799_v4  ;;  %v5936_v61 = vadd.f32 %v3199_v53, %v3159_v23  ;;  %v3304_v54 = vadd.f32 %v3303_v12, %v3263_v47  ;;  %v5955_v15 = vld [vmem:[%s6077_s9 + $0x8] sm:$0xff] }
 0x5f0   :  { %v3809_v35 = vpop.eup %3808  ;;  %v3185_v55 = vadd.f32 %v3184_v33, %v3183_v40  ;;  %v5938_v11 = vadd.f32 %v3166_v60, %v3165_v51  ;;  %v3163_v34 = vmul.f32 %v6208_v19, %v3807_v62  ;;  %3814 = vtanh.f32 %v3103_v21 }
 0x5f1   :  { %v3029_v42 = vpop.permute.xlu1 %3028  ;;  %v3811_v16 = vpop.eup %3810  ;;  %v5941_v22 = vadd.f32 %v3270_v8, %v3269_v36  ;;  %v3192_v30 = vadd.f32 %v3191_v31, %v3156_v6  ;;  %3816 = vtanh.f32 %v3110_v38  ;;  %v3100_v29 = vmul.f32 %v3902_v48, %v3068_v41 }
 0x5f2   :  { %v2995_v59 = vpop.permute.xlu0 %2994  ;;  %v3813_v27 = vpop.eup %3812  ;;  %v3290_v4 = vrot.slane %v3289_v9, 2  ;;  %v3297_v53 = vrot.slane %v3296_v10, 4  ;;  %3818 = vtanh.f32 %v3109_v44  ;;  %v3107_v39 = vmul.f32 %v5918_v32, %v3075_v5 }
 0x5f3   :  { %v3267_v19 = vmul.f32 %v5944_v18, %v3807_v62  ;;  %v3264_v12 = vmul.f32 %v5656_v14, %v3809_v35  ;;  %3820 = vtanh.f32 %v3100_v29  ;;  %v3082_v31 = vsub.f32 %v5903_v50, %v5899_v43  ;;  %v5964_v14 = vld [vmem:[%s6077_s9] sm:$0xff] }
 0x5f4   :  { %v3186_v58 = vrot.slane %v3185_v55, 2  ;;  %v5950_v7 = vadd.f32 %v3208_v24, %v3163_v34  ;;  %v3170_v26 = vmul.f32 %v5955_v15, %v3811_v16  ;;  %v3274_v20 = vmul.f32 %v5958_v56, %v3811_v16 }
 0x5f5   :  { %v3048_v1 = vpop.permute.xlu1 %3047  ;;  %v3193_v45 = vrot.slane %v3192_v30, 4  ;;  %v3169_v43 = vmul.f32 %v5964_v14, %v3813_v27  ;;  %v3114_v50 = vmul.f32 %v5872_v28, %v3082_v31  ;;  %v3081_v24 = vsub.f32 %v5905_v63, %v5909_v17 }
 0x5f6   :  { %v3014_v40 = vpop.permute.xlu0 %3013  ;;  %v3291_v23 = vadd.f32 %v3290_v4, %v3289_v9  ;;  %v3298_v47 = vadd.f32 %v3297_v53, %v3296_v10  ;;  %3822 = vtanh.f32 %v3107_v39  ;;  %v3079_v51 = vsub.f32 %v3029_v42, %v5895_v49  ;;  %v3907_v39 = vld [vmem:[%s6077_s9 + $0x10] sm:$0xff]  ;;  %s4152_s9 = smov [#allocation17]  }
 0x5f7   :  { %v3305_v60 = vadd.f32 %v3304_v54, %v3264_v12  ;;  %v3113_v21 = vmul.f32 %v5882_v13, %v3081_v24  ;;  %v3072_v62 = vsub.f32 %v2995_v59, %v5924_v46  ;;  %v3083_v8 = vsub.f32 %v3048_v1, %v5895_v49  ;;  %s3402_s27 = sshll.u32 %s4152_s9, 4  ;;  %s3403_s27 = int_to_ptr.vmem [resolvable:$true] %s3402_s27 }
 0x5f8   :  { %v3160_v6 = vmul.f32 %v5879_v25, %v3809_v35  ;;  %3824 = vtanh.f32 %v3114_v50  ;;  %v3111_v28 = vmul.f32 %v5918_v32, %v3079_v51  ;;  %v3076_v63 = vsub.f32 %v3014_v40, %v5924_v46  ;;  %s4107_s26 = scalar_lea.vmem %s3403_s27, 128  ;;  %p4112_p3 = scmp.lt.s32.totalorder %s3403_s27, %s3403_s27 }
 0x5f9   :  { %v3052_v33 = vpop.permute.xlu1 %3051  ;;  %3826 = vtanh.f32 %v3113_v21  ;;  %v3104_v38 = vmul.f32 %v3902_v48, %v3072_v62  ;;  %v3115_v41 = vmul.f32 %v5918_v32, %v3083_v8  ;;  %v3194_v13 = vadd.f32 %v3193_v45, %v3192_v30  ;;  %p4108_p2 = scmp.ne.s32.totalorder %s3403_s27, %s4107_s26  ;;  %p4113_p4 = scmp.lt.s32.totalorder %s4107_s26, %s4107_s26 }
 0x5fa   :  { %v3033_v17 = vpop.permute.xlu0 %3032  ;;  %v3084_v42 = vsub.f32 %v3052_v33, %v5924_v46  ;;  %v3815_v9 = vpop.eup %3814  ;;  %v3299_v10 = vrot.slane %v3298_v47, 2  ;;  %v3273_v59 = vmul.f32 %v5933_v57, %v3813_v27  ;;  %3828 = vtanh.f32 %v3111_v28 }
 0x5fb   :  { %v3817_v49 = vpop.eup %3816  ;;  %v3306_v44 = vrot.slane %v3305_v60, 4  ;;  %3830 = vtanh.f32 %v3104_v38  ;;  %v3108_v5 = vmul.f32 %v3902_v48, %v3076_v63  ;;  %v3080_v36 = vsub.f32 %v3033_v17, %v5924_v46  ;;  %p4114_p5 = por %p4113_p4, %p4112_p3 }
 0x5fc   :  { %v3819_v54 = vpop.eup %3818  ;;  %v5981_v35 = vadd.f32 %v3186_v58, %v3185_v55  ;;  %v3313_v34 = vadd.f32 %v5931_v2, %v3267_v19  ;;  %v3201_v32 = vadd.f32 %v5936_v61, %v3160_v6  ;;  %v3116_v16 = vmul.f32 %v3902_v48, %v3084_v42  ;;  %v5991_v19 = vld [vmem:[#allocation16 + $0x18] sm:$0xff] }
 0x5fd   :  { %v3821_v29 = vpop.eup %3820  ;;  %v3292_v30 = vrot.slane %v3291_v23, 1  ;;  %v3226_v1 = vadd.f32 %v3170_v26, %v3169_v43  ;;  %3832 = vtanh.f32 %v3115_v41  ;;  %v3112_v27 = vmul.f32 %v3902_v48, %v3080_v36  ;;  %p4115_p6 = pnand %p4114_p5, %p4108_p2 }
 0x5fe   :  { %v3195_v4 = vrot.slane %v3194_v13, 2  ;;  %v3330_v53 = vadd.f32 %v3274_v20, %v3273_v59  ;;  %v3167_v46 = vmul.f32 %v3907_v39, %v3815_v9  ;;  %v3271_v55 = vmul.f32 %v5944_v18, %v3815_v9 }
 0x5ff   :  { %v5989_v40 = vadd.f32 %v3299_v10, %v3298_v47  ;;  %v3307_v2 = vadd.f32 %v3306_v44, %v3305_v60  ;;  %v3268_v61 = vmul.f32 %v5991_v19, %v3821_v29  ;;  %3834 = vtanh.f32 %v3108_v5 }
 0x600   :  { %v3823_v12 = vpop.eup %3822  ;;  %v3202_v31 = vrot.slane %v3201_v32, 4  ;;  %v3174_v48 = vmul.f32 %v5955_v15, %v3817_v49  ;;  %v3173_v58 = vmul.f32 %v5964_v14, %v3819_v54  ;;  %3836 = vtanh.f32 %v3116_v16 }
 0x601   :  { %v5996_v26 = vadd.f32 %v3292_v30, %v3291_v23  ;;  %v3164_v20 = vmul.f32 %v5879_v25, %v3821_v29  ;;  %v3314_v45 = vadd.f32 %v3313_v34, %v3268_v61  ;;  %3838 = vtanh.f32 %v3112_v27 }
 0x602   :  { %v3825_v43 = vpop.eup %3824  ;;  %v5999_v50 = vadd.f32 %v3195_v4, %v3194_v13  ;;  %v3218_v24 = vadd.f32 %v5938_v11, %v3167_v46  ;;  %v3322_v47 = vadd.f32 %v5941_v22, %v3271_v55  ;;  %v3278_v51 = vmul.f32 %v5958_v56, %v3817_v49 }
 0x603   :  { %v3827_v33 = vpop.eup %3826  ;;  %v3308_v60 = vrot.slane %v3307_v2, 2  ;;  %v3277_v21 = vmul.f32 %v5933_v57, %v3819_v54  ;;  %v3171_v62 = vmul.f32 %v3907_v39, %v3823_v12  ;;  %v3315_v23 = vrot.slane %v3314_v45, 4 }
 0x604   :  { %v3829_v8 = vpop.eup %3828  ;;  %v3301_v6 = vrot.slane %v5989_v40, 1  ;;  %v6006_v28 = vadd.f32 %v3202_v31, %v3201_v32  ;;  %v3235_v63 = vadd.f32 %v3174_v48, %v3173_v58  ;;  %v3275_v17 = vmul.f32 %v5944_v18, %v3823_v12 }
 0x605   :  { %v3831_v38 = vpop.eup %3830  ;;  %v3210_v11 = vadd.f32 %v5950_v7, %v3164_v20  ;;  %v3178_v22 = vmul.f32 %v5955_v15, %v3825_v43  ;;  %v3282_v41 = vmul.f32 %v5958_v56, %v3825_v43  ;;  %v3177_v42 = vmul.f32 %v5964_v14, %v3827_v33 }
 0x606   :  { %v3316_v9 = vadd.f32 %v3315_v23, %v3314_v45  ;;  %v3281_v13 = vmul.f32 %v5933_v57, %v3827_v33  ;;  %v3175_v10 = vmul.f32 %v3907_v39, %v3829_v8  ;;  %v3168_v59 = vmul.f32 %v5879_v25, %v3831_v38 }
 0x607   :  { %v3833_v49 = vpop.eup %3832  ;;  %v6015_v44 = vadd.f32 %v3308_v60, %v3307_v2  ;;  %v3339_v5 = vadd.f32 %v3278_v51, %v3277_v21  ;;  %v3227_v36 = vadd.f32 %v3226_v1, %v3171_v62  ;;  %v3272_v54 = vmul.f32 %v5991_v19, %v3831_v38 }
 0x608   :  { %v3331_v7 = vadd.f32 %v3330_v53, %v3275_v17  ;;  %v3219_v34 = vadd.f32 %v3218_v24, %v3168_v59  ;;  %v3179_v15 = vmul.f32 %v3907_v39, %v3833_v49  ;;  %v3283_v56 = vmul.f32 %v5944_v18, %v3833_v49 }
 0x609   :  { %v3835_v32 = vpop.eup %3834  ;;  %v3211_v14 = vrot.slane %v3210_v11, 4  ;;  %v3244_v16 = vadd.f32 %v3178_v22, %v3177_v42  ;;  %v3279_v57 = vmul.f32 %v5944_v18, %v3829_v8  ;;  %v3323_v29 = vadd.f32 %v3322_v47, %v3272_v54 }
 0x60a   :  { %v3837_v30 = vpop.eup %3836  ;;  %v3317_v27 = vrot.slane %v3316_v9, 2  ;;  %v3348_v4 = vadd.f32 %v3282_v41, %v3281_v13  ;;  %v3236_v46 = vadd.f32 %v3235_v63, %v3175_v10  ;;  %v3220_v55 = vrot.slane %v3219_v34, 4 }
 0x60b   :  { %v3839_v2 = vpop.eup %3838  ;;  %v3324_v1 = vrot.slane %v3323_v29, 4  ;;  %v3245_v61 = vadd.f32 %v3244_v16, %v3179_v15  ;;  %v3172_v53 = vmul.f32 %v5879_v25, %v3835_v32  ;;  %v3276_v39 = vmul.f32 %v5991_v19, %v3835_v32 }
 0x60c   :  { %v3349_v12 = vadd.f32 %v3348_v4, %v3283_v56  ;;  %v3180_v31 = vmul.f32 %v5879_v25, %v3837_v30  ;;  %v3284_v48 = vmul.f32 %v5991_v19, %v3837_v30  ;;  %v3176_v18 = vmul.f32 %v5879_v25, %v3839_v2 }
 0x60d   :  { %v3212_v58 = vadd.f32 %v3211_v14, %v3210_v11  ;;  %v3325_v20 = vadd.f32 %v3324_v1, %v3323_v29  ;;  %v3228_v45 = vadd.f32 %v3227_v36, %v3172_v53  ;;  %v3332_v43 = vadd.f32 %v3331_v7, %v3276_v39 }
 0x60e   :  { %v3340_v24 = vadd.f32 %v3339_v5, %v3279_v57  ;;  %v3246_v47 = vadd.f32 %v3245_v61, %v3180_v31  ;;  %v3350_v51 = vadd.f32 %v3349_v12, %v3284_v48  ;;  %v3237_v33 = vadd.f32 %v3236_v46, %v3176_v18 }
 0x60f   :  { %v3326_v60 = vrot.slane %v3325_v20, 2  ;;  %v3229_v21 = vrot.slane %v3228_v45, 4  ;;  %v3333_v62 = vrot.slane %v3332_v43, 4  ;;  %v3280_v23 = vmul.f32 %v5991_v19, %v3839_v2 }
 0x610   :  { %v3318_v8 = vadd.f32 %v3317_v27, %v3316_v9  ;;  %v3221_v63 = vadd.f32 %v3220_v55, %v3219_v34  ;;  %v3351_v17 = vrot.slane %v3350_v51, 4  ;;  %v3238_v38 = vrot.slane %v3237_v33, 4 }
 0x611   :  { %v3327_v22 = vadd.f32 %v3326_v60, %v3325_v20  ;;  %v3230_v41 = vadd.f32 %v3229_v21, %v3228_v45  ;;  %v3334_v25 = vadd.f32 %v3333_v62, %v3332_v43  ;;  %v3341_v11 = vadd.f32 %v3340_v24, %v3280_v23 }
 0x612   :  { %v3204_v42 = vrot.slane %v6006_v28, 2  ;;  %v3352_v13 = vadd.f32 %v3351_v17, %v3350_v51  ;;  %v3239_v10 = vadd.f32 %v3238_v38, %v3237_v33  ;;  %v3247_v59 = vrot.slane %v3246_v47, 4 }
 0x613   :  { %v3310_v49 = vrot.slane %v6015_v44, 1  ;;  %v3213_v5 = vrot.slane %v3212_v58, 2  ;;  %v3335_v36 = vrot.slane %v3334_v25, 2  ;;  %v3342_v54 = vrot.slane %v3341_v11, 4 }
 0x614   :  { %v3319_v7 = vrot.slane %v3318_v8, 1  ;;  %v3222_v19 = vrot.slane %v3221_v63, 2  ;;  %v3328_v9 = vrot.slane %v3327_v22, 1  ;;  %v3353_v34 = vrot.slane %v3352_v13, 2 }
 0x615   :  { %v3336_v15 = vadd.f32 %v3335_v36, %v3334_v25  ;;  %v3343_v56 = vadd.f32 %v3342_v54, %v3341_v11  ;;  %v3231_v32 = vrot.slane %v3230_v41, 2  ;;  %v3248_v14 = vadd.f32 %v3247_v59, %v3246_v47 }
 0x616   :  { %v3302_v16 = vadd.f32 %v3301_v6, %v5989_v40  ;;  %v3205_v57 = vadd.f32 %v3204_v42, %v6006_v28  ;;  %v3354_v29 = vadd.f32 %v3353_v34, %v3352_v13  ;;  %v3240_v30 = vrot.slane %v3239_v10, 2 }
 0x617   :  { %v3311_v27 = vadd.f32 %v3310_v49, %v6015_v44  ;;  %v3214_v4 = vadd.f32 %v3213_v5, %v3212_v58  ;;  %v3337_v46 = vrot.slane %v3336_v15, 1  ;;  %v3344_v55 = vrot.slane %v3343_v56, 2 }
 0x618   :  { %v3197_v2 = vrot.slane %v5999_v50, 1  ;;  %v3320_v1 = vadd.f32 %v3319_v7, %v3318_v8  ;;  %v3355_v61 = vrot.slane %v3354_v29, 1  ;;  %v3223_v53 = vadd.f32 %v3222_v19, %v3221_v63 }
 0x619   :  { %v3329_v39 = vadd.f32 %v3328_v9, %v3327_v22  ;;  %v3345_v12 = vadd.f32 %v3344_v55, %v3343_v56  ;;  %v3232_v31 = vadd.f32 %v3231_v32, %v3230_v41  ;;  %v3249_v48 = vrot.slane %v3248_v14, 2 }
 0x61a   :  { %v3384_v40 = vsel %vm310_vm0, %v3302_v16, %v5996_v26  ;;  %v3206_v6 = vrot.slane %v3205_v57, 1  ;;  %v3338_v28 = vadd.f32 %v3337_v46, %v3336_v15  ;;  %v3241_v18 = vadd.f32 %v3240_v30, %v3239_v10 }
 0x61b   :  { %v3188_v44 = vrot.slane %v5981_v35, 1  ;;  %v3385_v58 = vsel %vm312_vm1, %v3311_v27, %v3384_v40  ;;  %v3215_v20 = vrot.slane %v3214_v4, 1  ;;  %v3346_v45 = vrot.slane %v3345_v12, 1 }
 0x61c   :  { %v3198_v43 = vadd.f32 %v3197_v2, %v5999_v50  ;;  %v3224_v24 = vrot.slane %v3223_v53, 1  ;;  %v3356_v47 = vadd.f32 %v3355_v61, %v3354_v29  ;;  %v3386_v51 = vsel %vm314_vm2, %v3320_v1, %v3385_v58 }
 0x61d   :  { %v3347_v33 = vadd.f32 %v3346_v45, %v3345_v12  ;;  %v3233_v60 = vrot.slane %v3232_v31, 1  ;;  %v3250_v21 = vadd.f32 %v3249_v48, %v3248_v14  ;;  %v3387_v26 = vsel %vm316_vm3, %v3329_v39, %v3386_v51 }
 0x61e   :  { %v3207_v62 = vadd.f32 %v3206_v6, %v3205_v57  ;;  %v3242_v23 = vrot.slane %v3241_v18, 1  ;;  %v3388_v8 = vsel %vm318_vm4, %v3338_v28, %v3387_v26  ;;  %v3189_v63 = vadd.f32 %v3188_v44, %v5981_v35 }
 0x61f   :  { %v3216_v17 = vadd.f32 %v3215_v20, %v3214_v4  ;;  %v3389_v38 = vsel %vm320_vm5, %v3347_v33, %v3388_v8  ;;  %v3225_v22 = vadd.f32 %v3224_v24, %v3223_v53  ;;  %v3234_v41 = vadd.f32 %v3233_v60, %v3232_v31 }
 0x620   :  { %v3390_v50 = vsel %vm322_vm6, %v3356_v47, %v3389_v38  ;;  %v3251_v25 = vrot.slane %v3250_v21, 1  ;;  %v3367_v11 = vsel %vm310_vm0, %v3198_v43, %v3189_v63  ;;  %v3243_v13 = vadd.f32 %v3242_v23, %v3241_v18 }
 0x621   :  { %v3392_v42 = vadd.f32 %v3390_v50, %v4736_v0  ;;  %v3368_v10 = vsel %vm312_vm1, %v3207_v62, %v3367_v11  ;;  %v3357_v36 = vmul.f32 %v5793_v3, %v5800_v37 }
 0x622   :  { %v3369_v59 = vsel %vm314_vm2, %v3216_v17, %v3368_v10  ;;  %v3252_v49 = vadd.f32 %v3251_v25, %v3250_v21 }
 0x623   :  { %3840 = vrcp.f32 %v3392_v42  ;;  %v3370_v35 = vsel %vm316_vm3, %v3225_v22, %v3369_v59  ;;  %v3358_v0 = vadd.f32 %v3357_v36, %v4767_v52 }
 0x624   :  { %v3371_v5 = vsel %vm318_vm4, %v3234_v41, %v3370_v35 }
 0x625   :  { %v3372_v54 = vsel %vm320_vm5, %v3243_v13, %v3371_v5 }
 0x626   :  { %v3373_v7 = vsel %vm322_vm6, %v3252_v49, %v3372_v54 }
 0x627   :  { %v3375_v19 = vadd.f32 %v3373_v7, %v3358_v0 }
 0x62d   :  { %v3841_v9 = vpop.eup %3840 }
 0x62e   :  { %v3394_v34 = vmul.f32 %v3841_v9, %v3375_v19 }
 0x630   :  { %3395 = vst [vmem:[#allocation17] sm:$0xff] %v3394_v34 }
 0x631   :  { %4118 = shalt.err (!%p4115_p6)
}
 0x632   :  { %s4119_s15 = scalar_lea.hbm %s6081_s13, 128 }
 0x633   :  { %p4120_p7 = scmp.ne.s32.totalorder %s6081_s13, %s4119_s15  ;;  %p4123_p8 = scmp.lt.u32.totalorder %s4119_s15, %s6081_s13 }
 0x635   :  { %p4125_p9 = pnand %p4123_p8, %p4120_p7 }
 0x637   :  { %4128 = shalt.err (!%p4125_p9)
}
 0x638   :  { %3405 = dma.vmem_to_hbm [thread:$0]  %s3403_s27, 128, %s6081_s13, [#allocation4]  }
 0x639   :  { %4139 = dma.done.wait [#allocation4], 128  }
 0x63a   :  { %4140 = vsyncadd [#allocation4], 4294967168 }
 0x63b   :  { %3409 = vsyncpa [#allocation3], 1 }
 0x63c   :  { %3410 = vsyncpa [#allocation6], 1 }
 0x63d   :  { %3411 = vsyncpa [#allocation9], 1 }
 0x63e   :  { %3412 = vsyncpa [#allocation12], 1 }
 0x63f   :  { %3413 = vsyncpa [#allocation15], 1 }
 0x640   :  { %3414 = vsyncpa [#allocation4], 1 }

</bundles_post_ra>
